<compile_context>
chip_gen: v7x
topology: tpu7x:2x2x1
jax: 0.10.0
libtpu: 0.0.40
codegen_flags: <defaults>
</compile_context>

<pallas_src>
import functools
import math

import jax
import jax.numpy as jnp
from jax import lax
from jax.experimental import pallas as pl
from jax.experimental.pallas import tpu as pltpu

WEIGHT_DTYPE = jnp.bfloat16   # MXU operand dtype; accumulation is always f32
LN_EPS = 1e-5

_PER_LAYER_KEYS = (
    "norms_g", "norms_b",
    "sa_qkv_w", "sa_qkv_b", "sa_wo", "sa_bo",
    "ca_q_w", "ca_q_b", "ca_kv_w", "ca_kv_b", "ca_wo", "ca_bo",
    "ff_w1", "ff_b1", "ff_w2", "ff_b2",
)
_CONST_KEYS = ("after_norm_g", "after_norm_b", "out_w_pad", "out_b_pad")


# ----------------------------------------------------------------------------
# Kernel: one grid step = (batch block b, decoder layer l)
# ----------------------------------------------------------------------------
def decoder_stack_kernel(
    lens_ref,                                    # SMEM (B,) int32 target lengths
    emb_ref, pe_ref, mem_ref, mm_ref,            # (BB,L,D) (1,L,D) (BB,Lin,D) (BB,1,Lin)
    ng_ref, nb_ref,                              # (1,3,1,D) layernorm gamma/beta for layer l
    sa_qkv_w, sa_qkv_b, sa_wo, sa_bo,            # self-attn fused QKV (Q pre-scaled) + out proj
    ca_q_w, ca_q_b, ca_kv_w, ca_kv_b, ca_wo, ca_bo,   # cross-attn Q (pre-scaled) / fused KV / out
    ff_w1, ff_b1, ff_w2, ff_b2,                  # position-wise FFN
    an_g, an_b, out_w, out_b,                    # after_norm + padded output layer (constant)
    o_ref,                                       # (BB, L, Vpad) bf16
    x_ref,                                       # VMEM scratch (BB*L, D) f32 -- carried over l
    *, num_heads, block_batch):
    bblk = pl.program_id(0)
    l = pl.program_id(1)
    num_layers = pl.num_programs(1)

    BB = block_batch
    L, D = emb_ref.shape[1], emb_ref.shape[2]
    Lin = mem_ref.shape[1]
    T = BB * L
    H = num_heads
    Dh = D // H
    neg_inf = jnp.float32(-1e30)

    def layer_norm(x, g, beta):
        mu = jnp.mean(x, axis=-1, keepdims=True)
        var = jnp.mean(jnp.square(x - mu), axis=-1, keepdims=True)
        return (x - mu) * lax.rsqrt(var + LN_EPS) * g + beta

    def dense(x, w, bias):
        # bf16 MXU operands, f32 accumulation, f32 bias add.
        return jnp.dot(x.astype(w.dtype), w,
                       preferred_element_type=jnp.float32) + bias

    def attention(q3, k3, v3, valid):
        # q3: (BB, Lq, D), k3/v3: (BB, Lk, D), valid broadcastable to (BB, Lq, Lk).
        # 1/sqrt(Dh) already folded into the Q projection at pack time.
        heads = []
        for h in range(H):                       # static over heads, batched over BB sequences
            sl = slice(h * Dh, (h + 1) * Dh)
            qh = q3[:, :, sl].astype(WEIGHT_DTYPE)
            kh = k3[:, :, sl].astype(WEIGHT_DTYPE)
            vh = v3[:, :, sl].astype(WEIGHT_DTYPE)
            s = jnp.einsum("bqd,bkd->bqk", qh, kh,
                           preferred_element_type=jnp.float32)
            s = jnp.where(valid, s, neg_inf)
            p = jnp.exp(s - jnp.max(s, axis=-1, keepdims=True))
            inv = pl.reciprocal(jnp.sum(p, axis=-1, keepdims=True), approx=True)
            heads.append(jnp.einsum("bqk,bkd->bqd", (p * inv).astype(WEIGHT_DTYPE), vh,
                                    preferred_element_type=jnp.float32))
        return jnp.concatenate(heads, axis=-1).reshape(T, D)      # (BB*L, D) f32

    # --- masks built in-kernel (cheap iota/compare; no per-head HBM mask broadcast) ---
    qpos = lax.broadcasted_iota(jnp.int32, (L, L), 0)
    kpos = lax.broadcasted_iota(jnp.int32, (L, L), 1)
    causal = kpos <= qpos
    self_valid = jnp.stack(
        [causal & (kpos < lens_ref[bblk * BB + i]) for i in range(BB)])   # (BB, L, L)
    mem_valid = mm_ref[...] > 0                                           # (BB, 1, Lin)

    @pl.when(l == 0)
    def _init():
        # embedding (pre-scaled by sqrt(D) at pack time) + positional encoding
        x_ref[...] = (emb_ref[...] + pe_ref[...]).reshape(T, D)

    x = x_ref[...]                                                        # (BB*L, D) f32

    # --- self attention (pre-norm, residual) ---
    xn = layer_norm(x, ng_ref[0, 0], nb_ref[0, 0])
    qkv = dense(xn, sa_qkv_w[0], sa_qkv_b[0])                             # (T, 3D)
    ctx = attention(qkv[:, :D].reshape(BB, L, D),
                    qkv[:, D:2 * D].reshape(BB, L, D),
                    qkv[:, 2 * D:].reshape(BB, L, D), self_valid)
    x = x + dense(ctx, sa_wo[0], sa_bo[0])

    # --- cross attention over encoder memory ---
    xn = layer_norm(x, ng_ref[0, 1], nb_ref[0, 1])
    q3 = dense(xn, ca_q_w[0], ca_q_b[0]).reshape(BB, L, D)
    kv = dense(mem_ref[...].reshape(BB * Lin, D),
               ca_kv_w[0], ca_kv_b[0]).reshape(BB, Lin, 2 * D)
    ctx = attention(q3, kv[:, :, :D], kv[:, :, D:], mem_valid)
    x = x + dense(ctx, ca_wo[0], ca_bo[0])

    # --- position-wise feed-forward ---
    xn = layer_norm(x, ng_ref[0, 2], nb_ref[0, 2])
    h1 = jnp.maximum(dense(xn, ff_w1[0], ff_b1[0]), 0.0)
    x = x + dense(h1, ff_w2[0], ff_b2[0])

    x_ref[...] = x                               # carry activation to next layer step

    @pl.when(l == num_layers - 1)
    def _final():
        xn = layer_norm(x, an_g[...], an_b[...])
        logits = dense(xn, out_w[...], out_b[...])                        # (T, Vpad) f32
        o_ref[...] = logits.reshape(BB, L, -1).astype(o_ref.dtype)        # bf16 store


# ----------------------------------------------------------------------------
# Wrapper: one pallas_call per TransformerDecoder forward
# ----------------------------------------------------------------------------
def pick_block_batch(batch, seq_len, target_rows=256):
    """Largest divisor of batch with BB*L <= ~256 rows, preferring >=2 parallel grid steps."""
    divisors = [d for d in range(1, batch + 1) if batch % d == 0]
    fits = [d for d in divisors if d * seq_len <= max(target_rows, seq_len)] or [1]
    multi = [d for d in fits if batch // d >= 2]
    return max(multi) if multi else max(fits)


def transformer_decoder_forward(params, memory, memory_mask, ys_in_pad, ys_in_lens,
                                num_heads):
    B, L = ys_in_pad.shape
    D = params["embed"].shape[1]
    Lin = memory.shape[1]
    V = params["vocab"]
    Vpad = params["out_w_pad"].shape[1]
    nl = params["num_layers"]
    BB = pick_block_batch(B, L)

    # glue: embedding gather (pre-scaled table), PE slice, mask / olens bookkeeping
    emb = jnp.take(params["embed"], ys_in_pad, axis=0)             # (B, L, D)
    pe = params["pe"][None, :L, :]                                 # (1, L, D)
    mem_mask = memory_mask.astype(jnp.int32)                       # (B, 1, Lin)
    lens = ys_in_lens.astype(jnp.int32)                            # (B,) -> SMEM

    layer_ws = [params[k] for k in _PER_LAYER_KEYS]
    const_ws = [params[k] for k in _CONST_KEYS]

    def batch_spec(rest):          # per-batch-block activations (constant over layer axis)
        n = len(rest)
        return pl.BlockSpec((BB,) + tuple(rest),
                            lambda b, l, lens_, _n=n: (b,) + (0,) * _n)

    def layer_spec(arr):           # streamed per-layer weights
        n = arr.ndim - 1
        return pl.BlockSpec((1,) + arr.shape[1:],
                            lambda b, l, lens_, _n=n: (l,) + (0,) * _n)

    def const_spec(arr):           # constant blocks (PE, after_norm, output projection)
        n = arr.ndim
        return pl.BlockSpec(arr.shape, lambda b, l, lens_, _n=n: (0,) * _n)

    in_specs = ([batch_spec((L, D)),            # emb
                 const_spec(pe),                # pe
                 batch_spec((Lin, D)),          # memory
                 batch_spec((1, Lin))]          # memory mask (int32)
                + [layer_spec(w) for w in layer_ws]
                + [const_spec(w) for w in const_ws])

    # VMEM budget: double-buffered per-layer weights + per-batch activations + constants.
    stream_bytes = sum(int(w.nbytes) // nl for w in layer_ws)
    const_bytes = int(pe.nbytes) + sum(int(w.nbytes) for w in const_ws)
    act_bytes = BB * (L * D * 4 + Lin * D * 4 + Lin * 4 + L * Vpad * 2 + L * D * 4)
    est = 2 * (stream_bytes + const_bytes + act_bytes)
    vmem_limit = int(min(64 * 2 ** 20, max(32 * 2 ** 20, 2 * est)))

    kernel = functools.partial(decoder_stack_kernel,
                               num_heads=num_heads, block_batch=BB)

    logits_pad = pl.pallas_call(
        kernel,
        grid_spec=pltpu.PrefetchScalarGridSpec(
            num_scalar_prefetch=1,
            grid=(B // BB, nl),
            in_specs=in_specs,
            out_specs=pl.BlockSpec((BB, L, Vpad), lambda b, l, lens_: (b, 0, 0)),
            scratch_shapes=[pltpu.VMEM((BB * L, D), jnp.float32)],
        ),
        out_shape=jax.ShapeDtypeStruct((B, L, Vpad), jnp.bfloat16),
        compiler_params=pltpu.CompilerParams(
            dimension_semantics=("parallel", "arbitrary"),
            vmem_limit_bytes=vmem_limit),
    )(lens, emb, pe, memory, mem_mask, *layer_ws, *const_ws)

    # slice back to the true vocab; upcast to f32 to preserve the reference output dtype
    logits = logits_pad[:, :, :V].astype(jnp.float32)

    # olens = tgt_mask.sum(1) as in the wenet reference -> (B, L) int
    valid = jnp.arange(L)[None, :] < ys_in_lens[:, None]
    tril = jnp.tril(jnp.ones((L, L), dtype=bool))
    tgt_mask = valid[:, None, :] & tril[None, :, :]
    olens = jnp.sum(tgt_mask.astype(jnp.int32), axis=1)
    return logits, olens


def bi_transformer_decoder_forward(left_params, right_params, memory, memory_mask,
                                   ys_in_pad, ys_in_lens, r_ys_in_pad,
                                   reverse_weight, num_heads):
    l_x, olens = transformer_decoder_forward(
        left_params, memory, memory_mask, ys_in_pad, ys_in_lens, num_heads)
    r_x = jnp.float32(0.0)
    if reverse_weight > 0.0:
        r_x, olens = transformer_decoder_forward(
            right_params, memory, memory_mask, r_ys_in_pad, ys_in_lens, num_heads)
    return l_x, r_x, olens


# ----------------------------------------------------------------------------
# Deterministic parameter construction + packing (fused QKV, stacked layers)
# ----------------------------------------------------------------------------
def make_pe_table(max_len, d_model):
    pos = jnp.arange(max_len, dtype=jnp.float32)[:, None]
    div = jnp.exp(jnp.arange(0, d_model, 2, dtype=jnp.float32)
                  * -(math.log(10000.0) / d_model))
    pe = jnp.zeros((max_len, d_model), jnp.float32)
    pe = pe.at[:, 0::2].set(jnp.sin(pos * div))
    pe = pe.at[:, 1::2].set(jnp.cos(pos * div))
    return pe


def init_decoder_params(key, vocab, d_model, ffn, num_blocks, max_len=256):
    keys = iter(jax.random.split(key, 8 + 32 * max(num_blocks, 1)))

    def dense_init(shape, scl=0.05):
        return scl * jax.random.normal(next(keys), shape, jnp.float32)

    params = {
        "embed": dense_init((vocab, d_model), 0.1),
        "pe": make_pe_table(max_len, d_model),
        "after_norm_g": jnp.ones((d_model,), jnp.float32) + dense_init((d_model,), 0.01),
        "after_norm_b": dense_init((d_model,), 0.01),
        "out_w": dense_init((d_model, vocab)),
        "out_b": dense_init((vocab,)),
        "layers": [],
    }
    for _ in range(num_blocks):
        lyr = {}
        for nm in ("norm1", "norm2", "norm3"):
            lyr[nm + "_g"] = jnp.ones((d_model,), jnp.float32) + dense_init((d_model,), 0.01)
            lyr[nm + "_b"] = dense_init((d_model,), 0.01)
        for pre in ("sa", "ca"):
            for nm in ("q", "k", "v", "o"):
                lyr[f"{pre}_w{nm}"] = dense_init((d_model, d_model))
                lyr[f"{pre}_b{nm}"] = dense_init((d_model,))
        lyr["ff_w1"] = dense_init((d_model, ffn))
        lyr["ff_b1"] = dense_init((ffn,))
        lyr["ff_w2"] = dense_init((ffn, d_model))
        lyr["ff_b2"] = dense_init((d_model,))
        params["layers"].append(lyr)
    return params


def pack_decoder_params(raw, num_heads):
    """Stack per-layer params, fuse QKV / KV, fold sqrt(D) into the embedding and 1/sqrt(Dh)
    into the Q projections, cast matmul weights to bf16, pad output layer to 128-lane vocab."""
    layers = raw["layers"]
    nl = len(layers)
    assert nl >= 1  # TODO(synk): r_num_blocks == 0 (unused right decoder) not packed.
    D = raw["embed"].shape[1]
    V = raw["out_w"].shape[1]
    Vpad = ((V + 127) // 128) * 128
    qscale = 1.0 / math.sqrt(D // num_heads)

    def stack(fn, dtype=None):
        a = jnp.stack([fn(l) for l in layers], axis=0)
        return a.astype(dtype) if dtype is not None else a

    return {
        "num_layers": nl,
        "num_heads": num_heads,
        "vocab": V,
        "embed": raw["embed"] * jnp.float32(math.sqrt(D)),   # PE xscale folded in
        "pe": raw["pe"],
        "norms_g": stack(lambda l: jnp.stack([l["norm1_g"], l["norm2_g"], l["norm3_g"]]))[:, :, None, :],
        "norms_b": stack(lambda l: jnp.stack([l["norm1_b"], l["norm2_b"], l["norm3_b"]]))[:, :, None, :],
        "sa_qkv_w": stack(lambda l: jnp.concatenate(
            [l["sa_wq"] * qscale, l["sa_wk"], l["sa_wv"]], axis=1), WEIGHT_DTYPE),
        "sa_qkv_b": stack(lambda l: jnp.concatenate(
            [l["sa_bq"] * qscale, l["sa_bk"], l["sa_bv"]]))[:, None, :],
        "sa_wo": stack(lambda l: l["sa_wo"], WEIGHT_DTYPE),
        "sa_bo": stack(lambda l: l["sa_bo"])[:, None, :],
        "ca_q_w": stack(lambda l: l["ca_wq"] * qscale, WEIGHT_DTYPE),
        "ca_q_b": stack(lambda l: l["ca_bq"] * qscale)[:, None, :],
        "ca_kv_w": stack(lambda l: jnp.concatenate([l["ca_wk"], l["ca_wv"]], axis=1), WEIGHT_DTYPE),
        "ca_kv_b": stack(lambda l: jnp.concatenate([l["ca_bk"], l["ca_bv"]]))[:, None, :],
        "ca_wo": stack(lambda l: l["ca_wo"], WEIGHT_DTYPE),
        "ca_bo": stack(lambda l: l["ca_bo"])[:, None, :],
        "ff_w1": stack(lambda l: l["ff_w1"], WEIGHT_DTYPE),
        "ff_b1": stack(lambda l: l["ff_b1"])[:, None, :],
        "ff_w2": stack(lambda l: l["ff_w2"], WEIGHT_DTYPE),
        "ff_b2": stack(lambda l: l["ff_b2"])[:, None, :],
        "after_norm_g": raw["after_norm_g"][None, :],
        "after_norm_b": raw["after_norm_b"][None, :],
        "out_w_pad": jnp.pad(raw["out_w"], ((0, 0), (0, Vpad - V))).astype(WEIGHT_DTYPE),
        "out_b_pad": jnp.pad(raw["out_b"], (0, Vpad - V))[None, :],
    }


# ----------------------------------------------------------------------------
if __name__ == "__main__":
    # small config consistent with BiTransformerDecoder.__init__/forward
    VOCAB = 40
    D_MODEL = 32           # encoder_output_size / attention_dim
    HEADS = 4
    FFN = 64               # linear_units
    N_BLOCKS = 2           # left decoder blocks
    R_BLOCKS = 1           # right decoder blocks
    B, L_IN, L_OUT = 2, 16, 8
    REVERSE_WEIGHT = 0.3

    key = jax.random.PRNGKey(0)
    k_mem, k_tok, k_rtok, k_left, k_right = jax.random.split(key, 5)

    memory = jax.random.normal(k_mem, (B, L_IN, D_MODEL), jnp.float32)
    mem_lens = jnp.array([L_IN, 11], jnp.int32)
    memory_mask = (jnp.arange(L_IN)[None, :] < mem_lens[:, None])[:, None, :]  # (B,1,Lin)

    ys_in_pad = jax.random.randint(k_tok, (B, L_OUT), 0, VOCAB, jnp.int32)
    r_ys_in_pad = jax.random.randint(k_rtok, (B, L_OUT), 0, VOCAB, jnp.int32)
    ys_in_lens = jnp.array([L_OUT, 5], jnp.int32)

    left_params = pack_decoder_params(
        init_decoder_params(k_left, VOCAB, D_MODEL, FFN, N_BLOCKS), HEADS)
    right_params = pack_decoder_params(
        init_decoder_params(k_right, VOCAB, D_MODEL, FFN, R_BLOCKS), HEADS)

    l_x, r_x, olens = bi_transformer_decoder_forward(
        left_params, right_params, memory, memory_mask,
        ys_in_pad, ys_in_lens, r_ys_in_pad, REVERSE_WEIGHT, HEADS)

    jax.block_until_ready((l_x, r_x, olens))
    assert l_x.shape == (B, L_OUT, VOCAB)
    assert r_x.shape == (B, L_OUT, VOCAB)
    assert olens.shape == (B, L_OUT)
    # TODO(synk): dropout / forward_one_step (cache path) not exercised (eval-mode forward only).
    print("KERNEL_OK")
</pallas_src>

<mosaic_0001>
module attributes {stable_mosaic.version = 11 : i64} {
  func.func @decoder_stack_kernel(%arg0: i32, %arg1: i32, %arg2: memref<2xi32, #tpu.memory_space<smem>>, %arg3: memref<1x8x32xf32, #tpu.memory_space<vmem>>, %arg4: memref<1x8x32xf32, #tpu.memory_space<vmem>>, %arg5: memref<1x16x32xf32, #tpu.memory_space<vmem>>, %arg6: memref<1x1x16xi32, #tpu.memory_space<vmem>>, %arg7: memref<1x3x1x32xf32, #tpu.memory_space<vmem>>, %arg8: memref<1x3x1x32xf32, #tpu.memory_space<vmem>>, %arg9: memref<1x32x96xbf16, #tpu.memory_space<vmem>>, %arg10: memref<1x1x96xf32, #tpu.memory_space<vmem>>, %arg11: memref<1x32x32xbf16, #tpu.memory_space<vmem>>, %arg12: memref<1x1x32xf32, #tpu.memory_space<vmem>>, %arg13: memref<1x32x32xbf16, #tpu.memory_space<vmem>>, %arg14: memref<1x1x32xf32, #tpu.memory_space<vmem>>, %arg15: memref<1x32x64xbf16, #tpu.memory_space<vmem>>, %arg16: memref<1x1x64xf32, #tpu.memory_space<vmem>>, %arg17: memref<1x32x32xbf16, #tpu.memory_space<vmem>>, %arg18: memref<1x1x32xf32, #tpu.memory_space<vmem>>, %arg19: memref<1x32x64xbf16, #tpu.memory_space<vmem>>, %arg20: memref<1x1x64xf32, #tpu.memory_space<vmem>>, %arg21: memref<1x64x32xbf16, #tpu.memory_space<vmem>>, %arg22: memref<1x1x32xf32, #tpu.memory_space<vmem>>, %arg23: memref<1x32xf32, #tpu.memory_space<vmem>>, %arg24: memref<1x32xf32, #tpu.memory_space<vmem>>, %arg25: memref<32x128xbf16, #tpu.memory_space<vmem>>, %arg26: memref<1x128xf32, #tpu.memory_space<vmem>>, %arg27: memref<1x8x128xbf16, #tpu.memory_space<vmem>>, %arg28: memref<8x32xf32, #tpu.memory_space<vmem>>) attributes {dimension_semantics = [#tpu.dimension_semantics<parallel>, #tpu.dimension_semantics<arbitrary>], iteration_bounds = array<i64: 2, 2>, scalar_prefetch = 1 : i64, scratch_operands = 1 : i64, tpu.core_type = #tpu.core_type<tc>, window_params = [{transform_indices = @transform_0, window_bounds = array<i64: 1, 8, 32>}, {pipeline_mode = #tpu.pipeline_mode<synchronous>, transform_indices = @transform_1, window_bounds = array<i64: 1, 8, 32>}, {transform_indices = @transform_2, window_bounds = array<i64: 1, 16, 32>}, {transform_indices = @transform_3, window_bounds = array<i64: 1, 1, 16>}, {transform_indices = @transform_4, window_bounds = array<i64: 1, 3, 1, 32>}, {transform_indices = @transform_5, window_bounds = array<i64: 1, 3, 1, 32>}, {transform_indices = @transform_6, window_bounds = array<i64: 1, 32, 96>}, {transform_indices = @transform_7, window_bounds = array<i64: 1, 1, 96>}, {transform_indices = @transform_8, window_bounds = array<i64: 1, 32, 32>}, {transform_indices = @transform_9, window_bounds = array<i64: 1, 1, 32>}, {transform_indices = @transform_10, window_bounds = array<i64: 1, 32, 32>}, {transform_indices = @transform_11, window_bounds = array<i64: 1, 1, 32>}, {transform_indices = @transform_12, window_bounds = array<i64: 1, 32, 64>}, {transform_indices = @transform_13, window_bounds = array<i64: 1, 1, 64>}, {transform_indices = @transform_14, window_bounds = array<i64: 1, 32, 32>}, {transform_indices = @transform_15, window_bounds = array<i64: 1, 1, 32>}, {transform_indices = @transform_16, window_bounds = array<i64: 1, 32, 64>}, {transform_indices = @transform_17, window_bounds = array<i64: 1, 1, 64>}, {transform_indices = @transform_18, window_bounds = array<i64: 1, 64, 32>}, {transform_indices = @transform_19, window_bounds = array<i64: 1, 1, 32>}, {pipeline_mode = #tpu.pipeline_mode<synchronous>, transform_indices = @transform_20, window_bounds = array<i64: 1, 32>}, {pipeline_mode = #tpu.pipeline_mode<synchronous>, transform_indices = @transform_21, window_bounds = array<i64: 1, 32>}, {pipeline_mode = #tpu.pipeline_mode<synchronous>, transform_indices = @transform_22, window_bounds = array<i64: 32, 128>}, {pipeline_mode = #tpu.pipeline_mode<synchronous>, transform_indices = @transform_23, window_bounds = array<i64: 1, 128>}, {transform_indices = @transform_24, window_bounds = array<i64: 1, 8, 128>}]} {
    %0 = tpu.iota {dimensions = array<i32: 0>} : vector<8x8xi32>
    %1 = tpu.iota {dimensions = array<i32: 1>} : vector<8x8xi32>
    %2 = arith.cmpi sle, %1, %0 : vector<8x8xi32>
    %c1_i32 = arith.constant 1 : i32
    %3 = arith.muli %arg0, %c1_i32 : i32
    %c0_i32 = arith.constant 0 : i32
    %4 = arith.addi %3, %c0_i32 : i32
    %5 = arith.index_cast %4 : i32 to index
    %6 = memref.load %arg2[%5] : memref<2xi32, #tpu.memory_space<smem>>
    %7 = vector.broadcast %6 : i32 to vector<8x8xi32>
    %8 = arith.cmpi slt, %1, %7 : vector<8x8xi32>
    %9 = arith.andi %2, %8 : vector<8x8xi1>
    %10 = vector.shape_cast %9 : vector<8x8xi1> to vector<1x8x8xi1>
    %c0 = arith.constant 0 : index
    %c0_0 = arith.constant 0 : index
    %c0_1 = arith.constant 0 : index
    %11 = vector.load %arg6[%c0, %c0_0, %c0_1] : memref<1x1x16xi32, #tpu.memory_space<vmem>>, vector<1x1x16xi32>
    %c0_i32_2 = arith.constant 0 : i32
    %12 = vector.broadcast %c0_i32_2 : i32 to vector<1x1x16xi32>
    %13 = arith.cmpi sgt, %11, %12 : vector<1x1x16xi32>
    %c0_i32_3 = arith.constant 0 : i32
    %14 = arith.cmpi eq, %arg1, %c0_i32_3 : i32
    %15 = arith.extui %14 : i1 to i32
    %c0_i32_4 = arith.constant 0 : i32
    %16 = arith.cmpi ne, %15, %c0_i32_4 : i32
    scf.if %16 {
      %c0_140 = arith.constant 0 : index
      %c0_141 = arith.constant 0 : index
      %c0_142 = arith.constant 0 : index
      %353 = vector.load %arg3[%c0_140, %c0_141, %c0_142] : memref<1x8x32xf32, #tpu.memory_space<vmem>>, vector<1x8x32xf32>
      %c0_143 = arith.constant 0 : index
      %c0_144 = arith.constant 0 : index
      %c0_145 = arith.constant 0 : index
      %354 = vector.load %arg4[%c0_143, %c0_144, %c0_145] : memref<1x8x32xf32, #tpu.memory_space<vmem>>, vector<1x8x32xf32>
      %355 = arith.addf %353, %354 : vector<1x8x32xf32>
      %356 = vector.shape_cast %355 : vector<1x8x32xf32> to vector<8x32xf32>
      %c0_146 = arith.constant 0 : index
      %c0_147 = arith.constant 0 : index
      %357 = vector.load %arg28[%c0_146, %c0_147] : memref<8x32xf32, #tpu.memory_space<vmem>>, vector<8x32xf32>
      tpu.vector_store %arg28[%c0_146, %c0_147], %356 {strides = array<i32>} : memref<8x32xf32, #tpu.memory_space<vmem>>, vector<8x32xf32>,
    } else {
    }
    %c0_5 = arith.constant 0 : index
    %c0_6 = arith.constant 0 : index
    %17 = vector.load %arg28[%c0_5, %c0_6] : memref<8x32xf32, #tpu.memory_space<vmem>>, vector<8x32xf32>
    %c0_7 = arith.constant 0 : index
    %c0_8 = arith.constant 0 : index
    %c0_9 = arith.constant 0 : index
    %c0_10 = arith.constant 0 : index
    %18 = vector.load %arg7[%c0_7, %c0_8, %c0_9, %c0_10] : memref<1x3x1x32xf32, #tpu.memory_space<vmem>>, vector<1x1x1x32xf32>
    %19 = vector.shape_cast %18 : vector<1x1x1x32xf32> to vector<1x32xf32>
    %c0_11 = arith.constant 0 : index
    %c0_12 = arith.constant 0 : index
    %c0_13 = arith.constant 0 : index
    %c0_14 = arith.constant 0 : index
    %20 = vector.load %arg8[%c0_11, %c0_12, %c0_13, %c0_14] : memref<1x3x1x32xf32, #tpu.memory_space<vmem>>, vector<1x1x1x32xf32>
    %21 = vector.shape_cast %20 : vector<1x1x1x32xf32> to vector<1x32xf32>
    %cst = arith.constant dense<0.000000e+00> : vector<8xf32>
    %22 = vector.multi_reduction <add>, %17, %cst [1] : vector<8x32xf32> to vector<8xf32>
    %23 = vector.shape_cast %22 : vector<8xf32> to vector<8x1xf32>
    %cst_15 = arith.constant 3.200000e+01 : f32
    %24 = vector.broadcast %cst_15 : f32 to vector<8x1xf32>
    %25 = arith.divf %23, %24 : vector<8x1xf32>
    %26 = vector.broadcast %25 : vector<8x1xf32> to vector<8x32xf32>
    %27 = arith.subf %17, %26 : vector<8x32xf32>
    %28 = arith.mulf %27, %27 : vector<8x32xf32>
    %cst_16 = arith.constant dense<0.000000e+00> : vector<8xf32>
    %29 = vector.multi_reduction <add>, %28, %cst_16 [1] : vector<8x32xf32> to vector<8xf32>
    %30 = vector.shape_cast %29 : vector<8xf32> to vector<8x1xf32>
    %cst_17 = arith.constant 3.200000e+01 : f32
    %31 = vector.broadcast %cst_17 : f32 to vector<8x1xf32>
    %32 = arith.divf %30, %31 : vector<8x1xf32>
    %33 = vector.broadcast %25 : vector<8x1xf32> to vector<8x32xf32>
    %34 = arith.subf %17, %33 : vector<8x32xf32>
    %cst_18 = arith.constant 9.99999974E-6 : f32
    %35 = vector.broadcast %cst_18 : f32 to vector<8x1xf32>
    %36 = arith.addf %32, %35 : vector<8x1xf32>
    %37 = math.rsqrt %36 : vector<8x1xf32>
    %38 = vector.broadcast %37 : vector<8x1xf32> to vector<8x32xf32>
    %39 = arith.mulf %34, %38 : vector<8x32xf32>
    %40 = vector.broadcast %19 : vector<1x32xf32> to vector<8x32xf32>
    %41 = arith.mulf %39, %40 : vector<8x32xf32>
    %42 = vector.broadcast %21 : vector<1x32xf32> to vector<8x32xf32>
    %43 = arith.addf %41, %42 : vector<8x32xf32>
    %c0_19 = arith.constant 0 : index
    %c0_20 = arith.constant 0 : index
    %c0_21 = arith.constant 0 : index
    %44 = vector.load %arg9[%c0_19, %c0_20, %c0_21] : memref<1x32x96xbf16, #tpu.memory_space<vmem>>, vector<1x32x96xbf16>
    %45 = vector.shape_cast %44 : vector<1x32x96xbf16> to vector<32x96xbf16>
    %c0_22 = arith.constant 0 : index
    %c0_23 = arith.constant 0 : index
    %c0_24 = arith.constant 0 : index
    %46 = vector.load %arg10[%c0_22, %c0_23, %c0_24] : memref<1x1x96xf32, #tpu.memory_space<vmem>>, vector<1x1x96xf32>
    %47 = vector.shape_cast %46 : vector<1x1x96xf32> to vector<1x96xf32>
    %48 = arith.truncf %43 : vector<8x32xf32> to vector<8x32xbf16>
    %cst_25 = arith.constant dense<0.000000e+00> : vector<8x96xf32>
    %49 = tpu.matmul %48, %45, %cst_25 {dimension_numbers = #tpu.dot_dimension_numbers<[1], [0], [0], [1], [0, 0, 1, 1], [], []>} : vector<8x32xbf16>, vector<32x96xbf16>, vector<8x96xf32> -> vector<8x96xf32>
    %50 = vector.broadcast %47 : vector<1x96xf32> to vector<8x96xf32>
    %51 = arith.addf %49, %50 : vector<8x96xf32>
    %52 = vector.extract_strided_slice %51 {offsets = [0, 0], sizes = [8, 32], strides = [1, 1]} : vector<8x96xf32> to vector<8x32xf32>
    %53 = vector.shape_cast %52 : vector<8x32xf32> to vector<1x8x32xf32>
    %54 = vector.extract_strided_slice %51 {offsets = [0, 32], sizes = [8, 32], strides = [1, 1]} : vector<8x96xf32> to vector<8x32xf32>
    %55 = vector.shape_cast %54 : vector<8x32xf32> to vector<1x8x32xf32>
    %56 = vector.extract_strided_slice %51 {offsets = [0, 64], sizes = [8, 32], strides = [1, 1]} : vector<8x96xf32> to vector<8x32xf32>
    %57 = vector.shape_cast %56 : vector<8x32xf32> to vector<1x8x32xf32>
    %58 = vector.extract_strided_slice %53 {offsets = [0, 0, 0], sizes = [1, 8, 8], strides = [1, 1, 1]} : vector<1x8x32xf32> to vector<1x8x8xf32>
    %59 = arith.truncf %58 : vector<1x8x8xf32> to vector<1x8x8xbf16>
    %60 = vector.extract_strided_slice %55 {offsets = [0, 0, 0], sizes = [1, 8, 8], strides = [1, 1, 1]} : vector<1x8x32xf32> to vector<1x8x8xf32>
    %61 = arith.truncf %60 : vector<1x8x8xf32> to vector<1x8x8xbf16>
    %62 = vector.extract_strided_slice %57 {offsets = [0, 0, 0], sizes = [1, 8, 8], strides = [1, 1, 1]} : vector<1x8x32xf32> to vector<1x8x8xf32>
    %63 = arith.truncf %62 : vector<1x8x8xf32> to vector<1x8x8xbf16>
    "tpu.trace_start"() <{level = 10 : i32, message = "bqd,bkd->bqk"}> : () -> ()
    %cst_26 = arith.constant dense<0.000000e+00> : vector<1x8x8xf32>
    %64 = tpu.matmul %59, %61, %cst_26 {dimension_numbers = #tpu.dot_dimension_numbers<[2], [2], [1], [1], [0, 0, 0, 1, 1, 1], [0], [0]>} : vector<1x8x8xbf16>, vector<1x8x8xbf16>, vector<1x8x8xf32> -> vector<1x8x8xf32>
    %cst_27 = arith.constant -1.000000e+30 : f32
    "tpu.trace_stop"() : () -> ()
    %65 = vector.broadcast %cst_27 : f32 to vector<1x8x8xf32>
    %66 = arith.select %10, %64, %65 : vector<1x8x8xi1>, vector<1x8x8xf32>
    %cst_28 = arith.constant dense<0xFF800000> : vector<1x8xf32>
    %67 = vector.multi_reduction <maximumf>, %66, %cst_28 [2] : vector<1x8x8xf32> to vector<1x8xf32>
    %68 = vector.shape_cast %67 : vector<1x8xf32> to vector<1x8x1xf32>
    %69 = vector.broadcast %68 : vector<1x8x1xf32> to vector<1x8x8xf32>
    %70 = arith.subf %66, %69 : vector<1x8x8xf32>
    %71 = math.exp %70 : vector<1x8x8xf32>
    %cst_29 = arith.constant dense<0.000000e+00> : vector<1x8xf32>
    %72 = vector.multi_reduction <add>, %71, %cst_29 [2] : vector<1x8x8xf32> to vector<1x8xf32>
    %73 = vector.shape_cast %72 : vector<1x8xf32> to vector<1x8x1xf32>
    %74 = tpu.reciprocal %73 {approx = true} : vector<1x8x1xf32> -> vector<1x8x1xf32>
    %75 = vector.broadcast %74 : vector<1x8x1xf32> to vector<1x8x8xf32>
    %76 = arith.mulf %71, %75 : vector<1x8x8xf32>
    %77 = arith.truncf %76 : vector<1x8x8xf32> to vector<1x8x8xbf16>
    "tpu.trace_start"() <{level = 10 : i32, message = "bqk,bkd->bqd"}> : () -> ()
    %cst_30 = arith.constant dense<0.000000e+00> : vector<1x8x8xf32>
    %78 = tpu.matmul %77, %63, %cst_30 {dimension_numbers = #tpu.dot_dimension_numbers<[2], [1], [1], [2], [0, 0, 0, 1, 1, 2], [0], [0]>} : vector<1x8x8xbf16>, vector<1x8x8xbf16>, vector<1x8x8xf32> -> vector<1x8x8xf32>
    "tpu.trace_stop"() : () -> ()
    %79 = vector.extract_strided_slice %53 {offsets = [0, 0, 8], sizes = [1, 8, 8], strides = [1, 1, 1]} : vector<1x8x32xf32> to vector<1x8x8xf32>
    %80 = arith.truncf %79 : vector<1x8x8xf32> to vector<1x8x8xbf16>
    %81 = vector.extract_strided_slice %55 {offsets = [0, 0, 8], sizes = [1, 8, 8], strides = [1, 1, 1]} : vector<1x8x32xf32> to vector<1x8x8xf32>
    %82 = arith.truncf %81 : vector<1x8x8xf32> to vector<1x8x8xbf16>
    %83 = vector.extract_strided_slice %57 {offsets = [0, 0, 8], sizes = [1, 8, 8], strides = [1, 1, 1]} : vector<1x8x32xf32> to vector<1x8x8xf32>
    %84 = arith.truncf %83 : vector<1x8x8xf32> to vector<1x8x8xbf16>
    "tpu.trace_start"() <{level = 10 : i32, message = "bqd,bkd->bqk"}> : () -> ()
    %cst_31 = arith.constant dense<0.000000e+00> : vector<1x8x8xf32>
    %85 = tpu.matmul %80, %82, %cst_31 {dimension_numbers = #tpu.dot_dimension_numbers<[2], [2], [1], [1], [0, 0, 0, 1, 1, 1], [0], [0]>} : vector<1x8x8xbf16>, vector<1x8x8xbf16>, vector<1x8x8xf32> -> vector<1x8x8xf32>
    %cst_32 = arith.constant -1.000000e+30 : f32
    "tpu.trace_stop"() : () -> ()
    %86 = vector.broadcast %cst_32 : f32 to vector<1x8x8xf32>
    %87 = arith.select %10, %85, %86 : vector<1x8x8xi1>, vector<1x8x8xf32>
    %cst_33 = arith.constant dense<0xFF800000> : vector<1x8xf32>
    %88 = vector.multi_reduction <maximumf>, %87, %cst_33 [2] : vector<1x8x8xf32> to vector<1x8xf32>
    %89 = vector.shape_cast %88 : vector<1x8xf32> to vector<1x8x1xf32>
    %90 = vector.broadcast %89 : vector<1x8x1xf32> to vector<1x8x8xf32>
    %91 = arith.subf %87, %90 : vector<1x8x8xf32>
    %92 = math.exp %91 : vector<1x8x8xf32>
    %cst_34 = arith.constant dense<0.000000e+00> : vector<1x8xf32>
    %93 = vector.multi_reduction <add>, %92, %cst_34 [2] : vector<1x8x8xf32> to vector<1x8xf32>
    %94 = vector.shape_cast %93 : vector<1x8xf32> to vector<1x8x1xf32>
    %95 = tpu.reciprocal %94 {approx = true} : vector<1x8x1xf32> -> vector<1x8x1xf32>
    %96 = vector.broadcast %95 : vector<1x8x1xf32> to vector<1x8x8xf32>
    %97 = arith.mulf %92, %96 : vector<1x8x8xf32>
    %98 = arith.truncf %97 : vector<1x8x8xf32> to vector<1x8x8xbf16>
    "tpu.trace_start"() <{level = 10 : i32, message = "bqk,bkd->bqd"}> : () -> ()
    %cst_35 = arith.constant dense<0.000000e+00> : vector<1x8x8xf32>
    %99 = tpu.matmul %98, %84, %cst_35 {dimension_numbers = #tpu.dot_dimension_numbers<[2], [1], [1], [2], [0, 0, 0, 1, 1, 2], [0], [0]>} : vector<1x8x8xbf16>, vector<1x8x8xbf16>, vector<1x8x8xf32> -> vector<1x8x8xf32>
    "tpu.trace_stop"() : () -> ()
    %100 = vector.extract_strided_slice %53 {offsets = [0, 0, 16], sizes = [1, 8, 8], strides = [1, 1, 1]} : vector<1x8x32xf32> to vector<1x8x8xf32>
    %101 = arith.truncf %100 : vector<1x8x8xf32> to vector<1x8x8xbf16>
    %102 = vector.extract_strided_slice %55 {offsets = [0, 0, 16], sizes = [1, 8, 8], strides = [1, 1, 1]} : vector<1x8x32xf32> to vector<1x8x8xf32>
    %103 = arith.truncf %102 : vector<1x8x8xf32> to vector<1x8x8xbf16>
    %104 = vector.extract_strided_slice %57 {offsets = [0, 0, 16], sizes = [1, 8, 8], strides = [1, 1, 1]} : vector<1x8x32xf32> to vector<1x8x8xf32>
    %105 = arith.truncf %104 : vector<1x8x8xf32> to vector<1x8x8xbf16>
    "tpu.trace_start"() <{level = 10 : i32, message = "bqd,bkd->bqk"}> : () -> ()
    %cst_36 = arith.constant dense<0.000000e+00> : vector<1x8x8xf32>
    %106 = tpu.matmul %101, %103, %cst_36 {dimension_numbers = #tpu.dot_dimension_numbers<[2], [2], [1], [1], [0, 0, 0, 1, 1, 1], [0], [0]>} : vector<1x8x8xbf16>, vector<1x8x8xbf16>, vector<1x8x8xf32> -> vector<1x8x8xf32>
    %cst_37 = arith.constant -1.000000e+30 : f32
    "tpu.trace_stop"() : () -> ()
    %107 = vector.broadcast %cst_37 : f32 to vector<1x8x8xf32>
    %108 = arith.select %10, %106, %107 : vector<1x8x8xi1>, vector<1x8x8xf32>
    %cst_38 = arith.constant dense<0xFF800000> : vector<1x8xf32>
    %109 = vector.multi_reduction <maximumf>, %108, %cst_38 [2] : vector<1x8x8xf32> to vector<1x8xf32>
    %110 = vector.shape_cast %109 : vector<1x8xf32> to vector<1x8x1xf32>
    %111 = vector.broadcast %110 : vector<1x8x1xf32> to vector<1x8x8xf32>
    %112 = arith.subf %108, %111 : vector<1x8x8xf32>
    %113 = math.exp %112 : vector<1x8x8xf32>
    %cst_39 = arith.constant dense<0.000000e+00> : vector<1x8xf32>
    %114 = vector.multi_reduction <add>, %113, %cst_39 [2] : vector<1x8x8xf32> to vector<1x8xf32>
    %115 = vector.shape_cast %114 : vector<1x8xf32> to vector<1x8x1xf32>
    %116 = tpu.reciprocal %115 {approx = true} : vector<1x8x1xf32> -> vector<1x8x1xf32>
    %117 = vector.broadcast %116 : vector<1x8x1xf32> to vector<1x8x8xf32>
    %118 = arith.mulf %113, %117 : vector<1x8x8xf32>
    %119 = arith.truncf %118 : vector<1x8x8xf32> to vector<1x8x8xbf16>
    "tpu.trace_start"() <{level = 10 : i32, message = "bqk,bkd->bqd"}> : () -> ()
    %cst_40 = arith.constant dense<0.000000e+00> : vector<1x8x8xf32>
    %120 = tpu.matmul %119, %105, %cst_40 {dimension_numbers = #tpu.dot_dimension_numbers<[2], [1], [1], [2], [0, 0, 0, 1, 1, 2], [0], [0]>} : vector<1x8x8xbf16>, vector<1x8x8xbf16>, vector<1x8x8xf32> -> vector<1x8x8xf32>
    "tpu.trace_stop"() : () -> ()
    %121 = vector.extract_strided_slice %53 {offsets = [0, 0, 24], sizes = [1, 8, 8], strides = [1, 1, 1]} : vector<1x8x32xf32> to vector<1x8x8xf32>
    %122 = arith.truncf %121 : vector<1x8x8xf32> to vector<1x8x8xbf16>
    %123 = vector.extract_strided_slice %55 {offsets = [0, 0, 24], sizes = [1, 8, 8], strides = [1, 1, 1]} : vector<1x8x32xf32> to vector<1x8x8xf32>
    %124 = arith.truncf %123 : vector<1x8x8xf32> to vector<1x8x8xbf16>
    %125 = vector.extract_strided_slice %57 {offsets = [0, 0, 24], sizes = [1, 8, 8], strides = [1, 1, 1]} : vector<1x8x32xf32> to vector<1x8x8xf32>
    %126 = arith.truncf %125 : vector<1x8x8xf32> to vector<1x8x8xbf16>
    "tpu.trace_start"() <{level = 10 : i32, message = "bqd,bkd->bqk"}> : () -> ()
    %cst_41 = arith.constant dense<0.000000e+00> : vector<1x8x8xf32>
    %127 = tpu.matmul %122, %124, %cst_41 {dimension_numbers = #tpu.dot_dimension_numbers<[2], [2], [1], [1], [0, 0, 0, 1, 1, 1], [0], [0]>} : vector<1x8x8xbf16>, vector<1x8x8xbf16>, vector<1x8x8xf32> -> vector<1x8x8xf32>
    %cst_42 = arith.constant -1.000000e+30 : f32
    "tpu.trace_stop"() : () -> ()
    %128 = vector.broadcast %cst_42 : f32 to vector<1x8x8xf32>
    %129 = arith.select %10, %127, %128 : vector<1x8x8xi1>, vector<1x8x8xf32>
    %cst_43 = arith.constant dense<0xFF800000> : vector<1x8xf32>
    %130 = vector.multi_reduction <maximumf>, %129, %cst_43 [2] : vector<1x8x8xf32> to vector<1x8xf32>
    %131 = vector.shape_cast %130 : vector<1x8xf32> to vector<1x8x1xf32>
    %132 = vector.broadcast %131 : vector<1x8x1xf32> to vector<1x8x8xf32>
    %133 = arith.subf %129, %132 : vector<1x8x8xf32>
    %134 = math.exp %133 : vector<1x8x8xf32>
    %cst_44 = arith.constant dense<0.000000e+00> : vector<1x8xf32>
    %135 = vector.multi_reduction <add>, %134, %cst_44 [2] : vector<1x8x8xf32> to vector<1x8xf32>
    %136 = vector.shape_cast %135 : vector<1x8xf32> to vector<1x8x1xf32>
    %137 = tpu.reciprocal %136 {approx = true} : vector<1x8x1xf32> -> vector<1x8x1xf32>
    %138 = vector.broadcast %137 : vector<1x8x1xf32> to vector<1x8x8xf32>
    %139 = arith.mulf %134, %138 : vector<1x8x8xf32>
    %140 = arith.truncf %139 : vector<1x8x8xf32> to vector<1x8x8xbf16>
    "tpu.trace_start"() <{level = 10 : i32, message = "bqk,bkd->bqd"}> : () -> ()
    %cst_45 = arith.constant dense<0.000000e+00> : vector<1x8x8xf32>
    %141 = tpu.matmul %140, %126, %cst_45 {dimension_numbers = #tpu.dot_dimension_numbers<[2], [1], [1], [2], [0, 0, 0, 1, 1, 2], [0], [0]>} : vector<1x8x8xbf16>, vector<1x8x8xbf16>, vector<1x8x8xf32> -> vector<1x8x8xf32>
    "tpu.trace_stop"() : () -> ()
    %142 = tpu.concatenate %78, %99, %120, %141 in 2 : vector<1x8x8xf32>, vector<1x8x8xf32>, vector<1x8x8xf32>, vector<1x8x8xf32> -> vector<1x8x32xf32>
    %143 = vector.shape_cast %142 : vector<1x8x32xf32> to vector<8x32xf32>
    %c0_46 = arith.constant 0 : index
    %c0_47 = arith.constant 0 : index
    %c0_48 = arith.constant 0 : index
    %144 = vector.load %arg11[%c0_46, %c0_47, %c0_48] : memref<1x32x32xbf16, #tpu.memory_space<vmem>>, vector<1x32x32xbf16>
    %145 = vector.shape_cast %144 : vector<1x32x32xbf16> to vector<32x32xbf16>
    %c0_49 = arith.constant 0 : index
    %c0_50 = arith.constant 0 : index
    %c0_51 = arith.constant 0 : index
    %146 = vector.load %arg12[%c0_49, %c0_50, %c0_51] : memref<1x1x32xf32, #tpu.memory_space<vmem>>, vector<1x1x32xf32>
    %147 = vector.shape_cast %146 : vector<1x1x32xf32> to vector<1x32xf32>
    %148 = arith.truncf %143 : vector<8x32xf32> to vector<8x32xbf16>
    %cst_52 = arith.constant dense<0.000000e+00> : vector<8x32xf32>
    %149 = tpu.matmul %148, %145, %cst_52 {dimension_numbers = #tpu.dot_dimension_numbers<[1], [0], [0], [1], [0, 0, 1, 1], [], []>} : vector<8x32xbf16>, vector<32x32xbf16>, vector<8x32xf32> -> vector<8x32xf32>
    %150 = vector.broadcast %147 : vector<1x32xf32> to vector<8x32xf32>
    %151 = arith.addf %149, %150 : vector<8x32xf32>
    %152 = arith.addf %17, %151 : vector<8x32xf32>
    %c0_53 = arith.constant 0 : index
    %c1 = arith.constant 1 : index
    %c0_54 = arith.constant 0 : index
    %c0_55 = arith.constant 0 : index
    %153 = vector.load %arg7[%c0_53, %c1, %c0_54, %c0_55] : memref<1x3x1x32xf32, #tpu.memory_space<vmem>>, vector<1x1x1x32xf32>
    %154 = vector.shape_cast %153 : vector<1x1x1x32xf32> to vector<1x32xf32>
    %c0_56 = arith.constant 0 : index
    %c1_57 = arith.constant 1 : index
    %c0_58 = arith.constant 0 : index
    %c0_59 = arith.constant 0 : index
    %155 = vector.load %arg8[%c0_56, %c1_57, %c0_58, %c0_59] : memref<1x3x1x32xf32, #tpu.memory_space<vmem>>, vector<1x1x1x32xf32>
    %156 = vector.shape_cast %155 : vector<1x1x1x32xf32> to vector<1x32xf32>
    %cst_60 = arith.constant dense<0.000000e+00> : vector<8xf32>
    %157 = vector.multi_reduction <add>, %152, %cst_60 [1] : vector<8x32xf32> to vector<8xf32>
    %158 = vector.shape_cast %157 : vector<8xf32> to vector<8x1xf32>
    %cst_61 = arith.constant 3.200000e+01 : f32
    %159 = vector.broadcast %cst_61 : f32 to vector<8x1xf32>
    %160 = arith.divf %158, %159 : vector<8x1xf32>
    %161 = vector.broadcast %160 : vector<8x1xf32> to vector<8x32xf32>
    %162 = arith.subf %152, %161 : vector<8x32xf32>
    %163 = arith.mulf %162, %162 : vector<8x32xf32>
    %cst_62 = arith.constant dense<0.000000e+00> : vector<8xf32>
    %164 = vector.multi_reduction <add>, %163, %cst_62 [1] : vector<8x32xf32> to vector<8xf32>
    %165 = vector.shape_cast %164 : vector<8xf32> to vector<8x1xf32>
    %cst_63 = arith.constant 3.200000e+01 : f32
    %166 = vector.broadcast %cst_63 : f32 to vector<8x1xf32>
    %167 = arith.divf %165, %166 : vector<8x1xf32>
    %168 = vector.broadcast %160 : vector<8x1xf32> to vector<8x32xf32>
    %169 = arith.subf %152, %168 : vector<8x32xf32>
    %cst_64 = arith.constant 9.99999974E-6 : f32
    %170 = vector.broadcast %cst_64 : f32 to vector<8x1xf32>
    %171 = arith.addf %167, %170 : vector<8x1xf32>
    %172 = math.rsqrt %171 : vector<8x1xf32>
    %173 = vector.broadcast %172 : vector<8x1xf32> to vector<8x32xf32>
    %174 = arith.mulf %169, %173 : vector<8x32xf32>
    %175 = vector.broadcast %154 : vector<1x32xf32> to vector<8x32xf32>
    %176 = arith.mulf %174, %175 : vector<8x32xf32>
    %177 = vector.broadcast %156 : vector<1x32xf32> to vector<8x32xf32>
    %178 = arith.addf %176, %177 : vector<8x32xf32>
    %c0_65 = arith.constant 0 : index
    %c0_66 = arith.constant 0 : index
    %c0_67 = arith.constant 0 : index
    %179 = vector.load %arg13[%c0_65, %c0_66, %c0_67] : memref<1x32x32xbf16, #tpu.memory_space<vmem>>, vector<1x32x32xbf16>
    %180 = vector.shape_cast %179 : vector<1x32x32xbf16> to vector<32x32xbf16>
    %c0_68 = arith.constant 0 : index
    %c0_69 = arith.constant 0 : index
    %c0_70 = arith.constant 0 : index
    %181 = vector.load %arg14[%c0_68, %c0_69, %c0_70] : memref<1x1x32xf32, #tpu.memory_space<vmem>>, vector<1x1x32xf32>
    %182 = vector.shape_cast %181 : vector<1x1x32xf32> to vector<1x32xf32>
    %183 = arith.truncf %178 : vector<8x32xf32> to vector<8x32xbf16>
    %cst_71 = arith.constant dense<0.000000e+00> : vector<8x32xf32>
    %184 = tpu.matmul %183, %180, %cst_71 {dimension_numbers = #tpu.dot_dimension_numbers<[1], [0], [0], [1], [0, 0, 1, 1], [], []>} : vector<8x32xbf16>, vector<32x32xbf16>, vector<8x32xf32> -> vector<8x32xf32>
    %185 = vector.broadcast %182 : vector<1x32xf32> to vector<8x32xf32>
    %186 = arith.addf %184, %185 : vector<8x32xf32>
    %187 = vector.shape_cast %186 : vector<8x32xf32> to vector<1x8x32xf32>
    %c0_72 = arith.constant 0 : index
    %c0_73 = arith.constant 0 : index
    %c0_74 = arith.constant 0 : index
    %188 = vector.load %arg5[%c0_72, %c0_73, %c0_74] : memref<1x16x32xf32, #tpu.memory_space<vmem>>, vector<1x16x32xf32>
    %189 = vector.shape_cast %188 : vector<1x16x32xf32> to vector<16x32xf32>
    %c0_75 = arith.constant 0 : index
    %c0_76 = arith.constant 0 : index
    %c0_77 = arith.constant 0 : index
    %190 = vector.load %arg15[%c0_75, %c0_76, %c0_77] : memref<1x32x64xbf16, #tpu.memory_space<vmem>>, vector<1x32x64xbf16>
    %191 = vector.shape_cast %190 : vector<1x32x64xbf16> to vector<32x64xbf16>
    %c0_78 = arith.constant 0 : index
    %c0_79 = arith.constant 0 : index
    %c0_80 = arith.constant 0 : index
    %192 = vector.load %arg16[%c0_78, %c0_79, %c0_80] : memref<1x1x64xf32, #tpu.memory_space<vmem>>, vector<1x1x64xf32>
    %193 = vector.shape_cast %192 : vector<1x1x64xf32> to vector<1x64xf32>
    %194 = arith.truncf %189 : vector<16x32xf32> to vector<16x32xbf16>
    %cst_81 = arith.constant dense<0.000000e+00> : vector<16x64xf32>
    %195 = tpu.matmul %194, %191, %cst_81 {dimension_numbers = #tpu.dot_dimension_numbers<[1], [0], [0], [1], [0, 0, 1, 1], [], []>} : vector<16x32xbf16>, vector<32x64xbf16>, vector<16x64xf32> -> vector<16x64xf32>
    %196 = vector.broadcast %193 : vector<1x64xf32> to vector<16x64xf32>
    %197 = arith.addf %195, %196 : vector<16x64xf32>
    %198 = vector.shape_cast %197 : vector<16x64xf32> to vector<1x16x64xf32>
    %199 = vector.extract_strided_slice %198 {offsets = [0, 0, 0], sizes = [1, 16, 32], strides = [1, 1, 1]} : vector<1x16x64xf32> to vector<1x16x32xf32>
    %200 = vector.extract_strided_slice %198 {offsets = [0, 0, 32], sizes = [1, 16, 32], strides = [1, 1, 1]} : vector<1x16x64xf32> to vector<1x16x32xf32>
    %201 = vector.extract_strided_slice %187 {offsets = [0, 0, 0], sizes = [1, 8, 8], strides = [1, 1, 1]} : vector<1x8x32xf32> to vector<1x8x8xf32>
    %202 = arith.truncf %201 : vector<1x8x8xf32> to vector<1x8x8xbf16>
    %203 = vector.extract_strided_slice %199 {offsets = [0, 0, 0], sizes = [1, 16, 8], strides = [1, 1, 1]} : vector<1x16x32xf32> to vector<1x16x8xf32>
    %204 = arith.truncf %203 : vector<1x16x8xf32> to vector<1x16x8xbf16>
    %205 = vector.extract_strided_slice %200 {offsets = [0, 0, 0], sizes = [1, 16, 8], strides = [1, 1, 1]} : vector<1x16x32xf32> to vector<1x16x8xf32>
    %206 = arith.truncf %205 : vector<1x16x8xf32> to vector<1x16x8xbf16>
    "tpu.trace_start"() <{level = 10 : i32, message = "bqd,bkd->bqk"}> : () -> ()
    %cst_82 = arith.constant dense<0.000000e+00> : vector<1x8x16xf32>
    %207 = tpu.matmul %202, %204, %cst_82 {dimension_numbers = #tpu.dot_dimension_numbers<[2], [2], [1], [1], [0, 0, 0, 1, 1, 1], [0], [0]>} : vector<1x8x8xbf16>, vector<1x16x8xbf16>, vector<1x8x16xf32> -> vector<1x8x16xf32>
    %cst_83 = arith.constant -1.000000e+30 : f32
    "tpu.trace_stop"() : () -> ()
    %208 = vector.shape_cast %13 : vector<1x1x16xi1> to vector<1x1x16xi1>
    %209 = vector.broadcast %208 : vector<1x1x16xi1> to vector<1x8x16xi1>
    %210 = vector.broadcast %cst_83 : f32 to vector<1x8x16xf32>
    %211 = arith.select %209, %207, %210 : vector<1x8x16xi1>, vector<1x8x16xf32>
    %cst_84 = arith.constant dense<0xFF800000> : vector<1x8xf32>
    %212 = vector.multi_reduction <maximumf>, %211, %cst_84 [2] : vector<1x8x16xf32> to vector<1x8xf32>
    %213 = vector.shape_cast %212 : vector<1x8xf32> to vector<1x8x1xf32>
    %214 = vector.broadcast %213 : vector<1x8x1xf32> to vector<1x8x16xf32>
    %215 = arith.subf %211, %214 : vector<1x8x16xf32>
    %216 = math.exp %215 : vector<1x8x16xf32>
    %cst_85 = arith.constant dense<0.000000e+00> : vector<1x8xf32>
    %217 = vector.multi_reduction <add>, %216, %cst_85 [2] : vector<1x8x16xf32> to vector<1x8xf32>
    %218 = vector.shape_cast %217 : vector<1x8xf32> to vector<1x8x1xf32>
    %219 = tpu.reciprocal %218 {approx = true} : vector<1x8x1xf32> -> vector<1x8x1xf32>
    %220 = vector.broadcast %219 : vector<1x8x1xf32> to vector<1x8x16xf32>
    %221 = arith.mulf %216, %220 : vector<1x8x16xf32>
    %222 = arith.truncf %221 : vector<1x8x16xf32> to vector<1x8x16xbf16>
    "tpu.trace_start"() <{level = 10 : i32, message = "bqk,bkd->bqd"}> : () -> ()
    %cst_86 = arith.constant dense<0.000000e+00> : vector<1x8x8xf32>
    %223 = tpu.matmul %222, %206, %cst_86 {dimension_numbers = #tpu.dot_dimension_numbers<[2], [1], [1], [2], [0, 0, 0, 1, 1, 2], [0], [0]>} : vector<1x8x16xbf16>, vector<1x16x8xbf16>, vector<1x8x8xf32> -> vector<1x8x8xf32>
    "tpu.trace_stop"() : () -> ()
    %224 = vector.extract_strided_slice %187 {offsets = [0, 0, 8], sizes = [1, 8, 8], strides = [1, 1, 1]} : vector<1x8x32xf32> to vector<1x8x8xf32>
    %225 = arith.truncf %224 : vector<1x8x8xf32> to vector<1x8x8xbf16>
    %226 = vector.extract_strided_slice %199 {offsets = [0, 0, 8], sizes = [1, 16, 8], strides = [1, 1, 1]} : vector<1x16x32xf32> to vector<1x16x8xf32>
    %227 = arith.truncf %226 : vector<1x16x8xf32> to vector<1x16x8xbf16>
    %228 = vector.extract_strided_slice %200 {offsets = [0, 0, 8], sizes = [1, 16, 8], strides = [1, 1, 1]} : vector<1x16x32xf32> to vector<1x16x8xf32>
    %229 = arith.truncf %228 : vector<1x16x8xf32> to vector<1x16x8xbf16>
    "tpu.trace_start"() <{level = 10 : i32, message = "bqd,bkd->bqk"}> : () -> ()
    %cst_87 = arith.constant dense<0.000000e+00> : vector<1x8x16xf32>
    %230 = tpu.matmul %225, %227, %cst_87 {dimension_numbers = #tpu.dot_dimension_numbers<[2], [2], [1], [1], [0, 0, 0, 1, 1, 1], [0], [0]>} : vector<1x8x8xbf16>, vector<1x16x8xbf16>, vector<1x8x16xf32> -> vector<1x8x16xf32>
    %cst_88 = arith.constant -1.000000e+30 : f32
    "tpu.trace_stop"() : () -> ()
    %231 = vector.shape_cast %13 : vector<1x1x16xi1> to vector<1x1x16xi1>
    %232 = vector.broadcast %231 : vector<1x1x16xi1> to vector<1x8x16xi1>
    %233 = vector.broadcast %cst_88 : f32 to vector<1x8x16xf32>
    %234 = arith.select %232, %230, %233 : vector<1x8x16xi1>, vector<1x8x16xf32>
    %cst_89 = arith.constant dense<0xFF800000> : vector<1x8xf32>
    %235 = vector.multi_reduction <maximumf>, %234, %cst_89 [2] : vector<1x8x16xf32> to vector<1x8xf32>
    %236 = vector.shape_cast %235 : vector<1x8xf32> to vector<1x8x1xf32>
    %237 = vector.broadcast %236 : vector<1x8x1xf32> to vector<1x8x16xf32>
    %238 = arith.subf %234, %237 : vector<1x8x16xf32>
    %239 = math.exp %238 : vector<1x8x16xf32>
    %cst_90 = arith.constant dense<0.000000e+00> : vector<1x8xf32>
    %240 = vector.multi_reduction <add>, %239, %cst_90 [2] : vector<1x8x16xf32> to vector<1x8xf32>
    %241 = vector.shape_cast %240 : vector<1x8xf32> to vector<1x8x1xf32>
    %242 = tpu.reciprocal %241 {approx = true} : vector<1x8x1xf32> -> vector<1x8x1xf32>
    %243 = vector.broadcast %242 : vector<1x8x1xf32> to vector<1x8x16xf32>
    %244 = arith.mulf %239, %243 : vector<1x8x16xf32>
    %245 = arith.truncf %244 : vector<1x8x16xf32> to vector<1x8x16xbf16>
    "tpu.trace_start"() <{level = 10 : i32, message = "bqk,bkd->bqd"}> : () -> ()
    %cst_91 = arith.constant dense<0.000000e+00> : vector<1x8x8xf32>
    %246 = tpu.matmul %245, %229, %cst_91 {dimension_numbers = #tpu.dot_dimension_numbers<[2], [1], [1], [2], [0, 0, 0, 1, 1, 2], [0], [0]>} : vector<1x8x16xbf16>, vector<1x16x8xbf16>, vector<1x8x8xf32> -> vector<1x8x8xf32>
    "tpu.trace_stop"() : () -> ()
    %247 = vector.extract_strided_slice %187 {offsets = [0, 0, 16], sizes = [1, 8, 8], strides = [1, 1, 1]} : vector<1x8x32xf32> to vector<1x8x8xf32>
    %248 = arith.truncf %247 : vector<1x8x8xf32> to vector<1x8x8xbf16>
    %249 = vector.extract_strided_slice %199 {offsets = [0, 0, 16], sizes = [1, 16, 8], strides = [1, 1, 1]} : vector<1x16x32xf32> to vector<1x16x8xf32>
    %250 = arith.truncf %249 : vector<1x16x8xf32> to vector<1x16x8xbf16>
    %251 = vector.extract_strided_slice %200 {offsets = [0, 0, 16], sizes = [1, 16, 8], strides = [1, 1, 1]} : vector<1x16x32xf32> to vector<1x16x8xf32>
    %252 = arith.truncf %251 : vector<1x16x8xf32> to vector<1x16x8xbf16>
    "tpu.trace_start"() <{level = 10 : i32, message = "bqd,bkd->bqk"}> : () -> ()
    %cst_92 = arith.constant dense<0.000000e+00> : vector<1x8x16xf32>
    %253 = tpu.matmul %248, %250, %cst_92 {dimension_numbers = #tpu.dot_dimension_numbers<[2], [2], [1], [1], [0, 0, 0, 1, 1, 1], [0], [0]>} : vector<1x8x8xbf16>, vector<1x16x8xbf16>, vector<1x8x16xf32> -> vector<1x8x16xf32>
    %cst_93 = arith.constant -1.000000e+30 : f32
    "tpu.trace_stop"() : () -> ()
    %254 = vector.shape_cast %13 : vector<1x1x16xi1> to vector<1x1x16xi1>
    %255 = vector.broadcast %254 : vector<1x1x16xi1> to vector<1x8x16xi1>
    %256 = vector.broadcast %cst_93 : f32 to vector<1x8x16xf32>
    %257 = arith.select %255, %253, %256 : vector<1x8x16xi1>, vector<1x8x16xf32>
    %cst_94 = arith.constant dense<0xFF800000> : vector<1x8xf32>
    %258 = vector.multi_reduction <maximumf>, %257, %cst_94 [2] : vector<1x8x16xf32> to vector<1x8xf32>
    %259 = vector.shape_cast %258 : vector<1x8xf32> to vector<1x8x1xf32>
    %260 = vector.broadcast %259 : vector<1x8x1xf32> to vector<1x8x16xf32>
    %261 = arith.subf %257, %260 : vector<1x8x16xf32>
    %262 = math.exp %261 : vector<1x8x16xf32>
    %cst_95 = arith.constant dense<0.000000e+00> : vector<1x8xf32>
    %263 = vector.multi_reduction <add>, %262, %cst_95 [2] : vector<1x8x16xf32> to vector<1x8xf32>
    %264 = vector.shape_cast %263 : vector<1x8xf32> to vector<1x8x1xf32>
    %265 = tpu.reciprocal %264 {approx = true} : vector<1x8x1xf32> -> vector<1x8x1xf32>
    %266 = vector.broadcast %265 : vector<1x8x1xf32> to vector<1x8x16xf32>
    %267 = arith.mulf %262, %266 : vector<1x8x16xf32>
    %268 = arith.truncf %267 : vector<1x8x16xf32> to vector<1x8x16xbf16>
    "tpu.trace_start"() <{level = 10 : i32, message = "bqk,bkd->bqd"}> : () -> ()
    %cst_96 = arith.constant dense<0.000000e+00> : vector<1x8x8xf32>
    %269 = tpu.matmul %268, %252, %cst_96 {dimension_numbers = #tpu.dot_dimension_numbers<[2], [1], [1], [2], [0, 0, 0, 1, 1, 2], [0], [0]>} : vector<1x8x16xbf16>, vector<1x16x8xbf16>, vector<1x8x8xf32> -> vector<1x8x8xf32>
    "tpu.trace_stop"() : () -> ()
    %270 = vector.extract_strided_slice %187 {offsets = [0, 0, 24], sizes = [1, 8, 8], strides = [1, 1, 1]} : vector<1x8x32xf32> to vector<1x8x8xf32>
    %271 = arith.truncf %270 : vector<1x8x8xf32> to vector<1x8x8xbf16>
    %272 = vector.extract_strided_slice %199 {offsets = [0, 0, 24], sizes = [1, 16, 8], strides = [1, 1, 1]} : vector<1x16x32xf32> to vector<1x16x8xf32>
    %273 = arith.truncf %272 : vector<1x16x8xf32> to vector<1x16x8xbf16>
    %274 = vector.extract_strided_slice %200 {offsets = [0, 0, 24], sizes = [1, 16, 8], strides = [1, 1, 1]} : vector<1x16x32xf32> to vector<1x16x8xf32>
    %275 = arith.truncf %274 : vector<1x16x8xf32> to vector<1x16x8xbf16>
    "tpu.trace_start"() <{level = 10 : i32, message = "bqd,bkd->bqk"}> : () -> ()
    %cst_97 = arith.constant dense<0.000000e+00> : vector<1x8x16xf32>
    %276 = tpu.matmul %271, %273, %cst_97 {dimension_numbers = #tpu.dot_dimension_numbers<[2], [2], [1], [1], [0, 0, 0, 1, 1, 1], [0], [0]>} : vector<1x8x8xbf16>, vector<1x16x8xbf16>, vector<1x8x16xf32> -> vector<1x8x16xf32>
    %cst_98 = arith.constant -1.000000e+30 : f32
    "tpu.trace_stop"() : () -> ()
    %277 = vector.shape_cast %13 : vector<1x1x16xi1> to vector<1x1x16xi1>
    %278 = vector.broadcast %277 : vector<1x1x16xi1> to vector<1x8x16xi1>
    %279 = vector.broadcast %cst_98 : f32 to vector<1x8x16xf32>
    %280 = arith.select %278, %276, %279 : vector<1x8x16xi1>, vector<1x8x16xf32>
    %cst_99 = arith.constant dense<0xFF800000> : vector<1x8xf32>
    %281 = vector.multi_reduction <maximumf>, %280, %cst_99 [2] : vector<1x8x16xf32> to vector<1x8xf32>
    %282 = vector.shape_cast %281 : vector<1x8xf32> to vector<1x8x1xf32>
    %283 = vector.broadcast %282 : vector<1x8x1xf32> to vector<1x8x16xf32>
    %284 = arith.subf %280, %283 : vector<1x8x16xf32>
    %285 = math.exp %284 : vector<1x8x16xf32>
    %cst_100 = arith.constant dense<0.000000e+00> : vector<1x8xf32>
    %286 = vector.multi_reduction <add>, %285, %cst_100 [2] : vector<1x8x16xf32> to vector<1x8xf32>
    %287 = vector.shape_cast %286 : vector<1x8xf32> to vector<1x8x1xf32>
    %288 = tpu.reciprocal %287 {approx = true} : vector<1x8x1xf32> -> vector<1x8x1xf32>
    %289 = vector.broadcast %288 : vector<1x8x1xf32> to vector<1x8x16xf32>
    %290 = arith.mulf %285, %289 : vector<1x8x16xf32>
    %291 = arith.truncf %290 : vector<1x8x16xf32> to vector<1x8x16xbf16>
    "tpu.trace_start"() <{level = 10 : i32, message = "bqk,bkd->bqd"}> : () -> ()
    %cst_101 = arith.constant dense<0.000000e+00> : vector<1x8x8xf32>
    %292 = tpu.matmul %291, %275, %cst_101 {dimension_numbers = #tpu.dot_dimension_numbers<[2], [1], [1], [2], [0, 0, 0, 1, 1, 2], [0], [0]>} : vector<1x8x16xbf16>, vector<1x16x8xbf16>, vector<1x8x8xf32> -> vector<1x8x8xf32>
    "tpu.trace_stop"() : () -> ()
    %293 = tpu.concatenate %223, %246, %269, %292 in 2 : vector<1x8x8xf32>, vector<1x8x8xf32>, vector<1x8x8xf32>, vector<1x8x8xf32> -> vector<1x8x32xf32>
    %294 = vector.shape_cast %293 : vector<1x8x32xf32> to vector<8x32xf32>
    %c0_102 = arith.constant 0 : index
    %c0_103 = arith.constant 0 : index
    %c0_104 = arith.constant 0 : index
    %295 = vector.load %arg17[%c0_102, %c0_103, %c0_104] : memref<1x32x32xbf16, #tpu.memory_space<vmem>>, vector<1x32x32xbf16>
    %296 = vector.shape_cast %295 : vector<1x32x32xbf16> to vector<32x32xbf16>
    %c0_105 = arith.constant 0 : index
    %c0_106 = arith.constant 0 : index
    %c0_107 = arith.constant 0 : index
    %297 = vector.load %arg18[%c0_105, %c0_106, %c0_107] : memref<1x1x32xf32, #tpu.memory_space<vmem>>, vector<1x1x32xf32>
    %298 = vector.shape_cast %297 : vector<1x1x32xf32> to vector<1x32xf32>
    %299 = arith.truncf %294 : vector<8x32xf32> to vector<8x32xbf16>
    %cst_108 = arith.constant dense<0.000000e+00> : vector<8x32xf32>
    %300 = tpu.matmul %299, %296, %cst_108 {dimension_numbers = #tpu.dot_dimension_numbers<[1], [0], [0], [1], [0, 0, 1, 1], [], []>} : vector<8x32xbf16>, vector<32x32xbf16>, vector<8x32xf32> -> vector<8x32xf32>
    %301 = vector.broadcast %298 : vector<1x32xf32> to vector<8x32xf32>
    %302 = arith.addf %300, %301 : vector<8x32xf32>
    %303 = arith.addf %152, %302 : vector<8x32xf32>
    %c0_109 = arith.constant 0 : index
    %c2 = arith.constant 2 : index
    %c0_110 = arith.constant 0 : index
    %c0_111 = arith.constant 0 : index
    %304 = vector.load %arg7[%c0_109, %c2, %c0_110, %c0_111] : memref<1x3x1x32xf32, #tpu.memory_space<vmem>>, vector<1x1x1x32xf32>
    %305 = vector.shape_cast %304 : vector<1x1x1x32xf32> to vector<1x32xf32>
    %c0_112 = arith.constant 0 : index
    %c2_113 = arith.constant 2 : index
    %c0_114 = arith.constant 0 : index
    %c0_115 = arith.constant 0 : index
    %306 = vector.load %arg8[%c0_112, %c2_113, %c0_114, %c0_115] : memref<1x3x1x32xf32, #tpu.memory_space<vmem>>, vector<1x1x1x32xf32>
    %307 = vector.shape_cast %306 : vector<1x1x1x32xf32> to vector<1x32xf32>
    %cst_116 = arith.constant dense<0.000000e+00> : vector<8xf32>
    %308 = vector.multi_reduction <add>, %303, %cst_116 [1] : vector<8x32xf32> to vector<8xf32>
    %309 = vector.shape_cast %308 : vector<8xf32> to vector<8x1xf32>
    %cst_117 = arith.constant 3.200000e+01 : f32
    %310 = vector.broadcast %cst_117 : f32 to vector<8x1xf32>
    %311 = arith.divf %309, %310 : vector<8x1xf32>
    %312 = vector.broadcast %311 : vector<8x1xf32> to vector<8x32xf32>
    %313 = arith.subf %303, %312 : vector<8x32xf32>
    %314 = arith.mulf %313, %313 : vector<8x32xf32>
    %cst_118 = arith.constant dense<0.000000e+00> : vector<8xf32>
    %315 = vector.multi_reduction <add>, %314, %cst_118 [1] : vector<8x32xf32> to vector<8xf32>
    %316 = vector.shape_cast %315 : vector<8xf32> to vector<8x1xf32>
    %cst_119 = arith.constant 3.200000e+01 : f32
    %317 = vector.broadcast %cst_119 : f32 to vector<8x1xf32>
    %318 = arith.divf %316, %317 : vector<8x1xf32>
    %319 = vector.broadcast %311 : vector<8x1xf32> to vector<8x32xf32>
    %320 = arith.subf %303, %319 : vector<8x32xf32>
    %cst_120 = arith.constant 9.99999974E-6 : f32
    %321 = vector.broadcast %cst_120 : f32 to vector<8x1xf32>
    %322 = arith.addf %318, %321 : vector<8x1xf32>
    %323 = math.rsqrt %322 : vector<8x1xf32>
    %324 = vector.broadcast %323 : vector<8x1xf32> to vector<8x32xf32>
    %325 = arith.mulf %320, %324 : vector<8x32xf32>
    %326 = vector.broadcast %305 : vector<1x32xf32> to vector<8x32xf32>
    %327 = arith.mulf %325, %326 : vector<8x32xf32>
    %328 = vector.broadcast %307 : vector<1x32xf32> to vector<8x32xf32>
    %329 = arith.addf %327, %328 : vector<8x32xf32>
    %c0_121 = arith.constant 0 : index
    %c0_122 = arith.constant 0 : index
    %c0_123 = arith.constant 0 : index
    %330 = vector.load %arg19[%c0_121, %c0_122, %c0_123] : memref<1x32x64xbf16, #tpu.memory_space<vmem>>, vector<1x32x64xbf16>
    %331 = vector.shape_cast %330 : vector<1x32x64xbf16> to vector<32x64xbf16>
    %c0_124 = arith.constant 0 : index
    %c0_125 = arith.constant 0 : index
    %c0_126 = arith.constant 0 : index
    %332 = vector.load %arg20[%c0_124, %c0_125, %c0_126] : memref<1x1x64xf32, #tpu.memory_space<vmem>>, vector<1x1x64xf32>
    %333 = vector.shape_cast %332 : vector<1x1x64xf32> to vector<1x64xf32>
    %334 = arith.truncf %329 : vector<8x32xf32> to vector<8x32xbf16>
    %cst_127 = arith.constant dense<0.000000e+00> : vector<8x64xf32>
    %335 = tpu.matmul %334, %331, %cst_127 {dimension_numbers = #tpu.dot_dimension_numbers<[1], [0], [0], [1], [0, 0, 1, 1], [], []>} : vector<8x32xbf16>, vector<32x64xbf16>, vector<8x64xf32> -> vector<8x64xf32>
    %336 = vector.broadcast %333 : vector<1x64xf32> to vector<8x64xf32>
    %337 = arith.addf %335, %336 : vector<8x64xf32>
    %cst_128 = arith.constant 0.000000e+00 : f32
    %338 = vector.broadcast %cst_128 : f32 to vector<8x64xf32>
    %339 = arith.maximumf %337, %338 : vector<8x64xf32>
    %c0_129 = arith.constant 0 : index
    %c0_130 = arith.constant 0 : index
    %c0_131 = arith.constant 0 : index
    %340 = vector.load %arg21[%c0_129, %c0_130, %c0_131] : memref<1x64x32xbf16, #tpu.memory_space<vmem>>, vector<1x64x32xbf16>
    %341 = vector.shape_cast %340 : vector<1x64x32xbf16> to vector<64x32xbf16>
    %c0_132 = arith.constant 0 : index
    %c0_133 = arith.constant 0 : index
    %c0_134 = arith.constant 0 : index
    %342 = vector.load %arg22[%c0_132, %c0_133, %c0_134] : memref<1x1x32xf32, #tpu.memory_space<vmem>>, vector<1x1x32xf32>
    %343 = vector.shape_cast %342 : vector<1x1x32xf32> to vector<1x32xf32>
    %344 = arith.truncf %339 : vector<8x64xf32> to vector<8x64xbf16>
    %cst_135 = arith.constant dense<0.000000e+00> : vector<8x32xf32>
    %345 = tpu.matmul %344, %341, %cst_135 {dimension_numbers = #tpu.dot_dimension_numbers<[1], [0], [0], [1], [0, 0, 1, 1], [], []>} : vector<8x64xbf16>, vector<64x32xbf16>, vector<8x32xf32> -> vector<8x32xf32>
    %346 = vector.broadcast %343 : vector<1x32xf32> to vector<8x32xf32>
    %347 = arith.addf %345, %346 : vector<8x32xf32>
    %348 = arith.addf %303, %347 : vector<8x32xf32>
    %c0_136 = arith.constant 0 : index
    %c0_137 = arith.constant 0 : index
    %349 = vector.load %arg28[%c0_136, %c0_137] : memref<8x32xf32, #tpu.memory_space<vmem>>, vector<8x32xf32>
    tpu.vector_store %arg28[%c0_136, %c0_137], %348 {strides = array<i32>} : memref<8x32xf32, #tpu.memory_space<vmem>>, vector<8x32xf32>,
    %c1_i32_138 = arith.constant 1 : i32
    %350 = arith.cmpi eq, %arg1, %c1_i32_138 : i32
    %351 = arith.extui %350 : i1 to i32
    %c0_i32_139 = arith.constant 0 : i32
    %352 = arith.cmpi ne, %351, %c0_i32_139 : i32
    scf.if %352 {
      %c0_140 = arith.constant 0 : index
      %c0_141 = arith.constant 0 : index
      %353 = vector.load %arg23[%c0_140, %c0_141] : memref<1x32xf32, #tpu.memory_space<vmem>>, vector<1x32xf32>
      %c0_142 = arith.constant 0 : index
      %c0_143 = arith.constant 0 : index
      %354 = vector.load %arg24[%c0_142, %c0_143] : memref<1x32xf32, #tpu.memory_space<vmem>>, vector<1x32xf32>
      %cst_144 = arith.constant dense<0.000000e+00> : vector<8xf32>
      %355 = vector.multi_reduction <add>, %348, %cst_144 [1] : vector<8x32xf32> to vector<8xf32>
      %356 = vector.shape_cast %355 : vector<8xf32> to vector<8x1xf32>
      %cst_145 = arith.constant 3.200000e+01 : f32
      %357 = vector.broadcast %cst_145 : f32 to vector<8x1xf32>
      %358 = arith.divf %356, %357 : vector<8x1xf32>
      %359 = vector.broadcast %358 : vector<8x1xf32> to vector<8x32xf32>
      %360 = arith.subf %348, %359 : vector<8x32xf32>
      %361 = arith.mulf %360, %360 : vector<8x32xf32>
      %cst_146 = arith.constant dense<0.000000e+00> : vector<8xf32>
      %362 = vector.multi_reduction <add>, %361, %cst_146 [1] : vector<8x32xf32> to vector<8xf32>
      %363 = vector.shape_cast %362 : vector<8xf32> to vector<8x1xf32>
      %cst_147 = arith.constant 3.200000e+01 : f32
      %364 = vector.broadcast %cst_147 : f32 to vector<8x1xf32>
      %365 = arith.divf %363, %364 : vector<8x1xf32>
      %366 = vector.broadcast %358 : vector<8x1xf32> to vector<8x32xf32>
      %367 = arith.subf %348, %366 : vector<8x32xf32>
      %cst_148 = arith.constant 9.99999974E-6 : f32
      %368 = vector.broadcast %cst_148 : f32 to vector<8x1xf32>
      %369 = arith.addf %365, %368 : vector<8x1xf32>
      %370 = math.rsqrt %369 : vector<8x1xf32>
      %371 = vector.broadcast %370 : vector<8x1xf32> to vector<8x32xf32>
      %372 = arith.mulf %367, %371 : vector<8x32xf32>
      %373 = vector.broadcast %353 : vector<1x32xf32> to vector<8x32xf32>
      %374 = arith.mulf %372, %373 : vector<8x32xf32>
      %375 = vector.broadcast %354 : vector<1x32xf32> to vector<8x32xf32>
      %376 = arith.addf %374, %375 : vector<8x32xf32>
      %c0_149 = arith.constant 0 : index
      %c0_150 = arith.constant 0 : index
      %377 = vector.load %arg25[%c0_149, %c0_150] : memref<32x128xbf16, #tpu.memory_space<vmem>>, vector<32x128xbf16>
      %c0_151 = arith.constant 0 : index
      %c0_152 = arith.constant 0 : index
      %378 = vector.load %arg26[%c0_151, %c0_152] : memref<1x128xf32, #tpu.memory_space<vmem>>, vector<1x128xf32>
      %379 = arith.truncf %376 : vector<8x32xf32> to vector<8x32xbf16>
      %cst_153 = arith.constant dense<0.000000e+00> : vector<8x128xf32>
      %380 = tpu.matmul %379, %377, %cst_153 {dimension_numbers = #tpu.dot_dimension_numbers<[1], [0], [0], [1], [0, 0, 1, 1], [], []>} : vector<8x32xbf16>, vector<32x128xbf16>, vector<8x128xf32> -> vector<8x128xf32>
      %381 = vector.broadcast %378 : vector<1x128xf32> to vector<8x128xf32>
      %382 = arith.addf %380, %381 : vector<8x128xf32>
      %383 = vector.shape_cast %382 : vector<8x128xf32> to vector<1x8x128xf32>
      %384 = arith.truncf %383 : vector<1x8x128xf32> to vector<1x8x128xbf16>
      %c0_154 = arith.constant 0 : index
      %c0_155 = arith.constant 0 : index
      %c0_156 = arith.constant 0 : index
      %385 = vector.load %arg27[%c0_154, %c0_155, %c0_156] : memref<1x8x128xbf16, #tpu.memory_space<vmem>>, vector<1x8x128xbf16>
      tpu.vector_store %arg27[%c0_154, %c0_155, %c0_156], %384 {strides = array<i32>} : memref<1x8x128xbf16, #tpu.memory_space<vmem>>, vector<1x8x128xbf16>,
    } else {
    }
    return
  }
  func.func @transform_0(%arg0: i32, %arg1: i32, %arg2: memref<2xi32, #tpu.memory_space<smem>>) -> (i32, i32, i32) {
    %c0_i32 = arith.constant 0 : i32
    %c0_i32_0 = arith.constant 0 : i32
    %c0_i32_1 = arith.constant 0 : i32
    return %arg0, %c0_i32, %c0_i32_0 : i32, i32, i32
  }
  func.func @transform_1(%arg0: i32, %arg1: i32, %arg2: memref<2xi32, #tpu.memory_space<smem>>) -> (i32, i32, i32) {
    %c0_i32 = arith.constant 0 : i32
    %c0_i32_0 = arith.constant 0 : i32
    %c0_i32_1 = arith.constant 0 : i32
    %c0_i32_2 = arith.constant 0 : i32
    return %c0_i32, %c0_i32_0, %c0_i32_1 : i32, i32, i32
  }
  func.func @transform_2(%arg0: i32, %arg1: i32, %arg2: memref<2xi32, #tpu.memory_space<smem>>) -> (i32, i32, i32) {
    %c0_i32 = arith.constant 0 : i32
    %c0_i32_0 = arith.constant 0 : i32
    %c0_i32_1 = arith.constant 0 : i32
    return %arg0, %c0_i32, %c0_i32_0 : i32, i32, i32
  }
  func.func @transform_3(%arg0: i32, %arg1: i32, %arg2: memref<2xi32, #tpu.memory_space<smem>>) -> (i32, i32, i32) {
    %c0_i32 = arith.constant 0 : i32
    %c0_i32_0 = arith.constant 0 : i32
    %c0_i32_1 = arith.constant 0 : i32
    return %arg0, %c0_i32, %c0_i32_0 : i32, i32, i32
  }
  func.func @transform_4(%arg0: i32, %arg1: i32, %arg2: memref<2xi32, #tpu.memory_space<smem>>) -> (i32, i32, i32, i32) {
    %c0_i32 = arith.constant 0 : i32
    %c0_i32_0 = arith.constant 0 : i32
    %c0_i32_1 = arith.constant 0 : i32
    %c0_i32_2 = arith.constant 0 : i32
    return %arg1, %c0_i32, %c0_i32_0, %c0_i32_1 : i32, i32, i32, i32
  }
  func.func @transform_5(%arg0: i32, %arg1: i32, %arg2: memref<2xi32, #tpu.memory_space<smem>>) -> (i32, i32, i32, i32) {
    %c0_i32 = arith.constant 0 : i32
    %c0_i32_0 = arith.constant 0 : i32
    %c0_i32_1 = arith.constant 0 : i32
    %c0_i32_2 = arith.constant 0 : i32
    return %arg1, %c0_i32, %c0_i32_0, %c0_i32_1 : i32, i32, i32, i32
  }
  func.func @transform_6(%arg0: i32, %arg1: i32, %arg2: memref<2xi32, #tpu.memory_space<smem>>) -> (i32, i32, i32) {
    %c0_i32 = arith.constant 0 : i32
    %c0_i32_0 = arith.constant 0 : i32
    %c0_i32_1 = arith.constant 0 : i32
    return %arg1, %c0_i32, %c0_i32_0 : i32, i32, i32
  }
  func.func @transform_7(%arg0: i32, %arg1: i32, %arg2: memref<2xi32, #tpu.memory_space<smem>>) -> (i32, i32, i32) {
    %c0_i32 = arith.constant 0 : i32
    %c0_i32_0 = arith.constant 0 : i32
    %c0_i32_1 = arith.constant 0 : i32
    return %arg1, %c0_i32, %c0_i32_0 : i32, i32, i32
  }
  func.func @transform_8(%arg0: i32, %arg1: i32, %arg2: memref<2xi32, #tpu.memory_space<smem>>) -> (i32, i32, i32) {
    %c0_i32 = arith.constant 0 : i32
    %c0_i32_0 = arith.constant 0 : i32
    %c0_i32_1 = arith.constant 0 : i32
    return %arg1, %c0_i32, %c0_i32_0 : i32, i32, i32
  }
  func.func @transform_9(%arg0: i32, %arg1: i32, %arg2: memref<2xi32, #tpu.memory_space<smem>>) -> (i32, i32, i32) {
    %c0_i32 = arith.constant 0 : i32
    %c0_i32_0 = arith.constant 0 : i32
    %c0_i32_1 = arith.constant 0 : i32
    return %arg1, %c0_i32, %c0_i32_0 : i32, i32, i32
  }
  func.func @transform_10(%arg0: i32, %arg1: i32, %arg2: memref<2xi32, #tpu.memory_space<smem>>) -> (i32, i32, i32) {
    %c0_i32 = arith.constant 0 : i32
    %c0_i32_0 = arith.constant 0 : i32
    %c0_i32_1 = arith.constant 0 : i32
    return %arg1, %c0_i32, %c0_i32_0 : i32, i32, i32
  }
  func.func @transform_11(%arg0: i32, %arg1: i32, %arg2: memref<2xi32, #tpu.memory_space<smem>>) -> (i32, i32, i32) {
    %c0_i32 = arith.constant 0 : i32
    %c0_i32_0 = arith.constant 0 : i32
    %c0_i32_1 = arith.constant 0 : i32
    return %arg1, %c0_i32, %c0_i32_0 : i32, i32, i32
  }
  func.func @transform_12(%arg0: i32, %arg1: i32, %arg2: memref<2xi32, #tpu.memory_space<smem>>) -> (i32, i32, i32) {
    %c0_i32 = arith.constant 0 : i32
    %c0_i32_0 = arith.constant 0 : i32
    %c0_i32_1 = arith.constant 0 : i32
    return %arg1, %c0_i32, %c0_i32_0 : i32, i32, i32
  }
  func.func @transform_13(%arg0: i32, %arg1: i32, %arg2: memref<2xi32, #tpu.memory_space<smem>>) -> (i32, i32, i32) {
    %c0_i32 = arith.constant 0 : i32
    %c0_i32_0 = arith.constant 0 : i32
    %c0_i32_1 = arith.constant 0 : i32
    return %arg1, %c0_i32, %c0_i32_0 : i32, i32, i32
  }
  func.func @transform_14(%arg0: i32, %arg1: i32, %arg2: memref<2xi32, #tpu.memory_space<smem>>) -> (i32, i32, i32) {
    %c0_i32 = arith.constant 0 : i32
    %c0_i32_0 = arith.constant 0 : i32
    %c0_i32_1 = arith.constant 0 : i32
    return %arg1, %c0_i32, %c0_i32_0 : i32, i32, i32
  }
  func.func @transform_15(%arg0: i32, %arg1: i32, %arg2: memref<2xi32, #tpu.memory_space<smem>>) -> (i32, i32, i32) {
    %c0_i32 = arith.constant 0 : i32
    %c0_i32_0 = arith.constant 0 : i32
    %c0_i32_1 = arith.constant 0 : i32
    return %arg1, %c0_i32, %c0_i32_0 : i32, i32, i32
  }
  func.func @transform_16(%arg0: i32, %arg1: i32, %arg2: memref<2xi32, #tpu.memory_space<smem>>) -> (i32, i32, i32) {
    %c0_i32 = arith.constant 0 : i32
    %c0_i32_0 = arith.constant 0 : i32
    %c0_i32_1 = arith.constant 0 : i32
    return %arg1, %c0_i32, %c0_i32_0 : i32, i32, i32
  }
  func.func @transform_17(%arg0: i32, %arg1: i32, %arg2: memref<2xi32, #tpu.memory_space<smem>>) -> (i32, i32, i32) {
    %c0_i32 = arith.constant 0 : i32
    %c0_i32_0 = arith.constant 0 : i32
    %c0_i32_1 = arith.constant 0 : i32
    return %arg1, %c0_i32, %c0_i32_0 : i32, i32, i32
  }
  func.func @transform_18(%arg0: i32, %arg1: i32, %arg2: memref<2xi32, #tpu.memory_space<smem>>) -> (i32, i32, i32) {
    %c0_i32 = arith.constant 0 : i32
    %c0_i32_0 = arith.constant 0 : i32
    %c0_i32_1 = arith.constant 0 : i32
    return %arg1, %c0_i32, %c0_i32_0 : i32, i32, i32
  }
  func.func @transform_19(%arg0: i32, %arg1: i32, %arg2: memref<2xi32, #tpu.memory_space<smem>>) -> (i32, i32, i32) {
    %c0_i32 = arith.constant 0 : i32
    %c0_i32_0 = arith.constant 0 : i32
    %c0_i32_1 = arith.constant 0 : i32
    return %arg1, %c0_i32, %c0_i32_0 : i32, i32, i32
  }
  func.func @transform_20(%arg0: i32, %arg1: i32, %arg2: memref<2xi32, #tpu.memory_space<smem>>) -> (i32, i32) {
    %c0_i32 = arith.constant 0 : i32
    %c0_i32_0 = arith.constant 0 : i32
    %c0_i32_1 = arith.constant 0 : i32
    return %c0_i32, %c0_i32_0 : i32, i32
  }
  func.func @transform_21(%arg0: i32, %arg1: i32, %arg2: memref<2xi32, #tpu.memory_space<smem>>) -> (i32, i32) {
    %c0_i32 = arith.constant 0 : i32
    %c0_i32_0 = arith.constant 0 : i32
    %c0_i32_1 = arith.constant 0 : i32
    return %c0_i32, %c0_i32_0 : i32, i32
  }
  func.func @transform_22(%arg0: i32, %arg1: i32, %arg2: memref<2xi32, #tpu.memory_space<smem>>) -> (i32, i32) {
    %c0_i32 = arith.constant 0 : i32
    %c0_i32_0 = arith.constant 0 : i32
    %c0_i32_1 = arith.constant 0 : i32
    return %c0_i32, %c0_i32_0 : i32, i32
  }
  func.func @transform_23(%arg0: i32, %arg1: i32, %arg2: memref<2xi32, #tpu.memory_space<smem>>) -> (i32, i32) {
    %c0_i32 = arith.constant 0 : i32
    %c0_i32_0 = arith.constant 0 : i32
    %c0_i32_1 = arith.constant 0 : i32
    return %c0_i32, %c0_i32_0 : i32, i32
  }
  func.func @transform_24(%arg0: i32, %arg1: i32, %arg2: memref<2xi32, #tpu.memory_space<smem>>) -> (i32, i32, i32) {
    %c0_i32 = arith.constant 0 : i32
    %c0_i32_0 = arith.constant 0 : i32
    %c0_i32_1 = arith.constant 0 : i32
    return %arg0, %c0_i32, %c0_i32_0 : i32, i32, i32
  }
}

</mosaic_0001>

<bundles_post_ra>
// kernel: tpu_custom_call.1
= control target key start
LH: loop header
LB: loop body
LE: loop exit
PB: predicated region body
PF: predicated region fallthrough
CT: control target
= control target key end

     0   :  { %s5782_s0 = inlined_call_operand.hbm [shape: s32[2], index: 0, kind: input, shape index: {}]   ;;  %s5783_s1 = inlined_call_operand.hbm [shape: f32[2,8,32], index: 1, kind: input, shape index: {}]   ;;  %s5784_s2 = inlined_call_operand.hbm [shape: f32[1,8,32], index: 2, kind: input, shape index: {}]   ;;  %s5785_s3 = inlined_call_operand.vmem [shape: f32[2,16,32], index: 3, kind: input, shape index: {}]   ;;  %s5786_s4 = inlined_call_operand.hbm [shape: s32[2,1,16], index: 4, kind: input, shape index: {}]   ;;  %s5787_s5 = inlined_call_operand.hbm [shape: f32[2,3,1,32], index: 5, kind: input, shape index: {}]   ;;  %s5788_s6 = inlined_call_operand.hbm [shape: f32[2,3,1,32], index: 6, kind: input, shape index: {}]   ;;  %s5789_s7 = inlined_call_operand.vmem [shape: bf16[2,32,96], index: 7, kind: input, shape index: {}]   ;;  %s5790_s8 = inlined_call_operand.hbm [shape: f32[2,1,96], index: 8, kind: input, shape index: {}]   ;;  %s5791_s9 = inlined_call_operand.vmem [shape: bf16[2,32,32], index: 9, kind: input, shape index: {}]   ;;  %s5792_s10 = inlined_call_operand.hbm [shape: f32[2,1,32], index: 10, kind: input, shape index: {}]   ;;  %s5793_s11 = inlined_call_operand.vmem [shape: bf16[2,32,32], index: 11, kind: input, shape index: {}]   ;;  %s5794_s12 = inlined_call_operand.hbm [shape: f32[2,1,32], index: 12, kind: input, shape index: {}]   ;;  %s5795_s13 = inlined_call_operand.hbm [shape: bf16[2,32,64], index: 13, kind: input, shape index: {}]   ;;  %s5796_s14 = inlined_call_operand.hbm [shape: f32[2,1,64], index: 14, kind: input, shape index: {}]   ;;  %s5797_s15 = inlined_call_operand.hbm [shape: bf16[2,32,32], index: 15, kind: input, shape index: {}]   ;;  %s5798_s16 = inlined_call_operand.hbm [shape: f32[2,1,32], index: 16, kind: input, shape index: {}]   ;;  %s5799_s17 = inlined_call_operand.hbm [shape: bf16[2,32,64], index: 17, kind: input, shape index: {}]   ;;  %s5800_s18 = inlined_call_operand.vmem [shape: f32[2,1,64], index: 18, kind: input, shape index: {}]   ;;  %s5801_s19 = inlined_call_operand.vmem [shape: bf16[2,64,32], index: 19, kind: input, shape index: {}]   ;;  %s5802_s20 = inlined_call_operand.hbm [shape: f32[2,1,32], index: 20, kind: input, shape index: {}]   ;;  %s5803_s21 = inlined_call_operand.vmem [shape: f32[1,32], index: 21, kind: input, shape index: {}]   ;;  %s5804_s22 = inlined_call_operand.hbm [shape: f32[1,32], index: 22, kind: input, shape index: {}]   ;;  %s5805_s23 = inlined_call_operand.vmem [shape: bf16[32,128], index: 23, kind: input, shape index: {}]   ;;  %s5806_s24 = inlined_call_operand.vmem [shape: f32[1,128], index: 24, kind: input, shape index: {}]   ;;  %s5807_s25 = inlined_call_operand.hbm [shape: bf16[2,8,128], index: 25, kind: output, shape index: {}]  }
   0x1   :  { %5861 = sst [smem:[#allocation45_spill]] %s5782_s0 }
   0x2   :  { %5862 = sst [smem:[#allocation46_spill]] %s5783_s1 }
   0x3   :  { %5863 = sst [smem:[#allocation47_spill]] %s5784_s2 }
   0x4   :  { %5864 = sst [smem:[#allocation48_spill]] %s5785_s3 }
   0x5   :  { %5865 = sst [smem:[#allocation49_spill]] %s5786_s4 }
   0x6   :  { %5866 = sst [smem:[#allocation50_spill]] %s5787_s5 }
   0x7   :  { %5867 = sst [smem:[#allocation51_spill]] %s5788_s6  ;;  %s5887_s6 = sld [smem:[#allocation45_spill]] }
   0x8   :  { %5868 = sst [smem:[#allocation52_spill]] %s5789_s7 }
   0x9   :  { %5869 = sst [smem:[#allocation53_spill]] %s5790_s8 }
   0xa   :  { %5870 = sst [smem:[#allocation54_spill]] %s5791_s9 }
   0xb   :  { %5871 = sst [smem:[#allocation55_spill]] %s5792_s10 }
   0xc   :  { %5872 = sst [smem:[#allocation56_spill]] %s5793_s11 }
   0xd   :  { %5873 = sst [smem:[#allocation57_spill]] %s5794_s12 }
   0xe   :  { %5874 = sst [smem:[#allocation58_spill]] %s5795_s13 }
   0xf   :  { %5875 = sst [smem:[#allocation59_spill]] %s5796_s14 }
  0x10   :  { %5876 = sst [smem:[#allocation60_spill]] %s5797_s15 }
  0x11   :  { %5877 = sst [smem:[#allocation61_spill]] %s5798_s16 }
  0x12   :  { %5878 = sst [smem:[#allocation62_spill]] %s5799_s17 }
  0x13   :  { %5879 = sst [smem:[#allocation63_spill]] %s5800_s18 }
  0x14   :  { %5880 = sst [smem:[#allocation64_spill]] %s5801_s19  ;;  %s3956_s19 = scalar_lea.hbm %s5887_s6, 16 }
  0x15   :  { %5881 = sst [smem:[#allocation65_spill]] %s5802_s20  ;;  %p3957_p0 = scmp.ne.s32.totalorder %s5887_s6, %s3956_s19 }
  0x16   :  { %5882 = sst [smem:[#allocation66_spill]] %s5803_s21  ;;  %p3960_p1 = scmp.lt.u32.totalorder %s3956_s19, %s5887_s6 }
  0x17   :  { %5883 = sst [smem:[#allocation67_spill]] %s5804_s22 }
  0x18   :  { %5884 = sst [smem:[#allocation68_spill]] %s5805_s23  ;;  %p3962_p2 = pnand %p3960_p1, %p3957_p0 }
  0x19   :  { %5885 = sst [smem:[#allocation69_spill]] %s5806_s24 }
  0x1a   :  { %5886 = sst [smem:[#allocation70_spill]] %s5807_s25 }
  0x1b   :  { %3965 = shalt.err (!%p3962_p2)  }
  0x1c   :  { %s4554_s1 = smov [#allocation4]  }
  0x1d   :  { %31 = dma.hbm_to_smem %s5887_s6, 16, %s4554_s1, [#allocation3] }
  0x1e   :  { %4484 = dma.done.wait [#allocation3], 16 }
  0x1f   :  { %4485 = vsyncadd [#allocation3], 4294967280 }
  0x20   :  { %33 = sfence }
  0x21   :  { %34 = vsyncpa [#allocation6], 0 }
  0x22   :  { %36 = vsyncpa [#allocation6 + $0x1], 0 }
  0x23   :  { %37 = vsyncpa [#allocation9], 0 }
  0x24   :  { %38 = vsyncpa [#allocation7], 0 }
  0x25   :  { %40 = vsyncpa [#allocation7 + $0x1], 0  ;;  %s4736_s4 = smov 0   ;;  %s4738_s28 = smov 0  }
  0x26   :  { %s4740_s19 = smov 0   ;;  %s4742_s9 = smov 0  }
  0x27   :  { %s4744_s5 = smov 0   ;;  %s4746_s0 = smov 0  }
  0x28   :  { %s4748_s29 = smov 0   ;;  %s4750_s2 = smov 0  }
  0x29   :  { %s4752_s6 = smov 0   ;;  %s4754_s30 = smov 0  }
  0x2a   :  { %s4756_s7 = smov 0  }
  0x2b LB: > { %5888 = sst [smem:[#allocation31_spill]] %s4516_s28  ;;  %s3345_s3 = sadd.s32 4294967294, %s4552_s7   ;;  %s4552_s7 = sphi %s4756_s7, %s46_s7   ;;  %s4548_s30 = sphi %s4754_s30, %s5996_s30   ;;  %s4544_s6 = sphi %s4752_s6, %s5995_s6   ;;  %s4540_s2 = sphi %s4750_s2, %s5994_s2   ;;  %s4536_s29 = sphi %s4748_s29, %s5993_s29   ;;  %s4532_s0 = sphi %s4746_s0, %s5992_s0   ;;  %s4528_s5 = sphi %s4744_s5, %s5991_s5   ;;  %s4524_s9 = sphi %s4742_s9, %s5990_s9   ;;  %s4520_s19 = sphi %s4740_s19, %s5989_s19   ;;  %s4516_s28 = sphi %s4738_s28, %s5988_s28   ;;  %s4512_s4 = sphi %s4736_s4, %s5987_s4  }
  0x2c   : > { %5889 = sst [smem:[#allocation32_spill]] %s4520_s19  ;;  %s55_s26 = sadd.s32 1, %s4544_s6 }
  0x2d   : > { %5890 = sst [smem:[#allocation33_spill]] %s4524_s9  ;;  %p56_p3 = scmp.ge.s32.totalorder %s55_s26, 2 }
  0x2e   : > { %5891 = sst [smem:[#allocation34_spill]] %s4528_s5  ;;  %s58_s1 = sadd.s32 1, %s4548_s30 }
  0x2f   : > { %5892 = sst [smem:[#allocation35_spill]] %s4532_s0  ;;  %s65_s8 = sadd.s32 1, %s4532_s0 }
  0x30   : > { %5893 = sst [smem:[#allocation36_spill]] %s4536_s29  ;;  %p5824_p4 = scmp.ne.s32.totalorder %s4532_s0, %s4528_s5 }
  0x31   : > { %5894 = sst [smem:[#allocation37_spill]] %s4540_s2  ;;  %s5998_s26 = smov (%p56_p3, %s55_s26), 0 }
  0x32   : > { %5895 = sst [smem:[#allocation38_spill]] %s4544_s6  ;;  %s6000_s1 = smov (!%p56_p3, %s58_s1), %s4548_s30 }
  0x33   : > { %5896 = sst [smem:[#allocation39_spill]] %s4548_s30  ;;  %p73_p5 = scmp.eq.s32.totalorder %s4552_s7, 0 }
  0x34   : > { %5897 = sst [smem:[#allocation40_spill]] %s5998_s26  ;;  %p5825_p6 = scmp.ne.s32.totalorder %s4528_s5, %s4524_s9 }
  0x35   : > { %p60_p7 = scmp.ge.s32.totalorder %s6000_s1, 2  ;;  %s161_s27 = ssub.s32 %s4544_s6, %s5998_s26 }
  0x36   : > { %p4808_p8 = por %p73_p5, %p5824_p4  ;;  %p162_p9 = scmp.eq.s32.totalorder %s161_s27, 0 }
  0x37   : > { %s6002_s1 = smov (%p60_p7, %s6000_s1), 0  ;;  %s164_s24 = sadd.s32 1, %s4520_s19 }
  0x38   : > { %5899 = sst [smem:[#allocation41_spill]] %s6002_s1  ;;  %p171_p10 = scmp.ne.s32.totalorder %s4520_s19, %s4516_s28 }
  0x39   : > { %s62_s21 = ssub.s32 %s4548_s30, %s6002_s1  ;;  %p681_p11 = scmp.eq.s32.totalorder %s3345_s3, 3 }
  0x3a   : > { %p63_p12 = scmp.eq.s32.totalorder %s62_s21, 0  ;;  %p4819_p13 = por %p171_p10, %p73_p5 }
  0x3b   : > { %s4824_s23 = scalar_select %p162_p9, %s4520_s19, %s164_s24  }
  0x3c   : > { %s4827_s11 = scalar_select %p63_p12, %s4532_s0, %s65_s8  }
  0x3d   : > { %5901 = sst [smem:[#allocation42_spill]] %s4824_s23  ;;  %p4832_p0 = por %p681_p11, %p5825_p6 }
  0x3e   : > { %5902 = sst [smem:[#allocation43_spill]] %s4827_s11  ;;  %p3780_p1 = scmp.lt.s32.totalorder %s4552_s7, 4 }
  0x3f   : > { %s5903_s27 = scalar_select %p4832_p0, 1, 0 }
  0x40   : > { %s732_s18 = sand.u32 1, %s4552_s7   ;;  %s5823_s1 = sand.u32 1, %s4532_s0  }
  0x41   : > { %5904 = sst [smem:[#allocation44_spill]] %s5903_s27  ;;  %s3350_s3 = sshll.u32 %s5823_s1, 3 }
  0x42   : > { %s3351_s21 = sshll.u32 %s4548_s30, 7  ;;  %s5905_s20 = sld [smem:[#allocation46_spill]] }
  0x43   : > { %s736_s24 = scalar_lea.vmem [#allocation5], %s3350_s3  ;;  %p4849_p2 = pnand %p3780_p1, %p4808_p8 }
  0x44   : > { %s743_s8 = sshll.u32 %s736_s24, 4  ;;  %s4856_s1 = sand.u32 1, %s4520_s19   ;;  %s4853_s8 = int_to_ptr.vmem [resolvable:$true] %s743_s8 }
  0x45   : > { %p4860_p3 = pnand %p3780_p1, %p4819_p13  ;;  %s4864_s2 = scalar_lea.sflag [#allocation6], %s732_s18 }
  0x46   : > { %p3968_p7 = pneg %p4849_p2 }
  0x47   : > { %s5907_s29 = scalar_select %p4860_p3, 1, 0 }
  0x48   : > { %s4845_s22 = scalar_lea.hbm %s5905_s20, %s3351_s21  ;;  %s3971_s24 = scalar_lea.hbm %s5905_s20, 256 }
  0x49   : > { %s3966_s3 = scalar_lea.hbm %s4845_s22, 128  ;;  %p3972_p10 = scmp.lt.u32.totalorder %s4845_s22, %s5905_s20 }
  0x4a   : > { %p3967_p5 = scmp.ne.s32.totalorder %s4845_s22, %s3966_s3  ;;  %p3973_p11 = scmp.lt.u32.totalorder %s3971_s24, %s3966_s3 }
  0x4b   : > { %p3975_p13 = scmp.lt.u32.totalorder %s3966_s3, %s4845_s22 }
  0x4c   : > { %p3969_p8 = pnand %p3968_p7, %p3967_p5  ;;  %p3974_p12 = por %p3973_p11, %p3972_p10 }
  0x4e   : > { %p3970_p9 = pneg %p3969_p8  ;;  %p3976_p1 = por %p3975_p13, %p3974_p12 }
  0x50   : > { %p3977_p4 = pnand %p3976_p1, %p3970_p9 }
  0x52   : > { %3980 = shalt.err (!%p3977_p4)
}
  0x53   : > { %s3981_s18 = scalar_lea.vmem %s4853_s8, 128  ;;  %s4555_s25 = smov [#allocation5]  }
  0x54   : > { %p3982_p5 = scmp.ne.s32.totalorder %s4853_s8, %s3981_s18  ;;  %s3986_s21 = sshll.u32 %s4555_s25, 4  ;;  %s3987_s21 = int_to_ptr.vmem [resolvable:$false] %s3986_s21 }
  0x55   : > { %s3988_s23 = scalar_lea.vmem %s3987_s21, 256  ;;  %p3989_p0 = scmp.lt.s32.totalorder %s4853_s8, %s3987_s21 }
  0x56   : > { %p3984_p8 = pnand %p3982_p5, %p3968_p7  ;;  %p3990_p10 = scmp.lt.s32.totalorder %s3988_s23, %s3981_s18 }
  0x58   : > { %p3985_p6 = pneg %p3984_p8  ;;  %p3991_p11 = por %p3990_p10, %p3989_p0 }
  0x5a   : > { %p3992_p12 = pnand %p3991_p11, %p3985_p6 }
  0x5c   : > { %3995 = shalt.err (!%p3992_p12)
}
  0x5d   : > { %3737 = dma.hbm_to_vmem [thread:$0]  (!%p4849_p2), %s4845_s22, 128, %s4853_s8, %s4864_s2  }
  0x5e   : > { %s3352_s3 = sshll.u32 %s4548_s30, 4  ;;  %s5908_s24 = sand.u32 1, %s4532_s0  }
  0x5f   : > { %s761_s26 = scalar_lea.vmem [#allocation10], %s5908_s24  ;;  %s5909_s21 = sld [smem:[#allocation49_spill]] }
  0x60   : > { %s768_s25 = sshll.u32 %s761_s26, 4  ;;  %s769_s25 = int_to_ptr.vmem [resolvable:$true] %s768_s25 }
  0x65   : > { %s766_s18 = scalar_lea.hbm %s5909_s21, %s3352_s3  ;;  %s4001_s9 = scalar_lea.hbm %s5909_s21, 32 }
  0x66   : > { %s3996_s23 = scalar_lea.hbm %s766_s18, 16  ;;  %p4002_p9 = scmp.lt.u32.totalorder %s766_s18, %s5909_s21 }
  0x67   : > { %p3997_p4 = scmp.ne.s32.totalorder %s766_s18, %s3996_s23  ;;  %p4003_p13 = scmp.lt.u32.totalorder %s4001_s9, %s3996_s23 }
  0x68   : > { %p4005_p5 = scmp.lt.u32.totalorder %s3996_s23, %s766_s18 }
  0x69   : > { %p3999_p6 = pnand %p3997_p4, %p3968_p7  ;;  %p4004_p1 = por %p4003_p13, %p4002_p9 }
  0x6b   : > { %p4000_p0 = pneg %p3999_p6  ;;  %p4006_p8 = por %p4005_p5, %p4004_p1 }
  0x6d   : > { %p4007_p10 = pnand %p4006_p8, %p4000_p0 }
  0x6f   : > { %4010 = shalt.err (!%p4007_p10)
}
  0x70   : > { %s4011_s20 = scalar_lea.vmem %s769_s25, 16  ;;  %s4556_s19 = smov [#allocation10]  }
  0x71   : > { %p4012_p11 = scmp.ne.s32.totalorder %s769_s25, %s4011_s20  ;;  %s4016_s17 = sshll.u32 %s4556_s19, 4  ;;  %s4017_s17 = int_to_ptr.vmem [resolvable:$false] %s4016_s17 }
  0x72   : > { %s4018_s27 = scalar_lea.vmem %s4017_s17, 32  ;;  %p4019_p6 = scmp.lt.s32.totalorder %s769_s25, %s4017_s17 }
  0x73   : > { %p4014_p12 = pnand %p4012_p11, %p3968_p7  ;;  %p4020_p3 = scmp.lt.s32.totalorder %s4018_s27, %s4011_s20 }
  0x75   : > { %p4015_p4 = pneg %p4014_p12  ;;  %p4021_p9 = por %p4020_p3, %p4019_p6 }
  0x77   : > { %p4022_p13 = pnand %p4021_p9, %p4015_p4 }
  0x79   : > { %4025 = shalt.err (!%p4022_p13)
}
  0x7a   : > { %3740 = dma.hbm_to_vmem [thread:$0]  (!%p4849_p2), %s766_s18, 16, %s769_s25, %s4864_s2  }
  0x7b   : > { %s5832_s9 = smul.u32 3, %s4856_s1  ;;  %s5910_s23 = sld [smem:[#allocation50_spill]] }
  0x7c   : > { %s3687_s3 = smul.u32 48, %s4544_s6  ;;  %s5911_s17 = sld [smem:[#allocation51_spill]] }
  0x7d   : > { %s779_s8 = scalar_lea.vmem [#allocation11], %s5832_s9  ;;  %p5912_p3 = scmp.ne.s32.totalorder %s5907_s29, 0 }
  0x7e   : > { %s786_s11 = sshll.u32 %s779_s8, 4  ;;  %s4922_s11 = int_to_ptr.vmem [resolvable:$true] %s786_s11 }
  0x7f   : > { %p4933_p7 = pneg %p5912_p3 }
  0x81   : > { %s4918_s22 = scalar_lea.hbm %s5910_s23, %s3687_s3  ;;  %s4031_s8 = scalar_lea.hbm %s5910_s23, 96 }
  0x82   : > { %s4927_s25 = scalar_lea.hbm %s5911_s17, %s3687_s3  ;;  %s4026_s18 = scalar_lea.hbm %s4918_s22, 48 }
  0x83   : > { %p4027_p2 = scmp.ne.s32.totalorder %s4918_s22, %s4026_s18  ;;  %p4032_p5 = scmp.lt.u32.totalorder %s4918_s22, %s5910_s23 }
  0x84   : > { %s5913_s27 = scalar_select %p4933_p7, 1, 0 }
  0x85   : > { %p4029_p0 = pnand %p4933_p7, %p4027_p2  ;;  %p4033_p8 = scmp.lt.u32.totalorder %s4031_s8, %s4026_s18 }
  0x86   : > { %p4035_p11 = scmp.lt.u32.totalorder %s4026_s18, %s4918_s22 }
  0x87   : > { %p4030_p1 = pneg %p4029_p0  ;;  %p4034_p10 = por %p4033_p8, %p4032_p5 }
  0x89   : > { %p4036_p12 = por %p4035_p11, %p4034_p10 }
  0x8b   : > { %p4037_p4 = pnand %p4036_p12, %p4030_p1 }
  0x8d   : > { %4040 = shalt.err (!%p4037_p4)
}
  0x8e   : > { %s4041_s3 = scalar_lea.vmem %s4922_s11, 48  ;;  %s4557_s20 = smov [#allocation11]  }
  0x8f   : > { %p4042_p6 = scmp.ne.s32.totalorder %s4922_s11, %s4041_s3  ;;  %s4046_s19 = sshll.u32 %s4557_s20, 4  ;;  %s4047_s19 = int_to_ptr.vmem [resolvable:$false] %s4046_s19 }
  0x90   : > { %s4048_s21 = scalar_lea.vmem %s4047_s19, 96  ;;  %p4049_p2 = scmp.lt.s32.totalorder %s4922_s11, %s4047_s19 }
  0x91   : > { %p4044_p9 = pnand %p4042_p6, %p4933_p7  ;;  %p4050_p0 = scmp.lt.s32.totalorder %s4048_s21, %s4041_s3 }
  0x93   : > { %p4045_p13 = pneg %p4044_p9  ;;  %p4051_p5 = por %p4050_p0, %p4049_p2 }
  0x95   : > { %p4052_p8 = pnand %p4051_p5, %p4045_p13 }
  0x97   : > { %4055 = shalt.err (!%p4052_p8)
}
  0x98   : > { %s4558_s9 = smov 16   ;;  %s4559_s18 = smov 1  }
  0x99   : > { %3743 = dma.hbm_to_vmem [thread:$0]  (!%p5912_p3), %s4918_s22, 48, %s4922_s11, %s4864_s2, %s4558_s9, %s4558_s9, %s4559_s18  }
  0x9a   : > { %s5914_s24 = smul.u32 3, %s4856_s1  ;;  %s4965_s3 = sshll.u32 %s4544_s6, 4 }
  0x9b   : > { %s4056_s20 = scalar_lea.hbm %s4927_s25, 48  ;;  %s4061_s23 = scalar_lea.hbm %s5911_s17, 96 }
  0x9c   : > { %s800_s26 = scalar_lea.vmem [#allocation12], %s5914_s24  ;;  %p4057_p1 = scmp.ne.s32.totalorder %s4927_s25, %s4056_s20 }
  0x9d   : > { %s807_s8 = sshll.u32 %s800_s26, 4  ;;  %p4062_p12 = scmp.lt.u32.totalorder %s4927_s25, %s5911_s17  ;;  %s4962_s8 = int_to_ptr.vmem [resolvable:$true] %s807_s8 }
  0x9e   : > { %p4059_p10 = pnand %p4057_p1, %p4933_p7  ;;  %p4063_p4 = scmp.lt.u32.totalorder %s4061_s23, %s4056_s20 }
  0x9f   : > { %p4065_p9 = scmp.lt.u32.totalorder %s4056_s20, %s4927_s25 }
  0xa0   : > { %p4060_p11 = pneg %p4059_p10  ;;  %p4064_p6 = por %p4063_p4, %p4062_p12 }
  0xa2   : > { %p4066_p13 = por %p4065_p9, %p4064_p6 }
  0xa4   : > { %p4067_p2 = pnand %p4066_p13, %p4060_p11 }
  0xa6   : > { %4070 = shalt.err (!%p4067_p2)
}
  0xa7   : > { %s4071_s22 = scalar_lea.vmem %s4962_s8, 48  ;;  %s4560_s11 = smov [#allocation12]  }
  0xa8   : > { %p4072_p0 = scmp.ne.s32.totalorder %s4962_s8, %s4071_s22  ;;  %s4076_s24 = sshll.u32 %s4560_s11, 4  ;;  %s4077_s24 = int_to_ptr.vmem [resolvable:$false] %s4076_s24 }
  0xa9   : > { %s4078_s0 = scalar_lea.vmem %s4077_s24, 96  ;;  %p4079_p1 = scmp.lt.s32.totalorder %s4962_s8, %s4077_s24 }
  0xaa   : > { %p4074_p5 = pnand %p4072_p0, %p4933_p7  ;;  %p4080_p10 = scmp.lt.s32.totalorder %s4078_s0, %s4071_s22 }
  0xac   : > { %p4075_p8 = pneg %p4074_p5  ;;  %p4081_p12 = por %p4080_p10, %p4079_p1 }
  0xae   : > { %p4082_p4 = pnand %p4081_p12, %p4075_p8 }
  0xb0   : > { %4085 = shalt.err (!%p4082_p4)
}
  0xb1   : > { %3746 = dma.hbm_to_vmem [thread:$0]  (!%p5912_p3), %s4927_s25, 48, %s4962_s8, %s4864_s2, %s4558_s9, %s4558_s9, %s4559_s18  }
  0xb2   : > { %s5915_s26 = sld [smem:[#allocation53_spill]]  ;;  %s828_s19 = scalar_lea.vmem [#allocation13], %s4856_s1 }
  0xb3   : > { %s835_s21 = sshll.u32 %s828_s19, 4  ;;  %s836_s21 = int_to_ptr.vmem [resolvable:$true] %s835_s21 }
  0xb8   : > { %s4996_s20 = scalar_lea.hbm %s5915_s26, %s4965_s3  ;;  %s4091_s25 = scalar_lea.hbm %s5915_s26, 32 }
  0xb9   : > { %s4086_s22 = scalar_lea.hbm %s4996_s20, 16  ;;  %p4092_p13 = scmp.lt.u32.totalorder %s4996_s20, %s5915_s26 }
  0xba   : > { %p4087_p11 = scmp.ne.s32.totalorder %s4996_s20, %s4086_s22  ;;  %p4093_p2 = scmp.lt.u32.totalorder %s4091_s25, %s4086_s22 }
  0xbb   : > { %p4095_p5 = scmp.lt.u32.totalorder %s4086_s22, %s4996_s20 }
  0xbc   : > { %p4089_p6 = pnand %p4087_p11, %p4933_p7  ;;  %p4094_p0 = por %p4093_p2, %p4092_p13 }
  0xbe   : > { %p4090_p9 = pneg %p4089_p6  ;;  %p4096_p8 = por %p4095_p5, %p4094_p0 }
  0xc0   : > { %p4097_p1 = pnand %p4096_p8, %p4090_p9 }
  0xc2   : > { %4100 = shalt.err (!%p4097_p1)
}
  0xc3   : > { %s4101_s8 = scalar_lea.vmem %s836_s21, 16  ;;  %s4561_s0 = smov [#allocation13]  }
  0xc4   : > { %p4102_p10 = scmp.ne.s32.totalorder %s836_s21, %s4101_s8  ;;  %s4106_s30 = sshll.u32 %s4561_s0, 4  ;;  %s4107_s30 = int_to_ptr.vmem [resolvable:$false] %s4106_s30 }
  0xc5   : > { %s4108_s23 = scalar_lea.vmem %s4107_s30, 32  ;;  %p4109_p11 = scmp.lt.s32.totalorder %s836_s21, %s4107_s30 }
  0xc6   : > { %p4104_p12 = pnand %p4102_p10, %p4933_p7  ;;  %p4110_p6 = scmp.lt.s32.totalorder %s4108_s23, %s4101_s8 }
  0xc8   : > { %p4105_p4 = pneg %p4104_p12  ;;  %p4111_p3 = por %p4110_p6, %p4109_p11 }
  0xca   : > { %p4112_p2 = pnand %p4111_p3, %p4105_p4 }
  0xcc   : > { %4115 = shalt.err (!%p4112_p2)
}
  0xcd   : > { %p5916_p13 = scmp.ne.s32.totalorder %s5907_s29, 0  ;;  %s5917_s10 = sld [smem:[#allocation55_spill]] }
  0xce   : > { %s853_s24 = scalar_lea.vmem [#allocation14], %s4856_s1 }
  0xcf   : > { %3749 = dma.hbm_to_vmem [thread:$0]  (!%p5916_p13), %s4996_s20, 16, %s836_s21, %s4864_s2  }
  0xd0   : > { %s860_s25 = sshll.u32 %s853_s24, 4  ;;  %s861_s25 = int_to_ptr.vmem [resolvable:$true] %s860_s25 }
  0xd3   : > { %s5021_s11 = scalar_lea.hbm %s5917_s10, %s4965_s3  ;;  %s4121_s20 = scalar_lea.hbm %s5917_s10, 32 }
  0xd4   : > { %s4116_s9 = scalar_lea.hbm %s5021_s11, 16  ;;  %p4122_p5 = scmp.lt.u32.totalorder %s5021_s11, %s5917_s10 }
  0xd5   : > { %p4117_p3 = scmp.ne.s32.totalorder %s5021_s11, %s4116_s9  ;;  %p4123_p8 = scmp.lt.u32.totalorder %s4121_s20, %s4116_s9 }
  0xd6   : > { %p4125_p10 = scmp.lt.u32.totalorder %s4116_s9, %s5021_s11 }
  0xd7   : > { %p4119_p9 = pnand %p4117_p3, %p4933_p7  ;;  %p4124_p1 = por %p4123_p8, %p4122_p5 }
  0xd9   : > { %p4120_p0 = pneg %p4119_p9  ;;  %p4126_p12 = por %p4125_p10, %p4124_p1 }
  0xdb   : > { %p4127_p4 = pnand %p4126_p12, %p4120_p0 }
  0xdd   : > { %4130 = shalt.err (!%p4127_p4)
}
  0xde   : > { %s4131_s30 = scalar_lea.vmem %s861_s25, 16  ;;  %s4562_s23 = smov [#allocation14]  }
  0xdf   : > { %p4132_p11 = scmp.ne.s32.totalorder %s861_s25, %s4131_s30  ;;  %s4136_s19 = sshll.u32 %s4562_s23, 4  ;;  %s4137_s19 = int_to_ptr.vmem [resolvable:$false] %s4136_s19 }
  0xe0   : > { %s4138_s22 = scalar_lea.vmem %s4137_s19, 32  ;;  %p4139_p3 = scmp.lt.s32.totalorder %s861_s25, %s4137_s19 }
  0xe1   : > { %p4134_p6 = pnand %p4132_p11, %p4933_p7  ;;  %p4140_p9 = scmp.lt.s32.totalorder %s4138_s22, %s4131_s30 }
  0xe3   : > { %p4135_p2 = pneg %p4134_p6  ;;  %p4141_p13 = por %p4140_p9, %p4139_p3 }
  0xe5   : > { %p4142_p5 = pnand %p4141_p13, %p4135_p2 }
  0xe7   : > { %4145 = shalt.err (!%p4142_p5)
}
  0xe8   : > { %p5918_p8 = scmp.ne.s32.totalorder %s5907_s29, 0  ;;  %s5919_s12 = sld [smem:[#allocation57_spill]] }
  0xe9   : > { %s878_s8 = scalar_lea.vmem [#allocation15], %s4856_s1  ;;  %s5050_s21 = sshll.u32 %s4856_s1, 4 }
  0xea   : > { %3752 = dma.hbm_to_vmem [thread:$0]  (!%p5918_p8), %s5021_s11, 16, %s861_s25, %s4864_s2  }
  0xeb   : > { %s885_s20 = sshll.u32 %s878_s8, 4  ;;  %s886_s20 = int_to_ptr.vmem [resolvable:$true] %s885_s20 }
  0xee   : > { %s5046_s18 = scalar_lea.hbm %s5919_s12, %s4965_s3  ;;  %s4151_s30 = scalar_lea.hbm %s5919_s12, 32 }
  0xef   : > { %s4146_s0 = scalar_lea.hbm %s5046_s18, 16  ;;  %p4152_p10 = scmp.lt.u32.totalorder %s5046_s18, %s5919_s12 }
  0xf0   : > { %p4147_p13 = scmp.ne.s32.totalorder %s5046_s18, %s4146_s0  ;;  %p4153_p12 = scmp.lt.u32.totalorder %s4151_s30, %s4146_s0 }
  0xf1   : > { %p4155_p11 = scmp.lt.u32.totalorder %s4146_s0, %s5046_s18 }
  0xf2   : > { %p4149_p0 = pnand %p4147_p13, %p4933_p7  ;;  %p4154_p4 = por %p4153_p12, %p4152_p10 }
  0xf4   : > { %p4150_p1 = pneg %p4149_p0  ;;  %p4156_p6 = por %p4155_p11, %p4154_p4 }
  0xf6   : > { %p4157_p2 = pnand %p4156_p6, %p4150_p1 }
  0xf8   : > { %4160 = shalt.err (!%p4157_p2)
}
  0xf9   : > { %s4161_s22 = scalar_lea.vmem %s886_s20, 16  ;;  %s4563_s24 = smov [#allocation15]  }
  0xfa   : > { %p4162_p3 = scmp.ne.s32.totalorder %s886_s20, %s4161_s22  ;;  %s4166_s9 = sshll.u32 %s4563_s24, 4  ;;  %s4167_s9 = int_to_ptr.vmem [resolvable:$false] %s4166_s9 }
  0xfb   : > { %s4168_s8 = scalar_lea.vmem %s4167_s9, 32  ;;  %p4169_p13 = scmp.lt.s32.totalorder %s886_s20, %s4167_s9 }
  0xfc   : > { %p4164_p9 = pnand %p4162_p3, %p4933_p7  ;;  %p4170_p0 = scmp.lt.s32.totalorder %s4168_s8, %s4161_s22 }
  0xfe   : > { %p4165_p5 = pneg %p4164_p9  ;;  %p4171_p8 = por %p4170_p0, %p4169_p13 }
 0x100   : > { %p4172_p10 = pnand %p4171_p8, %p4165_p5 }
 0x102   : > { %4175 = shalt.err (!%p4172_p10)
}
 0x103   : > { %p5920_p12 = scmp.ne.s32.totalorder %s5907_s29, 0  ;;  %s5071_s0 = sshll.u32 %s4544_s6, 8 }
 0x104   : > { %s5921_s13 = sld [smem:[#allocation58_spill]]  ;;  %s896_s23 = scalar_lea.vmem [#allocation16], %s5050_s21 }
 0x105   : > { %3755 = dma.hbm_to_vmem [thread:$0]  (!%p5920_p12), %s5046_s18, 16, %s886_s20, %s4864_s2  }
 0x106   : > { %s903_s19 = sshll.u32 %s896_s23, 4  ;;  %s5080_s19 = int_to_ptr.vmem [resolvable:$true] %s903_s19 }
 0x10a   : > { %s5077_s30 = scalar_lea.hbm %s5921_s13, %s5071_s0  ;;  %s4181_s24 = scalar_lea.hbm %s5921_s13, 512 }
 0x10b   : > { %s4176_s22 = scalar_lea.hbm %s5077_s30, 256  ;;  %p4182_p11 = scmp.lt.u32.totalorder %s5077_s30, %s5921_s13 }
 0x10c   : > { %p4177_p8 = scmp.ne.s32.totalorder %s5077_s30, %s4176_s22  ;;  %p4183_p6 = scmp.lt.u32.totalorder %s4181_s24, %s4176_s22 }
 0x10d   : > { %p4185_p3 = scmp.lt.u32.totalorder %s4176_s22, %s5077_s30 }
 0x10e   : > { %p4179_p1 = pnand %p4177_p8, %p4933_p7  ;;  %p4184_p2 = por %p4183_p6, %p4182_p11 }
 0x110   : > { %p4180_p4 = pneg %p4179_p1  ;;  %p4186_p9 = por %p4185_p3, %p4184_p2 }
 0x112   : > { %p4187_p5 = pnand %p4186_p9, %p4180_p4 }
 0x114   : > { %4190 = shalt.err (!%p4187_p5)
}
 0x115   : > { %s4191_s11 = scalar_lea.vmem %s5080_s19, 256  ;;  %s4564_s25 = smov [#allocation16]  }
 0x116   : > { %p4192_p13 = scmp.ne.s32.totalorder %s5080_s19, %s4191_s11  ;;  %s4196_s23 = sshll.u32 %s4564_s25, 4  ;;  %s4197_s23 = int_to_ptr.vmem [resolvable:$false] %s4196_s23 }
 0x117   : > { %s4198_s18 = scalar_lea.vmem %s4197_s23, 512  ;;  %p4199_p8 = scmp.lt.s32.totalorder %s5080_s19, %s4197_s23 }
 0x118   : > { %p4194_p0 = pnand %p4192_p13, %p4933_p7  ;;  %p4200_p1 = scmp.lt.s32.totalorder %s4198_s18, %s4191_s11 }
 0x11a   : > { %p4195_p10 = pneg %p4194_p0  ;;  %p4201_p11 = por %p4200_p1, %p4199_p8 }
 0x11c   : > { %p4202_p6 = pnand %p4201_p11, %p4195_p10 }
 0x11e   : > { %4205 = shalt.err (!%p4202_p6)
}
 0x11f   : > { %s5838_s22 = smov 64   ;;  %s5841_s20 = smov 4  }
 0x120   : > { %3758 = dma.hbm_to_vmem [thread:$0]  (!%p5920_p12), %s5077_s30, 256, %s5080_s19, %s4864_s2, %s5838_s22, %s5838_s22, %s5841_s20  }
 0x121   : > { %s5922_s14 = sld [smem:[#allocation59_spill]]  ;;  %s916_s11 = scalar_lea.vmem [#allocation17], %s4856_s1 }
 0x122   : > { %s923_s25 = sshll.u32 %s916_s11, 4  ;;  %s924_s25 = int_to_ptr.vmem [resolvable:$true] %s923_s25 }
 0x127   : > { %s5111_s8 = scalar_lea.hbm %s5922_s14, %s4965_s3  ;;  %s4211_s30 = scalar_lea.hbm %s5922_s14, 32 }
 0x128   : > { %s4206_s23 = scalar_lea.hbm %s5111_s8, 16  ;;  %p4212_p9 = scmp.lt.u32.totalorder %s5111_s8, %s5922_s14 }
 0x129   : > { %p4207_p4 = scmp.ne.s32.totalorder %s5111_s8, %s4206_s23  ;;  %p4213_p5 = scmp.lt.u32.totalorder %s4211_s30, %s4206_s23 }
 0x12a   : > { %p4215_p0 = scmp.lt.u32.totalorder %s4206_s23, %s5111_s8 }
 0x12b   : > { %p4209_p2 = pnand %p4207_p4, %p4933_p7  ;;  %p4214_p13 = por %p4213_p5, %p4212_p9 }
 0x12d   : > { %p4210_p3 = pneg %p4209_p2  ;;  %p4216_p10 = por %p4215_p0, %p4214_p13 }
 0x12f   : > { %p4217_p8 = pnand %p4216_p10, %p4210_p3 }
 0x131   : > { %4220 = shalt.err (!%p4217_p8)
}
 0x132   : > { %s4221_s9 = scalar_lea.vmem %s924_s25, 16  ;;  %s4567_s11 = smov [#allocation17]  }
 0x133   : > { %p4222_p1 = scmp.ne.s32.totalorder %s924_s25, %s4221_s9  ;;  %s4226_s22 = sshll.u32 %s4567_s11, 4  ;;  %s4227_s22 = int_to_ptr.vmem [resolvable:$false] %s4226_s22 }
 0x134   : > { %s4228_s10 = scalar_lea.vmem %s4227_s22, 32  ;;  %p4229_p4 = scmp.lt.s32.totalorder %s924_s25, %s4227_s22 }
 0x135   : > { %p4224_p11 = pnand %p4222_p1, %p4933_p7  ;;  %p4230_p2 = scmp.lt.s32.totalorder %s4228_s10, %s4221_s9 }
 0x137   : > { %p4225_p6 = pneg %p4224_p11  ;;  %p4231_p12 = por %p4230_p2, %p4229_p4 }
 0x139   : > { %p4232_p5 = pnand %p4231_p12, %p4225_p6 }
 0x13b   : > { %4235 = shalt.err (!%p4232_p5)
}
 0x13c   : > { %p5923_p9 = scmp.ne.s32.totalorder %s5907_s29, 0  ;;  %s5924_s15 = sld [smem:[#allocation60_spill]] }
 0x13d   : > { %s934_s22 = scalar_lea.vmem [#allocation18], %s5050_s21 }
 0x13e   : > { %3761 = dma.hbm_to_vmem [thread:$0]  (!%p5923_p9), %s5111_s8, 16, %s924_s25, %s4864_s2  }
 0x13f   : > { %s941_s19 = sshll.u32 %s934_s22, 4  ;;  %s5139_s19 = int_to_ptr.vmem [resolvable:$true] %s941_s19 }
 0x142   : > { %s5136_s30 = scalar_lea.hbm %s5924_s15, %s5071_s0  ;;  %s4241_s25 = scalar_lea.hbm %s5924_s15, 512 }
 0x143   : > { %s4236_s24 = scalar_lea.hbm %s5136_s30, 256  ;;  %p4242_p0 = scmp.lt.u32.totalorder %s5136_s30, %s5924_s15 }
 0x144   : > { %p4237_p12 = scmp.ne.s32.totalorder %s5136_s30, %s4236_s24  ;;  %p4243_p10 = scmp.lt.u32.totalorder %s4241_s25, %s4236_s24 }
 0x145   : > { %p4245_p1 = scmp.lt.u32.totalorder %s4236_s24, %s5136_s30 }
 0x146   : > { %p4239_p3 = pnand %p4237_p12, %p4933_p7  ;;  %p4244_p8 = por %p4243_p10, %p4242_p0 }
 0x148   : > { %p4240_p13 = pneg %p4239_p3  ;;  %p4246_p11 = por %p4245_p1, %p4244_p8 }
 0x14a   : > { %p4247_p6 = pnand %p4246_p11, %p4240_p13 }
 0x14c   : > { %4250 = shalt.err (!%p4247_p6)
}
 0x14d   : > { %s4251_s23 = scalar_lea.vmem %s5139_s19, 256  ;;  %s4568_s18 = smov [#allocation18]  }
 0x14e   : > { %p4252_p4 = scmp.ne.s32.totalorder %s5139_s19, %s4251_s23  ;;  %s4256_s22 = sshll.u32 %s4568_s18, 4  ;;  %s4257_s22 = int_to_ptr.vmem [resolvable:$false] %s4256_s22 }
 0x14f   : > { %s4258_s9 = scalar_lea.vmem %s4257_s22, 512  ;;  %p4259_p12 = scmp.lt.s32.totalorder %s5139_s19, %s4257_s22 }
 0x150   : > { %p4254_p2 = pnand %p4252_p4, %p4933_p7  ;;  %p4260_p3 = scmp.lt.s32.totalorder %s4258_s9, %s4251_s23 }
 0x152   : > { %p4255_p5 = pneg %p4254_p2  ;;  %p4261_p0 = por %p4260_p3, %p4259_p12 }
 0x154   : > { %p4262_p10 = pnand %p4261_p0, %p4255_p5 }
 0x156   : > { %4265 = shalt.err (!%p4262_p10)
}
 0x157   : > { %s5925_s24 = smov 64   ;;  %s5926_s16 = sld [smem:[#allocation61_spill]] }
 0x158   : > { %3764 = dma.hbm_to_vmem [thread:$0]  (!%p5923_p9), %s5136_s30, 256, %s5139_s19, %s4864_s2, %s5925_s24, %s5925_s24, %s5841_s20  }
 0x159   : > { %s954_s10 = scalar_lea.vmem [#allocation19], %s4856_s1 }
 0x15a   : > { %s961_s23 = sshll.u32 %s954_s10, 4  ;;  %s962_s23 = int_to_ptr.vmem [resolvable:$true] %s961_s23 }
 0x15d   : > { %s5170_s11 = scalar_lea.hbm %s5926_s16, %s4965_s3  ;;  %s4271_s30 = scalar_lea.hbm %s5926_s16, 32 }
 0x15e   : > { %s4266_s18 = scalar_lea.hbm %s5170_s11, 16  ;;  %p4272_p11 = scmp.lt.u32.totalorder %s5170_s11, %s5926_s16 }
 0x15f   : > { %p4267_p13 = scmp.ne.s32.totalorder %s5170_s11, %s4266_s18  ;;  %p4273_p6 = scmp.lt.u32.totalorder %s4271_s30, %s4266_s18 }
 0x160   : > { %p4275_p2 = scmp.lt.u32.totalorder %s4266_s18, %s5170_s11 }
 0x161   : > { %p4269_p8 = pnand %p4267_p13, %p4933_p7  ;;  %p4274_p4 = por %p4273_p6, %p4272_p11 }
 0x163   : > { %p4270_p1 = pneg %p4269_p8  ;;  %p4276_p5 = por %p4275_p2, %p4274_p4 }
 0x165   : > { %p4277_p12 = pnand %p4276_p5, %p4270_p1 }
 0x167   : > { %4280 = shalt.err (!%p4277_p12)
}
 0x168   : > { %s4281_s25 = scalar_lea.vmem %s962_s23, 16  ;;  %s4569_s10 = smov [#allocation19]  }
 0x169   : > { %p4282_p3 = scmp.ne.s32.totalorder %s962_s23, %s4281_s25  ;;  %s4286_s20 = sshll.u32 %s4569_s10, 4  ;;  %s4287_s20 = int_to_ptr.vmem [resolvable:$false] %s4286_s20 }
 0x16a   : > { %s4288_s22 = scalar_lea.vmem %s4287_s20, 32  ;;  %p4289_p13 = scmp.lt.s32.totalorder %s962_s23, %s4287_s20 }
 0x16b   : > { %p4284_p0 = pnand %p4282_p3, %p4933_p7  ;;  %p4290_p8 = scmp.lt.s32.totalorder %s4288_s22, %s4281_s25 }
 0x16d   : > { %p4285_p10 = pneg %p4284_p0  ;;  %p4291_p9 = por %p4290_p8, %p4289_p13 }
 0x16f   : > { %p4292_p6 = pnand %p4291_p9, %p4285_p10 }
 0x171   : > { %4295 = shalt.err (!%p4292_p6)
}
 0x172   : > { %p5927_p11 = scmp.ne.s32.totalorder %s5907_s29, 0  ;;  %s5928_s18 = sld [smem:[#allocation33_spill]] }
 0x173   : > { %s5929_s9 = sld [smem:[#allocation35_spill]]  ;;  %s5192_s20 = sadd.s32 4294967295, %s4552_s7  }
 0x174   : > { %3767 = dma.hbm_to_vmem [thread:$0]  (!%p5927_p11), %s5170_s11, 16, %s962_s23, %s4864_s2  }
 0x175   : > { %p5843_p9 = scmp.eq.s32.totalorder %s5192_s20, 0  ;;  %p177_p1 = scmp.ne.s32.totalorder %s4516_s28, %s4512_s4 }
 0x176   : > { %p675_p4 = scmp.eq.s32.totalorder %s5192_s20, 3  ;;  %p3346_p2 = scmp.ge.s32.totalorder %s4552_s7, 1 }
 0x177   : > { %p5210_p3 = por %p177_p1, %p5843_p9  ;;  %p688_p13 = scmp.lt.s32.totalorder %s4552_s7, 5 }
 0x178   : > { %p5930_p5 = scmp.ne.s32.totalorder %s4528_s5, %s5928_s18  ;;  %s4570_s19 = smov [#allocation8]  }
 0x179   : > { %s5932_s11 = scalar_select %p5210_p3, 1, 0 }
 0x17a   : > { %p5204_p12 = por %p5843_p9, %p5930_p5  ;;  %p5933_p0 = scmp.ne.s32.totalorder %s5929_s9, %s4528_s5 }
 0x17b   : > { %p5222_p8 = pnand %p3346_p2, %p688_p13  ;;  %s701_s8 = sshll.u32 %s4570_s19, 4  ;;  %s5226_s8 = int_to_ptr.vmem [resolvable:$true] %s701_s8 }
 0x17c   : > { %s5931_s30 = scalar_select %p5204_p12, 1, 0 }
 0x17d   : > { %p5217_p10 = por %p675_p4, %p5933_p0  ;;  %p3727_p6 = pneg %p5222_p8 }
 0x17e   : > { %s5935_s4 = scalar_select %p5222_p8, 1, 0 }
 0x17f   : > { %s5934_s23 = scalar_select %p5217_p10, 1, 0 }
 0x180   : > { %s5936_s22 = sld [smem:[#allocation62_spill]]  ;;  %s972_s9 = scalar_lea.vmem [#allocation20], %s5050_s21 }
 0x181   : > { %s979_s12 = sshll.u32 %s972_s9, 4  ;;  %p5239_p1 = pnand %p3727_p6, %p5843_p9  ;;  %s5243_s12 = int_to_ptr.vmem [resolvable:$true] %s979_s12 }
 0x183   : > { %s5937_s13 = scalar_select %p5239_p1, 1, 0 }
 0x186   : > { %s5234_s18 = scalar_lea.hbm %s5936_s22, %s5071_s0  ;;  %s4301_s10 = scalar_lea.hbm %s5936_s22, 512 }
 0x187   : > { %s4296_s19 = scalar_lea.hbm %s5234_s18, 256  ;;  %p4302_p0 = scmp.lt.u32.totalorder %s5234_s18, %s5936_s22 }
 0x188   : > { %p4297_p4 = scmp.ne.s32.totalorder %s5234_s18, %s4296_s19  ;;  %p4303_p13 = scmp.lt.u32.totalorder %s4301_s10, %s4296_s19 }
 0x189   : > { %p4305_p9 = scmp.lt.u32.totalorder %s4296_s19, %s5234_s18 }
 0x18a   : > { %p4299_p2 = pnand %p4297_p4, %p4933_p7  ;;  %p4304_p6 = por %p4303_p13, %p4302_p0 }
 0x18c   : > { %p4300_p5 = pneg %p4299_p2  ;;  %p4306_p10 = por %p4305_p9, %p4304_p6 }
 0x18e   : > { %p4307_p3 = pnand %p4306_p10, %p4300_p5 }
 0x190   : > { %4310 = shalt.err (!%p4307_p3)
}
 0x191   : > { %s4311_s21 = scalar_lea.vmem %s5243_s12, 256  ;;  %s4571_s9 = smov [#allocation20]  }
 0x192   : > { %p4312_p4 = scmp.ne.s32.totalorder %s5243_s12, %s4311_s21  ;;  %s4316_s0 = sshll.u32 %s4571_s9, 4  ;;  %s4317_s0 = int_to_ptr.vmem [resolvable:$false] %s4316_s0 }
 0x193   : > { %s4318_s14 = scalar_lea.vmem %s4317_s0, 512  ;;  %p4319_p8 = scmp.lt.s32.totalorder %s5243_s12, %s4317_s0 }
 0x194   : > { %p4314_p2 = pnand %p4312_p4, %p4933_p7  ;;  %p4320_p1 = scmp.lt.s32.totalorder %s4318_s14, %s4311_s21 }
 0x196   : > { %p4315_p12 = pneg %p4314_p2  ;;  %p4321_p0 = por %p4320_p1, %p4319_p8 }
 0x198   : > { %p4322_p13 = pnand %p4321_p0, %p4315_p12 }
 0x19a   : > { %4325 = shalt.err (!%p4322_p13)
}
 0x19b   : > { %s5938_s15 = smov 4   ;;  %s4572_s19 = smov [#allocation22]  }
 0x19c   : > { %3770 = dma.hbm_to_vmem [thread:$0]  (!%p5927_p11), %s5234_s18, 256, %s5243_s12, %s4864_s2, %s5925_s24, %s5925_s24, %s5938_s15  }
 0x19d   : > { %s715_s25 = sshll.u32 %s4572_s19, 4  ;;  %s5939_s0 = sld [smem:[#allocation47_spill]]  ;;  %s716_s25 = int_to_ptr.vmem [resolvable:$true] %s715_s25 }
 0x19e   : > { %p5941_p12 = scmp.ne.s32.totalorder %s5937_s13, 0 }
 0x1a0   : > { %p4328_p3 = pneg %p5941_p12 }
 0x1a3   : > { %s5940_s16 = smov %s5939_s0  ;;  %s4326_s21 = scalar_lea.hbm %s5939_s0, 128 }
 0x1a4   : > { %p4327_p9 = scmp.ne.s32.totalorder %s5940_s16, %s4326_s21  ;;  %p4333_p1 = scmp.lt.u32.totalorder %s4326_s21, %s5940_s16 }
 0x1a6   : > { %p4329_p10 = pnand %p4328_p3, %p4327_p9 }
 0x1a8   : > { %p4330_p8 = pneg %p4329_p10 }
 0x1aa   : > { %p4335_p5 = pnand %p4333_p1, %p4330_p8 }
 0x1ac   : > { %4338 = shalt.err (!%p4335_p5)
}
 0x1ad   : > { %s4339_s12 = scalar_lea.vmem %s5226_s8, 128  ;;  %p4347_p0 = scmp.lt.s32.totalorder %s5226_s8, %s5226_s8 }
 0x1ae   : > { %p4340_p6 = scmp.ne.s32.totalorder %s5226_s8, %s4339_s12  ;;  %p4348_p13 = scmp.lt.s32.totalorder %s4339_s12, %s4339_s12 }
 0x1b0   : > { %p4342_p4 = pnand %p4340_p6, %p4328_p3  ;;  %p4349_p9 = por %p4348_p13, %p4347_p0 }
 0x1b2   : > { %p4343_p2 = pneg %p4342_p4 }
 0x1b4   : > { %p4350_p10 = pnand %p4349_p9, %p4343_p2 }
 0x1b6   : > { %4353 = shalt.err (!%p4350_p10)
}
 0x1b7   : > { %3730 = dma.hbm_to_vmem [thread:$0]  (!%p5941_p12), %s5940_s16, 128, %s5226_s8, [#allocation9]  }
 0x1b8   : > { %s5942_s18 = sld [smem:[#allocation67_spill]] }
 0x1be   : > { %s4354_s15 = scalar_lea.hbm %s5942_s18, 16 }
 0x1bf   : > { %p4355_p8 = scmp.ne.s32.totalorder %s5942_s18, %s4354_s15  ;;  %p4361_p6 = scmp.lt.u32.totalorder %s4354_s15, %s5942_s18 }
 0x1c1   : > { %p4357_p1 = pnand %p4355_p8, %p4328_p3 }
 0x1c3   : > { %p4358_p5 = pneg %p4357_p1 }
 0x1c5   : > { %p4363_p4 = pnand %p4361_p6, %p4358_p5 }
 0x1c7   : > { %4366 = shalt.err (!%p4363_p4)
}
 0x1c8   : > { %s4367_s8 = scalar_lea.vmem %s716_s25, 16  ;;  %s4374_s21 = scalar_lea.vmem %s716_s25, 32 }
 0x1c9   : > { %p4368_p2 = scmp.ne.s32.totalorder %s716_s25, %s4367_s8  ;;  %p4375_p9 = scmp.lt.s32.totalorder %s716_s25, %s716_s25 }
 0x1ca   : > { %p4376_p10 = scmp.lt.s32.totalorder %s4374_s21, %s4367_s8 }
 0x1cb   : > { %p4370_p0 = pnand %p4368_p2, %p4328_p3 }
 0x1cc   : > { %p4377_p11 = por %p4376_p10, %p4375_p9 }
 0x1cd   : > { %p4371_p13 = pneg %p4370_p0 }
 0x1cf   : > { %p4378_p7 = pnand %p4377_p11, %p4371_p13 }
 0x1d1   : > { %4381 = shalt.err (!%p4378_p7)
}
 0x1d2   : > { %3733 = dma.hbm_to_vmem [thread:$0]  (!%p5941_p12), %s5942_s18, 16, %s716_s25, [#allocation9]  }
 0x1d3   : > { %s5943_s24 = sld [smem:[#allocation65_spill]]  ;;  %s1006_s15 = scalar_lea.vmem [#allocation21], %s4856_s1 }
 0x1d4   : > { %s1013_s19 = sshll.u32 %s1006_s15, 4  ;;  %p5944_p11 = scmp.ne.s32.totalorder %s5913_s27, 0  ;;  %s1014_s19 = int_to_ptr.vmem [resolvable:$true] %s1013_s19 }
 0x1d9   : > { %s5321_s22 = scalar_lea.hbm %s5943_s24, %s4965_s3  ;;  %s4387_s25 = scalar_lea.hbm %s5943_s24, 32 }
 0x1da   : > { %s4382_s13 = scalar_lea.hbm %s5321_s22, 16  ;;  %p4388_p12 = scmp.lt.u32.totalorder %s5321_s22, %s5943_s24 }
 0x1db   : > { %p4383_p7 = scmp.ne.s32.totalorder %s5321_s22, %s4382_s13  ;;  %p4389_p1 = scmp.lt.u32.totalorder %s4387_s25, %s4382_s13 }
 0x1dc   : > { %p4391_p6 = scmp.lt.u32.totalorder %s4382_s13, %s5321_s22 }
 0x1dd   : > { %p4385_p3 = pnand %p4383_p7, %p5944_p11  ;;  %p4390_p5 = por %p4389_p1, %p4388_p12 }
 0x1df   : > { %p4386_p8 = pneg %p4385_p3  ;;  %p4392_p4 = por %p4391_p6, %p4390_p5 }
 0x1e1   : > { %p4393_p2 = pnand %p4392_p4, %p4386_p8 }
 0x1e3   : > { %4396 = shalt.err (!%p4393_p2)
}
 0x1e4   : > { %s4397_s1 = scalar_lea.vmem %s1014_s19, 16  ;;  %s4573_s3 = smov [#allocation21]  }
 0x1e5   : > { %p4398_p0 = scmp.ne.s32.totalorder %s1014_s19, %s4397_s1  ;;  %s4402_s21 = sshll.u32 %s4573_s3, 4  ;;  %s4403_s21 = int_to_ptr.vmem [resolvable:$false] %s4402_s21 }
 0x1e6   : > { %s4404_s14 = scalar_lea.vmem %s4403_s21, 32  ;;  %p4405_p10 = scmp.lt.s32.totalorder %s1014_s19, %s4403_s21 }
 0x1e7   : > { %p4400_p13 = pnand %p4398_p0, %p5944_p11  ;;  %p4406_p7 = scmp.lt.s32.totalorder %s4404_s14, %s4397_s1 }
 0x1e9   : > { %p4401_p9 = pneg %p4400_p13  ;;  %p4407_p3 = por %p4406_p7, %p4405_p10 }
 0x1eb   : > { %p4408_p1 = pnand %p4407_p3, %p4401_p9 }
 0x1ed   : > { %4411 = shalt.err (!%p4408_p1)
}
 0x1ee   : > { %p5945_p12 = scmp.ne.s32.totalorder %s5907_s29, 0  ;;  %p5946_p8 = scmp.ne.s32.totalorder %s5935_s4, 0 }
 0x1ef   : > { %s1024_s27 = sand.u32 (!%p5946_p8), 1, %s5192_s20   ;;  %s5346_s12 = sand.u32 (!%p5946_p8), 1, %s4528_s5  }
 0x1f0   : > { %3773 = dma.hbm_to_vmem [thread:$0]  (!%p5945_p12), %s5321_s22, 16, %s1014_s19, %s4864_s2  }
 0x1f1   : > { %1022 = sbr.rel (%p5946_p8) target bundleno = 5412 (0x1524), region = 116  ;;  %s3371_s17 = sshll.u32 (!%p5946_p8), %s5346_s12, 3 }
 0x1f2   : > { %s1025_s26 = scalar_lea.sflag (!%p5946_p8), [#allocation6], %s1024_s27  ;;  %s5349_s15 = scalar_lea.vmem (!%p5946_p8), [#allocation5], %s3371_s17 }
 0x1f3   : > { %p5947_p11 = scmp.ne.s32.totalorder (!%p5946_p8), %s5931_s30, 0 }
 0x1f8   : > { %4487 = dma.done.wait (%p5947_p11), %s1025_s26, 128  }
 0x1f9   : > { %4489 = vsyncadd (%p5947_p11), %s1025_s26, 4294967168  ;;  %p5948_p5 = scmp.eq.s32.totalorder %s5192_s20, 0 }
 0x1fb   : > { %4491 = dma.done.wait (%p5948_p5), [#allocation9], 128   ;;  %p5949_p6 = pmov %p5948_p5 }
 0x1fc   : > { %s1040_s29 = scalar_lea.vmem [#allocation10], %s5346_s12 }
 0x1fd   : > { %4493 = vsyncadd (%p5949_p6), [#allocation9], 4294967168 }
 0x1fe   : > { %4495 = dma.done.wait (%p5947_p11), %s1025_s26, 16  }
 0x1ff   : > { %4497 = vsyncadd (%p5947_p11), %s1025_s26, 4294967280  ;;  %s5365_s2 = sand.u32 1, %s4516_s28   ;;  %p5950_p4 = scmp.ne.s32.totalorder %s5932_s11, 0 }
 0x200   : > { %s3690_s4 = smul.u32 3, %s5365_s2 }
 0x202   : > { %s5368_s22 = scalar_lea.vmem [#allocation11], %s3690_s4 }
 0x203   : > { %4499 = dma.done.wait (%p5950_p4), %s1025_s26, 960  }
 0x204   : > { %4501 = vsyncadd (%p5950_p4), %s1025_s26, 4294966336  ;;  %s5375_s30 = sshll.u32 %s5365_s2, 4  ;;  %s5377_s19 = scalar_lea.vmem [#allocation12], %s3690_s4 }
 0x205   : > { %p5951_p2 = pmov %p5948_p5 }
 0x207   : > { %4503 = dma.done.wait (%p5951_p2), [#allocation9], 16   ;;  %p5952_p0 = pmov %p5951_p2 }
 0x208   : > { %s5953_s21 = sld [smem:[#allocation37_spill]]  ;;  %s5954_s14 = sld [smem:[#allocation36_spill]]  ;;  %v1312_v0 = vlaneseq  ;;  %v5410_v4 = vld [vmem:[%s1040_s29] sm:$0x1] }
 0x209   : > { %4505 = vsyncadd (%p5952_p0), [#allocation9], 4294967280  ;;  %s3377_s27 = sshll.u32 %s5346_s12, 2  ;;  %s5955_s3 = sld [smem:[#allocation48_spill]]  ;;  %vm1322_vm2 = vcmp.gt.s32.totalorder %v5410_v4, 0 }
 0x20a   : > { %v5395_v1 = vshrl.u32 %v1312_v0, 7  ;;  %v1315_v2 = vand.u32 127, %v1312_v0  ;;  %s5959_s25 = sld [smem:[#allocation52_spill]]  ;;  %s5960_s29 = sld [smem:[#allocation54_spill]] }
 0x20b   : > { %s5961_s24 = sld [smem:[#allocation56_spill]]  ;;  %s5441_s28 = scalar_lea.vmem [#allocation23], %s3377_s27 }
 0x20c   : > { %vm1316_vm0 = vcmp.le.s32.totalorder %v1315_v2, %v5395_v1 }
 0x20e   : > { %p1283_p13 = scmp.lt.s32.totalorder %s5953_s21, 1  ;;  %s1317_s17 = sld [smem:[#allocation4 + %s5953_s21]] }
 0x20f   : > { %p1288_p9 = scmp.lt.s32.totalorder %s5954_s14, 1  ;;  %p3388_p10 = scmp.ne.s32.totalorder %s5954_s14, 0 }
 0x210   : > { %s6004_s21 = smov (!%p1283_p13, %s5953_s21), 1  ;;  %v1327_v6 = vld [vmem:[%s5349_s15] sm:$0xff] (!%p3388_p10)  ;;  %v1328_v7 = vld [vmem:[#allocation8] sm:$0xff] (!%p3388_p10)  ;;  %vm1330_vm4 = vcmask (!%p3388_p10), 261120  }
 0x211   : > { %s3459_s26 = sshll.u32 %s6004_s21, 4  ;;  %v1329_v8 = vadd.f32 (!%p3388_p10), %v1328_v7, %v1327_v6 }
 0x212   : > { %s5402_s1 = scalar_lea.vmem %s5955_s3, %s3459_s26  ;;  %s5962_s3 = sld [smem:[#allocation64_spill]] }
 0x213   : > { %s5406_s8 = scalar_select %p1288_p9, %s5954_s14, 1 }
 0x214   : > { %v1318_v3 = vstv %s1317_s17  ;;  %1326 = sbr.rel (%p3388_p10) target bundleno = 539 (0x21b), region = 180  ;;  %1331 = vst.msk [vmem:[#allocation2] sm:$0xff] (!%p3388_p10), %vm1330_vm4, %v1329_v8 }
 0x215   : > { %vm1319_vm1 = vcmp.lt.s32.totalorder %v1315_v2, %v1318_v3  ;;  %s3460_s21 = sshll.u32 %s5406_s8, 4  ;;  %s3463_s9 = sshll.u32 %s5406_s8, 5 }
 0x216   : > { %vm5418_vm3 = vmand %vm1316_vm0, %vm1319_vm1  ;;  %s1292_s11 = scalar_lea.vmem %s5959_s25, %s3460_s21  ;;  %s5428_s13 = scalar_lea.vmem %s5960_s29, %s3460_s21 }
 0x217   : > { %s5433_s6 = scalar_lea.vmem %s5961_s24, %s3460_s21 }
 0x218   : > { %s5439_s5 = scalar_lea.vmem %s5962_s3, %s3463_s9 }
 0x21b PF: > { %v5445_v9 = vld [vmem:[#allocation2] sm:$0xff]  ;;  %vm1335_vm5 = vcmask 261120   ;;  %v4574_v17 = vmov 0.0   ;;  %vm4575_vm6 = vmmov 0   ;;  %v3899_v18 = vld [vmem:[%s1292_s11 + $0x8] sm:$0xff]   ;;  %s5963_s16 = scalar_lea.vmem [#allocation13], %s5365_s2 }
 0x21c   : > { %v1336_v10 = vsel %vm1335_vm5, %v5445_v9, 0.0  ;;  %v3898_v16 = vld [vmem:[%s1292_s11] sm:$0xff]   ;;  %3522 = vmatprep.subr.bf16.mxu1 %v4574_v17  ;;  %3526 = vmatprep.mubr.msk.bf16.mxu1 %vm4575_vm6, %v4574_v17  ;;  %v3390_v25 = vld [vmem:[%s5377_s19] ss:$0 sm:$0xff]  ;;  %s4576_s18 = smov 120   ;;  %s4577_s24 = smov 96  }
 0x21d   : > { %1337 = vadd.xlane.f32.xlu0 %v1336_v10  ;;  %3523 = vmatpush3.bf16.msra.mxu1 %v3898_v16  ;;  %v3389_v23 = vld [vmem:[%s5368_s22] ss:$0 sm:$0xff]  ;;  %v3391_v29 = vld [vmem:[%s5963_s16] ss:$0 sm:$0xff]  ;;  %s4578_s15 = smov 88   ;;  %s4579_s10 = smov 80  }
 0x21e   : > { %3536 = vmatprep.subr.bf16.mxu0 %v4574_v17  ;;  %3524 = vmatprep.subr.bf16.mxu1 %v4574_v17  ;;  %s4580_s11 = smov 112   ;;  %s4581_s25 = smov 72   ;;  %vm1435_vm7 = vcmask 64512   ;;  %vm1500_vm8 = vcmask 1043456   ;;  %vm1890_vm9 = vcmask 130048   ;;  %vm1892_vm10 = vcmask 195584  }
 0x21f   : > { %3538 = vmatprep.mubr.msk.bf16.mxu0 %vm4575_vm6, %v4574_v17  ;;  %s4582_s14 = smov 104   ;;  %s4583_s27 = smov 64   ;;  %vm2794_vm12 = vcmask 523264  }
 0x220   : > { %s4584_s21 = smov 56   ;;  %s4585_s3 = smov 48  }
 0x221   : > { %3525 = vmatpush3.bf16.msra.mxu1 %v3899_v18  ;;  %s4586_s26 = smov 40   ;;  %s4587_s20 = smov 8  }
 0x222   : > { %3530 = vmatprep.subr.bf16.mxu1 %v4574_v17  ;;  %s4588_s17 = smov 16   ;;  %s4589_s29 = smov 24  }
 0x223   : > { %s5965_s9 = scalar_lea.vmem [#allocation16], %s5375_s30  ;;  %s5969_s4 = scalar_lea.vmem [#allocation18], %s5375_s30 }
 0x224   : > { %s5966_s0 = smov %s5965_s9  ;;  %s5970_s16 = smov %s5969_s4 }
 0x2aa   : > { %v1338_v11 = vpop.xlane.xlu0 %1337 }
 0x2ab   : > { %v1340_v12 = vmul.f32 0.03125, %v1338_v11 }
 0x2ad   : > { %v1341_v13 = vsub.f32 %v5445_v9, %v1340_v12 }
 0x2af   : > { %v1342_v14 = vmul.f32 %v1341_v13, %v1341_v13 }
 0x2b1   : > { %v1343_v15 = vsel %vm1335_vm5, %v1342_v14, 0.0 }
 0x2b2   : > { %1344 = vadd.xlane.f32.xlu0 %v1343_v15 }
 0x33f   : > { %v1345_v19 = vpop.xlane.xlu0 %1344 }
 0x340   : > { %v1346_v20 = vmul.f32 0.03125, %v1345_v19 }
 0x342   : > { %v1347_v21 = vadd.f32 1e-05, %v1346_v20 }
 0x344   : > { %3914 = vrsqrt.f32 %v1347_v21 }
 0x34e   : > { %v3915_v22 = vpop.eup %3914 }
 0x34f   : > { %v1349_v24 = vmul.f32 %v3915_v22, %v1341_v13 }
 0x351   : > { %v1356_v26 = vmul.f32 %v3389_v23, %v1349_v24 }
 0x353   : > { %v1363_v27 = vadd.f32 %v3390_v25, %v1356_v26 }
 0x355   : > { %v1369_v28 = vpack.c.bf16 %v1363_v27, %v1363_v27 }
 0x357   : > { %3527 = vmatmul.mubr.msk.bf16.vlgmr.msra.gmra.mrb[0].mxu1 %vm1335_vm5, %v1369_v28 }
 0x358   : > { %3532 = vmatprep.mubr.msk.bf16.mxu1 %vm4575_vm6, %v4574_v17 }
 0x42a   : > { %v1425_v30 = vpop.f32.mrb[0].mxu1 }
 0x42b   : > { %v1426_v31 = vadd.f32 %v3391_v29, %v1425_v30  ;;  %v3528_v32 = vpop.f32.mrb[1].mxu1 }
 0x42c   : > { %v1428_v33 = vpop.f32.mrb[2].mxu1 }
 0x42d   : > { %v5466_v34 = vpack.c.bf16 %v1426_v31, %v1426_v31  ;;  %v3529_v35 = vpop.f32.mrb[3].mxu1 }
 0x42f   : > { %1544 = vrot.lane.b32.xlu0 %v5466_v34, %s4576_s18  ;;  %1433 = vrot.lane.b32.xlu1 %v5466_v34, %s4577_s24 }
 0x433   : > { %1546 = vrot.lane.b32.xlu1 %v5466_v34, %s4578_s15 }
 0x437   : > { %1657 = vrot.lane.b32.xlu1 %v5466_v34, %s4579_s10 }
 0x43b   : > { %1655 = vrot.lane.b32.xlu1 %v5466_v34, %s4580_s11 }
 0x43f   : > { %1768 = vrot.lane.b32.xlu1 %v5466_v34, %s4581_s25 }
 0x443   : > { %1766 = vrot.lane.b32.xlu1 %v5466_v34, %s4582_s14 }
 0x4a1   : > { %v1434_v36 = vpop.permute.xlu1 %1433  ;;  %v1545_v41 = vpop.permute.xlu0 %1544 }
 0x4a2   : > { %v1440_v37 = vsel %vm1435_vm7, %v1434_v36, 0 }
 0x4a3   : > { %3531 = vmatpush3.bf16.xpose.msra.mxu1 %v1440_v37 }
 0x4a4   : > { %3542 = vmatprep.subr.bf16.mxu1 %v4574_v17 }
 0x4a5   : > { %v1547_v38 = vpop.permute.xlu1 %1546 }
 0x4a6   : > { %v1552_v39 = vsel %vm1435_vm7, %v1547_v38, 0 }
 0x4a9   : > { %v1658_v40 = vpop.permute.xlu1 %1657 }
 0x4aa   : > { %3533 = vmatmul.mubr.msk.bf16.vlgmr.msra.gmra.mrb[4].mxu1 %vm1435_vm7, %v5466_v34  ;;  %v1663_v43 = vsel %vm1435_vm7, %v1658_v40, 0 }
 0x4ab   : > { %3543 = vmatpush3.bf16.xpose.msra.mxu1 %v1552_v39  ;;  %3544 = vmatprep.mubr.msk.bf16.mxu1 %vm4575_vm6, %v4574_v17 }
 0x4ac   : > { %3554 = vmatprep.subr.bf16.mxu1 %v4574_v17 }
 0x4ad   : > { %v1656_v42 = vpop.permute.xlu1 %1655 }
 0x4b1   : > { %v1769_v44 = vpop.permute.xlu1 %1768 }
 0x4b2   : > { %3545 = vmatmul.mubr.msk.bf16.vlgmr.msra.gmra.mrb[8].mxu1 %vm1435_vm7, %v1545_v41  ;;  %v1774_v45 = vsel %vm1435_vm7, %v1769_v44, 0 }
 0x4b3   : > { %3555 = vmatpush3.bf16.xpose.msra.mxu1 %v1663_v43  ;;  %3556 = vmatprep.mubr.msk.bf16.mxu1 %vm4575_vm6, %v4574_v17 }
 0x4b4   : > { %3566 = vmatprep.subr.bf16.mxu1 %v4574_v17 }
 0x4b5   : > { %v1767_v46 = vpop.permute.xlu1 %1766 }
 0x4ba   : > { %3557 = vmatmul.mubr.msk.bf16.vlgmr.msra.gmra.mrb[12].mxu1 %vm1435_vm7, %v1656_v42 }
 0x4bb   : > { %3567 = vmatpush3.bf16.xpose.msra.mxu1 %v1774_v45  ;;  %3568 = vmatprep.mubr.msk.bf16.mxu1 %vm4575_vm6, %v4574_v17 }
 0x4bc   : > { %3578 = vmatprep.subr.bf16.mxu1 %v4574_v17 }
 0x4c2   : > { %3569 = vmatmul.mubr.msk.bf16.vlgmr.msra.gmra.mrb[16].mxu1 %vm1435_vm7, %v1767_v46 }
 0x4c3   : > { %3582 = vmatprep.mubr.msk.bf16.mxu1 %vm4575_vm6, %v4574_v17 }
 0x57d   : > { %v1476_v47 = vpop.f32.mrb[4].mxu1 }
 0x57e   : > { %v1482_v48 = vsel %vm5418_vm3, %v1476_v47, -1e+30  ;;  %v3534_v49 = vpop.f32.mrb[5].mxu1 }
 0x57f   : > { %v1479_v50 = vpop.f32.mrb[6].mxu1  ;;  %v1483_v51 = vsel %vm1435_vm7, %v1482_v48, -inf }
 0x580   : > { %1484 = vmax.xlane.f32.xlu1 %v1483_v51  ;;  %v3535_v52 = vpop.f32.mrb[7].mxu1 }
 0x585   : > { %v1588_v53 = vpop.f32.mrb[8].mxu1 }
 0x586   : > { %v1594_v54 = vsel %vm5418_vm3, %v1588_v53, -1e+30  ;;  %v3546_v55 = vpop.f32.mrb[9].mxu1 }
 0x587   : > { %v1591_v56 = vpop.f32.mrb[10].mxu1  ;;  %v1595_v57 = vsel %vm1435_vm7, %v1594_v54, -inf }
 0x588   : > { %1596 = vmax.xlane.f32.xlu0 %v1595_v57  ;;  %v3547_v58 = vpop.f32.mrb[11].mxu1 }
 0x58d   : > { %v1699_v59 = vpop.f32.mrb[12].mxu1 }
 0x58e   : > { %v1705_v60 = vsel %vm5418_vm3, %v1699_v59, -1e+30  ;;  %v3558_v61 = vpop.f32.mrb[13].mxu1 }
 0x58f   : > { %v1702_v62 = vpop.f32.mrb[14].mxu1  ;;  %v1706_v63 = vsel %vm1435_vm7, %v1705_v60, -inf }
 0x590   : > { %1707 = vmax.xlane.f32.xlu1 %v1706_v63  ;;  %v3559_v0 = vpop.f32.mrb[15].mxu1  ;;  %v3900_v63 = vld [vmem:[%s5428_s13] sm:$0xff]  }
 0x591   : > { %3579 = vmatpush3.bf16.msra.mxu1 %v3900_v63  ;;  %v3901_v0 = vld [vmem:[%s5428_s13 + $0x8] sm:$0xff]   ;;  %s5964_s13 = scalar_lea.vmem [#allocation14], %s5365_s2 }
 0x592   : > { %3580 = vmatprep.subr.bf16.mxu1 %v4574_v17 }
 0x595   : > { %v1810_v2 = vpop.f32.mrb[16].mxu1  ;;  %3581 = vmatpush3.bf16.msra.mxu1 %v3901_v0 }
 0x596   : > { %v1816_v3 = vsel %vm5418_vm3, %v1810_v2, -1e+30  ;;  %v3570_v6 = vpop.f32.mrb[17].mxu1  ;;  %3594 = vmatprep.subr.bf16.mxu1 %v4574_v17 }
 0x597   : > { %v1813_v7 = vpop.f32.mrb[18].mxu1  ;;  %v1817_v8 = vsel %vm1435_vm7, %v1816_v3, -inf }
 0x598   : > { %1818 = vmax.xlane.f32.xlu0 %v1817_v8  ;;  %v3571_v10 = vpop.f32.mrb[19].mxu1 }
 0x60d   : > { %v1485_v11 = vpop.xlane.xlu1 %1484 }
 0x60e   : > { %v1486_v12 = vsub.f32 %v1482_v48, %v1485_v11 }
 0x610   : > { %v1487_v13 = vmul.f32 1.442695, %v1486_v12 }
 0x612   : > { %3916 = vpow2.f32 %v1487_v13 }
 0x615   : > { %v1597_v14 = vpop.xlane.xlu0 %1596 }
 0x616   : > { %v1598_v15 = vsub.f32 %v1594_v54, %v1597_v14 }
 0x618   : > { %v1599_v16 = vmul.f32 1.442695, %v1598_v15 }
 0x61a   : > { %3918 = vpow2.f32 %v1599_v16 }
 0x61c   : > { %v3917_v18 = vpop.eup %3916 }
 0x61d   : > { %v1489_v19 = vsel %vm1435_vm7, %v3917_v18, 0.0  ;;  %v1708_v26 = vpop.xlane.xlu1 %1707 }
 0x61e   : > { %1490 = vadd.xlane.f32.xlu1 %v1489_v19  ;;  %v1709_v27 = vsub.f32 %v1705_v60, %v1708_v26 }
 0x620   : > { %v1710_v28 = vmul.f32 1.442695, %v1709_v27 }
 0x624   : > { %v3919_v5 = vpop.eup %3918 }
 0x625   : > { %v1819_v20 = vpop.xlane.xlu0 %1818  ;;  %v1601_v21 = vsel %vm1435_vm7, %v3919_v5, 0.0 }
 0x626   : > { %v1820_v22 = vsub.f32 %v1816_v3, %v1819_v20  ;;  %1602 = vadd.xlane.f32.xlu0 %v1601_v21  ;;  %v3403_v20 = vld [vmem:[%s5964_s13] ss:$0 sm:$0xff] }
 0x628   : > { %v1821_v23 = vmul.f32 1.442695, %v1820_v22 }
 0x62a   : > { %3920 = vpow2.f32 %v1821_v23 }
 0x62b   : > { %3922 = vpow2.f32 %v1710_v28 }
 0x62f   : > { %1495 = vrot.lane.b32.xlu1 %v5466_v34, %s4583_s27 }
 0x634   : > { %v3921_v24 = vpop.eup %3920 }
 0x635   : > { %v1823_v25 = vsel %vm1435_vm7, %v3921_v24, 0.0  ;;  %v3923_v29 = vpop.eup %3922 }
 0x636   : > { %1824 = vadd.xlane.f32.xlu0 %v1823_v25  ;;  %v1712_v30 = vsel %vm1435_vm7, %v3923_v29, 0.0 }
 0x64c   : > { %1607 = vrot.lane.b32.xlu0 %v5466_v34, %s4584_s21 }
 0x653   : > { %1713 = vadd.xlane.f32.xlu1 %v1712_v30 }
 0x664   : > { %1718 = vrot.lane.b32.xlu1 %v5466_v34, %s4585_s3 }
 0x668   : > { %1829 = vrot.lane.b32.xlu1 %v5466_v34, %s4586_s26 }
 0x6ab   : > { %v1491_v31 = vpop.xlane.xlu1 %1490 }
 0x6ac   : > { %3924 = vrcp.f32 %v1491_v31 }
 0x6af   : > { %v1496_v32 = vpop.permute.xlu1 %1495 }
 0x6b0   : > { %v1502_v33 = vsel %vm1500_vm8, %v1496_v32, 0 }
 0x6b1   : > { %3537 = vmatpush3.bf16.msra.mxu0 %v1502_v33  ;;  %v3902_v33 = vld [vmem:[%s5965_s9] sm:$0xff]  }
 0x6b2   : > { %3548 = vmatprep.subr.bf16.mxu0 %v4574_v17 }
 0x6b3   : > { %v1603_v36 = vpop.xlane.xlu0 %1602 }
 0x6b4   : > { %3926 = vrcp.f32 %v1603_v36  ;;  %v2061_v36 = vld [vmem:[%s5402_s1 + $0x8] sm:$0xff] }
 0x6b6   : > { %v3925_v35 = vpop.eup %3924 }
 0x6b7   : > { %v1493_v37 = vmul.f32 %v3925_v35, %v3917_v18  ;;  %v2060_v35 = vld [vmem:[%s5402_s1] sm:$0xff]  ;;  %s5968_s1 = scalar_lea.vmem [#allocation15], %s5365_s2 }
 0x6b9   : > { %v1494_v38 = vpack.c.bf16 %v1493_v37, %v1493_v37  ;;  %v2067_v37 = vpack.c.bf16 %v2061_v36, %v2060_v35 }
 0x6bb   : > { %3539 = vmatmul.mubr.msk.bf16.vlgmr.msra.gmra.mrb[0].mxu0 %vm1435_vm7, %v1494_v38  ;;  %v3904_v38 = vld [vmem:[%s5433_s6] sm:$0xff]  }
 0x6bc   : > { %3550 = vmatprep.mubr.msk.bf16.mxu0 %vm4575_vm6, %v4574_v17 }
 0x6be   : > { %v3927_v34 = vpop.eup %3926 }
 0x6bf   : > { %v1605_v40 = vmul.f32 %v3927_v34, %v3919_v5  ;;  %v3905_v34 = vld [vmem:[%s5433_s6 + $0x8] sm:$0xff]   ;;  %s5967_s6 = scalar_lea.vmem [#allocation17], %s5365_s2 }
 0x6c1   : > { %v1606_v43 = vpack.c.bf16 %v1605_v40, %v1605_v40 }
 0x6c3   : > { %v1825_v39 = vpop.xlane.xlu0 %1824 }
 0x6c7   : > { %v1608_v41 = vpop.permute.xlu0 %1607 }
 0x6c8   : > { %v1613_v42 = vsel %vm1500_vm8, %v1608_v41, 0 }
 0x6c9   : > { %3549 = vmatpush3.bf16.msra.mxu0 %v1613_v42 }
 0x6ca   : > { %3560 = vmatprep.subr.bf16.mxu0 %v4574_v17 }
 0x6cc   : > { %3551 = vmatmul.mubr.msk.bf16.vlgmr.msra.gmra.mrb[4].mxu0 %vm1435_vm7, %v1606_v43  ;;  %v3409_v43 = vld [vmem:[%s5368_s22 + $0x1] ss:$0 sm:$0xff] }
 0x6cd   : > { %3562 = vmatprep.mubr.msk.bf16.mxu0 %vm4575_vm6, %v4574_v17 }
 0x6e0   : > { %v1714_v44 = vpop.xlane.xlu1 %1713 }
 0x6e1   : > { %3928 = vrcp.f32 %v1714_v44 }
 0x6e2   : > { %3930 = vrcp.f32 %v1825_v39 }
 0x6e4   : > { %v1719_v45 = vpop.permute.xlu1 %1718 }
 0x6e5   : > { %v1724_v46 = vsel %vm1500_vm8, %v1719_v45, 0  ;;  %v3410_v45 = vld [vmem:[%s5377_s19 + $0x1] ss:$0 sm:$0xff] }
 0x6e6   : > { %3561 = vmatpush3.bf16.msra.mxu0 %v1724_v46 }
 0x6e7   : > { %3572 = vmatprep.subr.bf16.mxu0 %v4574_v17 }
 0x6e8   : > { %v1830_v49 = vpop.permute.xlu1 %1829 }
 0x6e9   : > { %v1835_v52 = vsel %vm1500_vm8, %v1830_v49, 0  ;;  %v3415_v49 = vld [vmem:[%s5967_s6] ss:$0 sm:$0xff] }
 0x6eb   : > { %v3929_v47 = vpop.eup %3928 }
 0x6ec   : > { %v1716_v48 = vmul.f32 %v3929_v47, %v3923_v29  ;;  %v3931_v51 = vpop.eup %3930 }
 0x6ed   : > { %v1827_v53 = vmul.f32 %v3931_v51, %v3921_v24 }
 0x6ee   : > { %v1717_v50 = vpack.c.bf16 %v1716_v48, %v1716_v48 }
 0x6ef   : > { %v1828_v54 = vpack.c.bf16 %v1827_v53, %v1827_v53 }
 0x6f0   : > { %3563 = vmatmul.mubr.msk.bf16.vlgmr.msra.gmra.mrb[8].mxu0 %vm1435_vm7, %v1717_v50 }
 0x6f1   : > { %3573 = vmatpush3.bf16.msra.mxu0 %v1835_v52  ;;  %3574 = vmatprep.mubr.msk.bf16.mxu0 %vm4575_vm6, %v4574_v17 }
 0x6f2   : > { %3586 = vmatprep.subr.bf16.mxu0 %v4574_v17 }
 0x6f8   : > { %3575 = vmatmul.mubr.msk.bf16.vlgmr.msra.gmra.mrb[12].mxu0 %vm1435_vm7, %v1828_v54 }
 0x6f9   : > { %3590 = vmatprep.mubr.msk.bf16.mxu0 %vm4575_vm6, %v4574_v17  ;;  %3587 = vmatpush3.bf16.msra.mxu0 %v3904_v38 }
 0x6fa   : > { %3588 = vmatprep.subr.bf16.mxu0 %v4574_v17 }
 0x6fd   : > { %3589 = vmatpush3.bf16.msra.mxu0 %v3905_v34 }
 0x6fe   : > { %3602 = vmatprep.subr.bf16.mxu0 %v4574_v17 }
 0x78e   : > { %v1538_v55 = vpop.f32.mrb[0].mxu0 }
 0x78f   : > { %v3540_v56 = vpop.f32.mrb[1].mxu0 }
 0x790   : > { %v1541_v57 = vpop.f32.mrb[2].mxu0 }
 0x791   : > { %v3541_v58 = vpop.f32.mrb[3].mxu0 }
 0x792   : > { %v3411_v58 = vld [vmem:[%s5968_s1] ss:$0 sm:$0xff] }
 0x79f   : > { %v1649_v59 = vpop.f32.mrb[4].mxu0 }
 0x7a0   : > { %1878 = vrot.lane.b32.xlu0 %v1649_v59, %s4587_s20  ;;  %v3552_v60 = vpop.f32.mrb[5].mxu0 }
 0x7a1   : > { %v1652_v61 = vpop.f32.mrb[6].mxu0 }
 0x7a2   : > { %v3553_v62 = vpop.f32.mrb[7].mxu0 }
 0x7c3   : > { %v1760_v2 = vpop.f32.mrb[8].mxu0 }
 0x7c4   : > { %1882 = vrot.lane.b32.xlu1 %v1760_v2, %s4588_s17  ;;  %v3564_v3 = vpop.f32.mrb[9].mxu0 }
 0x7c5   : > { %v1763_v6 = vpop.f32.mrb[10].mxu0 }
 0x7c6   : > { %v3565_v7 = vpop.f32.mrb[11].mxu0 }
 0x7cb   : > { %v1871_v8 = vpop.f32.mrb[12].mxu0 }
 0x7cc   : > { %1886 = vrot.lane.b32.xlu0 %v1871_v8, %s4589_s29  ;;  %v3576_v10 = vpop.f32.mrb[13].mxu0 }
 0x7cd   : > { %v1874_v11 = vpop.f32.mrb[14].mxu0 }
 0x7ce   : > { %v3577_v12 = vpop.f32.mrb[15].mxu0 }
 0x812   : > { %v1879_v13 = vpop.permute.xlu0 %1878 }
 0x813   : > { %v1889_v15 = vsel %vm1435_vm7, %v1538_v55, %v1879_v13 }
 0x836   : > { %v1883_v14 = vpop.permute.xlu1 %1882 }
 0x837   : > { %v1891_v16 = vsel %vm1890_vm9, %v1889_v15, %v1883_v14  ;;  %v2181_v14 = vsub.s32 0, %v5395_v1  ;;  %v4590_v15 = vmov 0  }
 0x83e   : > { %v1887_v18 = vpop.permute.xlu0 %1886 }
 0x83f   : > { %v1893_v19 = vsel %vm1892_vm10, %v1891_v16, %v1887_v18  ;;  %v2178_v16 = vsel %vm1322_vm2, 1, %v4590_v15 }
 0x840   : > { %v1899_v5 = vpack.c.bf16 %v1893_v19, %v1893_v19  ;;  %v2182_v18 = vrot.slane %v2178_v16, %v2181_v14 }
 0x842   : > { %3583 = vmatmul.mubr.msk.bf16.vlgmr.msra.gmra.mrb[20].mxu1 %vm1335_vm5, %v1899_v5  ;;  %vm2183_vm11 = vcmp.eq.s32.totalorder %v2182_v18, 1 }
 0x843   : > { %3598 = vmatprep.mubr.msk.bf16.mxu1 %vm4575_vm6, %v4574_v17  ;;  %3595 = vmatpush3.bf16.msra.mxu1 %v3902_v33 }
 0x844   : > { %3596 = vmatprep.subr.bf16.mxu1 %v4574_v17 }
 0x915   : > { %v1955_v21 = vpop.f32.mrb[20].mxu1 }
 0x916   : > { %v1956_v22 = vadd.f32 %v3403_v20, %v1955_v21  ;;  %v3584_v23 = vpop.f32.mrb[21].mxu1 }
 0x917   : > { %v1958_v24 = vpop.f32.mrb[22].mxu1 }
 0x918   : > { %v5559_v25 = vadd.f32 %v1956_v22, %v5445_v9  ;;  %v3585_v26 = vpop.f32.mrb[23].mxu1  ;;  %v3903_v9 = vld [vmem:[%s5966_s0 + $0x8] sm:$0xff]  }
 0x919   : > { %3597 = vmatpush3.bf16.msra.mxu1 %v3903_v9 }
 0x91a   : > { %v1966_v27 = vsel %vm1335_vm5, %v5559_v25, 0.0  ;;  %3608 = vmatprep.subr.bf16.mxu1 %v4574_v17 }
 0x91b   : > { %1967 = vadd.xlane.f32.xlu1 %v1966_v27 }
 0x91c   : > { %3599 = vmatmul.mubr.msk.bf16.vlgmr.msra.gmra.mrb[24].mxu1 %vm1335_vm5, %v2067_v37 }
 0x91d   : > { %3610 = vmatprep.mubr.msk.bf16.mxu1 %vm4575_vm6, %v4574_v17 }
 0x9a8   : > { %v1968_v28 = vpop.xlane.xlu1 %1967 }
 0x9a9   : > { %v1969_v29 = vmul.f32 0.03125, %v1968_v28 }
 0x9ab   : > { %v1970_v30 = vsub.f32 %v5559_v25, %v1969_v29 }
 0x9ad   : > { %v1971_v31 = vmul.f32 %v1970_v30, %v1970_v30 }
 0x9af   : > { %v1972_v32 = vsel %vm1335_vm5, %v1971_v31, 0.0 }
 0x9b0   : > { %1973 = vadd.xlane.f32.xlu0 %v1972_v32 }
 0x9ef   : > { %v2123_v50 = vpop.f32.mrb[24].mxu1 }
 0x9f0   : > { %v2124_v51 = vadd.f32 %v3415_v49, %v2123_v50  ;;  %v3600_v52 = vpop.f32.mrb[25].mxu1 }
 0x9f1   : > { %v2126_v53 = vpop.f32.mrb[26].mxu1 }
 0x9f2   : > { %v2127_v54 = vadd.f32 %v3415_v49, %v2126_v53  ;;  %v3601_v55 = vpop.f32.mrb[27].mxu1 }
 0x9f4   : > { %v5587_v56 = vpack.c.bf16 %v2127_v54, %v2124_v51 }
 0x9f6   : > { %2247 = vrot.lane.b32.xlu0 %v5587_v56, %s4576_s18  ;;  %v2136_v57 = vsel %vm1435_vm7, %v5587_v56, 0 }
 0xa3d   : > { %v1974_v39 = vpop.xlane.xlu0 %1973 }
 0xa3e   : > { %v1975_v40 = vmul.f32 0.03125, %v1974_v39 }
 0xa40   : > { %v1976_v41 = vadd.f32 1e-05, %v1975_v40 }
 0xa42   : > { %3932 = vrsqrt.f32 %v1976_v41 }
 0xa4c   : > { %v3933_v42 = vpop.eup %3932 }
 0xa4d   : > { %v1978_v44 = vmul.f32 %v3933_v42, %v1970_v30 }
 0xa4f   : > { %v1985_v46 = vmul.f32 %v3409_v43, %v1978_v44 }
 0xa51   : > { %v1992_v47 = vadd.f32 %v3410_v45, %v1985_v46 }
 0xa53   : > { %v1998_v48 = vpack.c.bf16 %v1992_v47, %v1992_v47 }
 0xa55   : > { %3591 = vmatmul.mubr.msk.bf16.vlgmr.msra.gmra.mrb[16].mxu0 %vm1335_vm5, %v1998_v48 }
 0xa56   : > { %3604 = vmatprep.mubr.msk.bf16.mxu0 %vm4575_vm6, %v4574_v17  ;;  %3603 = vmatpush3.bf16.xpose.msra.mxu0 %v2136_v57 }
 0xa57   : > { %3614 = vmatprep.subr.bf16.mxu0 %v4574_v17 }
 0xa68   : > { %v2248_v62 = vpop.permute.xlu0 %2247 }
 0xa69   : > { %v2253_v3 = vsel %vm1435_vm7, %v2248_v62, 0 }
 0xb28   : > { %v2054_v59 = vpop.f32.mrb[16].mxu0 }
 0xb29   : > { %v2055_v60 = vadd.f32 %v3411_v58, %v2054_v59  ;;  %v3592_v61 = vpop.f32.mrb[17].mxu0 }
 0xb2a   : > { %v2057_v63 = vpop.f32.mrb[18].mxu0 }
 0xb2b   : > { %v2130_v0 = vpack.c.bf16 %v2055_v60, %v2055_v60  ;;  %v3593_v2 = vpop.f32.mrb[19].mxu0 }
 0xb2d   : > { %2245 = vrot.lane.b32.xlu1 %v2130_v0, %s4576_s18  ;;  %2354 = vrot.lane.b32.xlu0 %v2130_v0, %s4580_s11  ;;  %s5971_s18 = scalar_lea.vmem [#allocation19], %s5365_s2 }
 0xb2e   : > { %3605 = vmatmul.mubr.msk.bf16.vlgmr.msra.gmra.mrb[20].mxu0 %vm1435_vm7, %v2130_v0 }
 0xb2f   : > { %3615 = vmatpush3.bf16.xpose.msra.mxu0 %v2253_v3  ;;  %3616 = vmatprep.mubr.msk.bf16.mxu0 %vm4575_vm6, %v4574_v17 }
 0xb30   : > { %3626 = vmatprep.subr.bf16.mxu0 %v4574_v17 }
 0xb31   : > { %2356 = vrot.lane.b32.xlu1 %v5587_v56, %s4580_s11  ;;  %2463 = vrot.lane.b32.xlu0 %v2130_v0, %s4582_s14  ;;  %s5974_s11 = sld [smem:[#allocation63_spill]] }
 0xb35   : > { %2465 = vrot.lane.b32.xlu1 %v5587_v56, %s4582_s14 }
 0xb9f   : > { %v2246_v6 = vpop.permute.xlu1 %2245  ;;  %v2355_v11 = vpop.permute.xlu0 %2354 }
 0xba0   : > { %3617 = vmatmul.mubr.msk.bf16.vlgmr.msra.gmra.mrb[24].mxu0 %vm1435_vm7, %v2246_v6 }
 0xba1   : > { %3628 = vmatprep.mubr.msk.bf16.mxu0 %vm4575_vm6, %v4574_v17 }
 0xba3   : > { %v2357_v7 = vpop.permute.xlu1 %2356  ;;  %v2464_v13 = vpop.permute.xlu0 %2463 }
 0xba4   : > { %v2362_v8 = vsel %vm1435_vm7, %v2357_v7, 0 }
 0xba5   : > { %3627 = vmatpush3.bf16.xpose.msra.mxu0 %v2362_v8 }
 0xba6   : > { %3638 = vmatprep.subr.bf16.mxu0 %v4574_v17 }
 0xba7   : > { %v2466_v10 = vpop.permute.xlu1 %2465 }
 0xba8   : > { %v2471_v12 = vsel %vm1435_vm7, %v2466_v10, 0 }
 0xbac   : > { %3629 = vmatmul.mubr.msk.bf16.vlgmr.msra.gmra.mrb[28].mxu0 %vm1435_vm7, %v2355_v11 }
 0xbad   : > { %3639 = vmatpush3.bf16.xpose.msra.mxu0 %v2471_v12  ;;  %3640 = vmatprep.mubr.msk.bf16.mxu0 %vm4575_vm6, %v4574_v17 }
 0xbae   : > { %3650 = vmatprep.subr.bf16.mxu0 %v4574_v17 }
 0xbb4   : > { %3641 = vmatmul.mubr.msk.bf16.vlgmr.msra.gmra.mrb[32].mxu0 %vm1435_vm7, %v2464_v13 }
 0xbb5   : > { %3654 = vmatprep.mubr.msk.bf16.mxu0 %vm4575_vm6, %v4574_v17 }
 0xc01   : > { %v2172_v19 = vpop.f32.mrb[20].mxu0 }
 0xc02   : > { %v2184_v5 = vsel %vm2183_vm11, %v2172_v19, -1e+30  ;;  %v3606_v20 = vpop.f32.mrb[21].mxu0 }
 0xc03   : > { %v2175_v21 = vpop.f32.mrb[22].mxu0  ;;  %v2185_v22 = vsel %vm1890_vm9, %v2184_v5, -inf }
 0xc04   : > { %2186 = vmax.xlane.f32.xlu1 %v2185_v22  ;;  %v3607_v23 = vpop.f32.mrb[23].mxu0 }
 0xc73   : > { %v2289_v24 = vpop.f32.mrb[24].mxu0 }
 0xc74   : > { %v2295_v26 = vsel %vm2183_vm11, %v2289_v24, -1e+30  ;;  %v3618_v27 = vpop.f32.mrb[25].mxu0 }
 0xc75   : > { %v2292_v1 = vpop.f32.mrb[26].mxu0  ;;  %v2296_v28 = vsel %vm1890_vm9, %v2295_v26, -inf }
 0xc76   : > { %2297 = vmax.xlane.f32.xlu0 %v2296_v28  ;;  %v3619_v4 = vpop.f32.mrb[27].mxu0  ;;  %v3906_v28 = vld [vmem:[%s5969_s4] sm:$0xff]  }
 0xc77   : > { %3651 = vmatpush3.bf16.msra.mxu0 %v3906_v28  ;;  %v3907_v4 = vld [vmem:[%s5970_s16 + $0x8] sm:$0xff]  }
 0xc78   : > { %3652 = vmatprep.subr.bf16.mxu0 %v4574_v17 }
 0xc7b   : > { %3653 = vmatpush3.bf16.msra.mxu0 %v3907_v4 }
 0xc7c   : > { %3666 = vmatprep.subr.bf16.mxu0 %v4574_v17 }
 0xc7f   : > { %v2398_v29 = vpop.f32.mrb[28].mxu0 }
 0xc80   : > { %v2404_v30 = vsel %vm2183_vm11, %v2398_v29, -1e+30  ;;  %v3630_v31 = vpop.f32.mrb[29].mxu0 }
 0xc81   : > { %v2401_v32 = vpop.f32.mrb[30].mxu0  ;;  %v2405_v33 = vsel %vm1890_vm9, %v2404_v30, -inf }
 0xc82   : > { %2406 = vmax.xlane.f32.xlu0 %v2405_v33  ;;  %v3631_v9 = vpop.f32.mrb[31].mxu0 }
 0xc87   : > { %v2507_v35 = vpop.f32.mrb[32].mxu0 }
 0xc88   : > { %v2513_v36 = vsel %vm2183_vm11, %v2507_v35, -1e+30  ;;  %v3642_v37 = vpop.f32.mrb[33].mxu0 }
 0xc89   : > { %v2510_v38 = vpop.f32.mrb[34].mxu0  ;;  %v2514_v34 = vsel %vm1890_vm9, %v2513_v36, -inf }
 0xc8a   : > { %2515 = vmax.xlane.f32.xlu1 %v2514_v34  ;;  %v3643_v39 = vpop.f32.mrb[35].mxu0 }
 0xc91   : > { %v2187_v40 = vpop.xlane.xlu1 %2186 }
 0xc92   : > { %v2188_v41 = vsub.f32 %v2184_v5, %v2187_v40 }
 0xc94   : > { %v2189_v42 = vmul.f32 1.442695, %v2188_v41 }
 0xc96   : > { %3934 = vpow2.f32 %v2189_v42 }
 0xca0   : > { %v3935_v43 = vpop.eup %3934 }
 0xca1   : > { %v2191_v44 = vsel %vm1890_vm9, %v3935_v43, 0.0 }
 0xca2   : > { %2192 = vadd.xlane.f32.xlu0 %v2191_v44 }
 0xd03   : > { %v2298_v45 = vpop.xlane.xlu0 %2297 }
 0xd04   : > { %v2299_v46 = vsub.f32 %v2295_v26, %v2298_v45 }
 0xd06   : > { %v2300_v47 = vmul.f32 1.442695, %v2299_v46 }
 0xd08   : > { %3936 = vpow2.f32 %v2300_v47 }
 0xd0f   : > { %v2407_v48 = vpop.xlane.xlu0 %2406 }
 0xd10   : > { %v2408_v49 = vsub.f32 %v2404_v30, %v2407_v48 }
 0xd12   : > { %v3937_v50 = vpop.eup %3936  ;;  %v2409_v51 = vmul.f32 1.442695, %v2408_v49 }
 0xd13   : > { %v2302_v52 = vsel %vm1890_vm9, %v3937_v50, 0.0 }
 0xd14   : > { %3938 = vpow2.f32 %v2409_v51  ;;  %2303 = vadd.xlane.f32.xlu1 %v2302_v52 }
 0xd17   : > { %v2516_v55 = vpop.xlane.xlu1 %2515 }
 0xd18   : > { %v2517_v57 = vsub.f32 %v2513_v36, %v2516_v55 }
 0xd1a   : > { %v2518_v58 = vmul.f32 1.442695, %v2517_v57 }
 0xd1c   : > { %3940 = vpow2.f32 %v2518_v58 }
 0xd1e   : > { %v3939_v53 = vpop.eup %3938 }
 0xd1f   : > { %v2411_v54 = vsel %vm1890_vm9, %v3939_v53, 0.0 }
 0xd20   : > { %2412 = vadd.xlane.f32.xlu0 %v2411_v54 }
 0xd25   : > { %2308 = vrot.lane.b32.xlu1 %v5587_v56, %s4578_s15 }
 0xd26   : > { %v3941_v59 = vpop.eup %3940 }
 0xd27   : > { %v2520_v60 = vsel %vm1890_vm9, %v3941_v59, 0.0 }
 0xd2f   : > { %v2193_v61 = vpop.xlane.xlu0 %2192 }
 0xd30   : > { %3942 = vrcp.f32 %v2193_v61 }
 0xd36   : > { %2198 = vrot.lane.b32.xlu0 %v5587_v56, %s4577_s24  ;;  %s5972_s24 = scalar_lea.vmem [#allocation20], %s5375_s30 }
 0xd37   : > { %v3908_v57 = vld [vmem:[%s5972_s24] sm:$0xff]   ;;  %s5973_s15 = smov %s5972_s24 }
 0xd38   : > { %v3909_v58 = vld [vmem:[%s5973_s15 + $0x8] sm:$0xff]  }
 0xd3a   : > { %2526 = vrot.lane.b32.xlu0 %v5587_v56, %s4581_s25  ;;  %v3943_v63 = vpop.eup %3942  ;;  %s5975_s25 = scalar_lea.vmem %s5974_s11, %s5406_s8 }
 0xd3b   : > { %v2195_v2 = vmul.f32 %v3943_v63, %v3935_v43  ;;  %v3427_v43 = vld [vmem:[%s5971_s18] ss:$0 sm:$0xff] }
 0xd3d   : > { %v2196_v6 = vpack.c.bf16 %v2195_v2, %v2195_v2 }
 0xd49   : > { %2521 = vadd.xlane.f32.xlu1 %v2520_v60 }
 0xd5a   : > { %2417 = vrot.lane.b32.xlu1 %v5587_v56, %s4579_s10 }
 0xda1   : > { %v2304_v62 = vpop.xlane.xlu1 %2303 }
 0xda2   : > { %3944 = vrcp.f32 %v2304_v62 }
 0xda5   : > { %v2309_v8 = vpop.permute.xlu1 %2308 }
 0xdac   : > { %v3945_v7 = vpop.eup %3944 }
 0xdad   : > { %v2413_v0 = vpop.xlane.xlu0 %2412  ;;  %v2306_v56 = vmul.f32 %v3945_v7, %v3937_v50 }
 0xdae   : > { %3946 = vrcp.f32 %v2413_v0  ;;  %v3433_v0 = vld [vmem:[%s5368_s22 + $0x2] ss:$0 sm:$0xff]  ;;  %s5976_s22 = scalar_lea.vmem [#allocation21], %s5365_s2 }
 0xdaf   : > { %v2307_v10 = vpack.c.bf16 %v2306_v56, %v2306_v56  ;;  %v3912_v56 = vld [vmem:[%s5439_s5 + $0x10] sm:$0xff]  }
 0xdb1   : > { %v2199_v3 = vpop.permute.xlu0 %2198 }
 0xdb2   : > { %3609 = vmatpush3.bf16.msra.mxu1 %v2199_v3  ;;  %v3434_v3 = vld [vmem:[%s5377_s19 + $0x2] ss:$0 sm:$0xff] }
 0xdb3   : > { %3620 = vmatprep.subr.bf16.mxu1 %v4574_v17 }
 0xdb5   : > { %3611 = vmatmul.mubr.msk.bf16.vlgmr.msra.gmra.mrb[28].mxu1 %vm1890_vm9, %v2196_v6  ;;  %v2527_v16 = vpop.permute.xlu0 %2526 }
 0xdb6   : > { %3621 = vmatpush3.bf16.msra.mxu1 %v2309_v8  ;;  %3622 = vmatprep.mubr.msk.bf16.mxu1 %vm4575_vm6, %v4574_v17 }
 0xdb7   : > { %3632 = vmatprep.subr.bf16.mxu1 %v4574_v17 }
 0xdb8   : > { %v3947_v11 = vpop.eup %3946 }
 0xdb9   : > { %v2415_v13 = vmul.f32 %v3947_v11, %v3939_v53  ;;  %v3435_v11 = vld [vmem:[%s5975_s25] ss:$0 sm:$0xff] }
 0xdbb   : > { %v2416_v15 = vpack.c.bf16 %v2415_v13, %v2415_v13 }
 0xdbd   : > { %3623 = vmatmul.mubr.msk.bf16.vlgmr.msra.gmra.mrb[32].mxu1 %vm1890_vm9, %v2307_v10  ;;  %v3913_v10 = vld [vmem:[%s5439_s5 + $0x18] sm:$0xff]  }
 0xdbe   : > { %3634 = vmatprep.mubr.msk.bf16.mxu1 %vm4575_vm6, %v4574_v17 }
 0xdd6   : > { %v2522_v12 = vpop.xlane.xlu1 %2521 }
 0xdd7   : > { %3948 = vrcp.f32 %v2522_v12 }
 0xdda   : > { %v2418_v14 = vpop.permute.xlu1 %2417 }
 0xddb   : > { %3633 = vmatpush3.bf16.msra.mxu1 %v2418_v14 }
 0xddc   : > { %3644 = vmatprep.subr.bf16.mxu1 %v4574_v17 }
 0xdde   : > { %3635 = vmatmul.mubr.msk.bf16.vlgmr.msra.gmra.mrb[36].mxu1 %vm1890_vm9, %v2416_v15 }
 0xddf   : > { %3645 = vmatpush3.bf16.msra.mxu1 %v2527_v16  ;;  %3646 = vmatprep.mubr.msk.bf16.mxu1 %vm4575_vm6, %v4574_v17 }
 0xde0   : > { %3658 = vmatprep.subr.bf16.mxu1 %v4574_v17 }
 0xde1   : > { %v3949_v18 = vpop.eup %3948 }
 0xde2   : > { %v2524_v19 = vmul.f32 %v3949_v18, %v3941_v59  ;;  %v3911_v59 = vld [vmem:[%s5439_s5 + $0x8] sm:$0xff]  }
 0xde4   : > { %v2525_v5 = vpack.c.bf16 %v2524_v19, %v2524_v19 }
 0xde6   : > { %3647 = vmatmul.mubr.msk.bf16.vlgmr.msra.gmra.mrb[40].mxu1 %vm1890_vm9, %v2525_v5  ;;  %v3439_v5 = vld [vmem:[%s5976_s22] ss:$0 sm:$0xff] }
 0xde7   : > { %3662 = vmatprep.mubr.msk.bf16.mxu1 %vm4575_vm6, %v4574_v17  ;;  %3659 = vmatpush3.bf16.msra.mxu1 %v3908_v57 }
 0xde8   : > { %3660 = vmatprep.subr.bf16.mxu1 %v4574_v17 }
 0xdeb   : > { %3661 = vmatpush3.bf16.msra.mxu1 %v3909_v58 }
 0xe88   : > { %v2238_v20 = vpop.f32.mrb[28].mxu1 }
 0xe89   : > { %v3612_v21 = vpop.f32.mrb[29].mxu1 }
 0xe8a   : > { %v2241_v22 = vpop.f32.mrb[30].mxu1 }
 0xe8b   : > { %v3613_v23 = vpop.f32.mrb[31].mxu1 }
 0xe90   : > { %v2348_v24 = vpop.f32.mrb[32].mxu1 }
 0xe91   : > { %2573 = vrot.lane.b32.xlu1 %v2348_v24, %s4587_s20  ;;  %v3624_v26 = vpop.f32.mrb[33].mxu1 }
 0xe92   : > { %v2351_v27 = vpop.f32.mrb[34].mxu1 }
 0xe93   : > { %v3625_v1 = vpop.f32.mrb[35].mxu1 }
 0xeb1   : > { %v2457_v29 = vpop.f32.mrb[36].mxu1 }
 0xeb2   : > { %2577 = vrot.lane.b32.xlu0 %v2457_v29, %s4588_s17  ;;  %v3636_v30 = vpop.f32.mrb[37].mxu1 }
 0xeb3   : > { %v2460_v31 = vpop.f32.mrb[38].mxu1 }
 0xeb4   : > { %v3637_v32 = vpop.f32.mrb[39].mxu1 }
 0xeb9   : > { %v2566_v33 = vpop.f32.mrb[40].mxu1 }
 0xeba   : > { %2581 = vrot.lane.b32.xlu1 %v2566_v33, %s4589_s29  ;;  %v3648_v9 = vpop.f32.mrb[41].mxu1 }
 0xebb   : > { %v2569_v35 = vpop.f32.mrb[42].mxu1 }
 0xebc   : > { %v3649_v36 = vpop.f32.mrb[43].mxu1 }
 0xf03   : > { %v2574_v37 = vpop.permute.xlu1 %2573 }
 0xf04   : > { %v2584_v34 = vsel %vm1435_vm7, %v2238_v20, %v2574_v37 }
 0xf24   : > { %v2578_v38 = vpop.permute.xlu0 %2577 }
 0xf25   : > { %v2585_v39 = vsel %vm1890_vm9, %v2584_v34, %v2578_v38 }
 0xf2c   : > { %v2582_v40 = vpop.permute.xlu1 %2581 }
 0xf2d   : > { %v2586_v41 = vsel %vm1892_vm10, %v2585_v39, %v2582_v40 }
 0xf2e   : > { %v2592_v42 = vpack.c.bf16 %v2586_v41, %v2586_v41 }
 0xf30   : > { %3655 = vmatmul.mubr.msk.bf16.vlgmr.msra.gmra.mrb[36].mxu0 %vm1335_vm5, %v2592_v42 }
 0xf31   : > { %3674 = vmatprep.mubr.msk.bf16.mxu0 %vm4575_vm6, %v4574_v17 }
0x1003   : > { %v2648_v44 = vpop.f32.mrb[36].mxu0 }
0x1004   : > { %v2649_v45 = vadd.f32 %v3427_v43, %v2648_v44  ;;  %v3656_v46 = vpop.f32.mrb[37].mxu0 }
0x1005   : > { %v2651_v47 = vpop.f32.mrb[38].mxu0 }
0x1006   : > { %v2654_v48 = vadd.f32 %v2649_v45, %v5559_v25  ;;  %v3657_v49 = vpop.f32.mrb[39].mxu0  ;;  %v3910_v25 = vld [vmem:[%s5439_s5] sm:$0xff]   ;;  %s5977_s5 = sld [smem:[#allocation36_spill]] }
0x1007   : > { %3667 = vmatpush3.bf16.msra.mxu0 %v3910_v25 }
0x1008   : > { %v2659_v50 = vsel %vm1335_vm5, %v2654_v48, 0.0  ;;  %3668 = vmatprep.subr.bf16.mxu0 %v4574_v17 }
0x1009   : > { %2660 = vadd.xlane.f32.xlu0 %v2659_v50 }
0x100b   : > { %3669 = vmatpush3.bf16.msra.mxu0 %v3911_v59 }
0x100c   : > { %3670 = vmatprep.subr.bf16.mxu0 %v4574_v17  ;;  %p3445_p7 = scmp.ne.s32.totalorder %s5977_s5, 1 }
0x100d   : > { %s5978_s8 = sld [smem:[#allocation68_spill]] (!%p3445_p7)  ;;  %v4591_v31 = vmov (!%p3445_p7), 0.0   ;;  %vm4592_vm13 = vmmov (!%p3445_p7), 0   ;;  %s5979_s26 = sld [smem:[#allocation66_spill]] (!%p3445_p7)  ;;  %v3447_v34 = vld [vmem:[#allocation22] ss:$0 sm:$0xff] (!%p3445_p7) }
0x100e   : > { %s5980_s29 = sld [smem:[#allocation69_spill]] (!%p3445_p7) }
0x100f   : > { %3671 = vmatpush3.bf16.msra.mxu0 %v3912_v56 }
0x1010   : > { %3672 = vmatprep.subr.bf16.mxu0 %v4574_v17 }
0x1013   : > { %3673 = vmatpush3.bf16.msra.mxu0 %v3913_v10  ;;  %v3952_v30 = vld [vmem:[%s5978_s8] sm:$0xff] (!%p3445_p7)   ;;  %v3953_v32 = vld [vmem:[%s5978_s8 + $0x8] sm:$0xff] (!%p3445_p7)  }
0x1014   : > { %3678 = vmatprep.subr.bf16.mxu0 (!%p3445_p7), %v4591_v31  ;;  %v3446_v37 = vld [vmem:[%s5979_s26] ss:$0 sm:$0xff] (!%p3445_p7) }
0x1015   : > { %v3448_v42 = vld [vmem:[%s5980_s29] ss:$0 sm:$0xff] (!%p3445_p7) }
0x1096   : > { %v2661_v51 = vpop.xlane.xlu0 %2660 }
0x1097   : > { %v2662_v52 = vmul.f32 0.03125, %v2661_v51 }
0x1099   : > { %v2663_v53 = vsub.f32 %v2654_v48, %v2662_v52 }
0x109b   : > { %v2664_v54 = vmul.f32 %v2663_v53, %v2663_v53 }
0x109d   : > { %v2665_v55 = vsel %vm1335_vm5, %v2664_v54, 0.0 }
0x109e   : > { %2666 = vadd.xlane.f32.xlu1 %v2665_v55 }
0x112b   : > { %v2667_v60 = vpop.xlane.xlu1 %2666 }
0x112c   : > { %v2668_v61 = vmul.f32 0.03125, %v2667_v60 }
0x112e   : > { %v2669_v62 = vadd.f32 1e-05, %v2668_v61 }
0x1130   : > { %3950 = vrsqrt.f32 %v2669_v62 }
0x113a   : > { %v3951_v63 = vpop.eup %3950 }
0x113b   : > { %v2671_v2 = vmul.f32 %v3951_v63, %v2663_v53 }
0x113d   : > { %v2678_v6 = vmul.f32 %v3433_v0, %v2671_v2 }
0x113f   : > { %v2685_v7 = vadd.f32 %v3434_v3, %v2678_v6 }
0x1141   : > { %v2691_v8 = vpack.c.bf16 %v2685_v7, %v2685_v7 }
0x1143   : > { %3663 = vmatmul.mubr.msk.bf16.vlgmr.msra.gmra.mrb[44].mxu1 %vm1335_vm5, %v2691_v8 }
0x1216   : > { %v2747_v12 = vpop.f32.mrb[44].mxu1 }
0x1217   : > { %v2748_v13 = vadd.f32 %v3435_v11, %v2747_v12  ;;  %v3664_v14 = vpop.f32.mrb[45].mxu1 }
0x1218   : > { %v2750_v15 = vpop.f32.mrb[46].mxu1 }
0x1219   : > { %v2753_v16 = vmax.f32 %v2748_v13, 0.0  ;;  %v3665_v18 = vpop.f32.mrb[47].mxu1 }
0x121b   : > { %v2763_v19 = vpack.c.bf16 %v2753_v16, %v2753_v16 }
0x121d   : > { %3675 = vmatmul.mubr.msk.bf16.vlgmr.msra.gmra.mrb[40].mxu0 %vm2794_vm12, %v2763_v19 }
0x121e   : > { %3682 = vmatprep.mubr.msk.bf16.mxu0 (!%p3445_p7), %vm4592_vm13, %v4591_v31  ;;  %3679 = vmatpush3.bf16.msra.mxu0 (!%p3445_p7), %v3952_v30 }
0x121f   : > { %3680 = vmatprep.subr.bf16.mxu0 (!%p3445_p7), %v4591_v31 }
0x1222   : > { %3681 = vmatpush3.bf16.msra.mxu0 (!%p3445_p7), %v3953_v32 }
0x12ef   : > { %2843 = sbr.rel (%p3445_p7) target bundleno = 5385 (0x1509), region = 184 }
0x12f0   : > { %v2832_v20 = vpop.f32.mrb[40].mxu0 }
0x12f1   : > { %v2833_v17 = vadd.f32 %v3439_v5, %v2832_v20  ;;  %v3676_v21 = vpop.f32.mrb[41].mxu0 }
0x12f2   : > { %v2835_v22 = vpop.f32.mrb[42].mxu0 }
0x12f3   : > { %v2838_v23 = vadd.f32 %v2833_v17, %v2654_v48  ;;  %v3677_v24 = vpop.f32.mrb[43].mxu0 }
0x12f5   : > { %2839 = vst.msk [vmem:[#allocation2] sm:$0xff] %vm1335_vm5, %v2838_v23  ;;  %v2846_v26 = vsel (!%p3445_p7), %vm1335_vm5, %v2838_v23, 0.0 }
0x12f6   : > { %2847 = vadd.xlane.f32.xlu0 %v2846_v26 }
0x1383   : > { %v2848_v27 = vpop.xlane.xlu0 %2847 }
0x1384   : > { %v2849_v1 = vmul.f32 0.03125, %v2848_v27 }
0x1386   : > { %v2850_v28 = vsub.f32 %v2838_v23, %v2849_v1 }
0x1388   : > { %v2851_v4 = vmul.f32 %v2850_v28, %v2850_v28 }
0x138a   : > { %v2852_v29 = vsel %vm1335_vm5, %v2851_v4, 0.0 }
0x138b   : > { %2853 = vadd.xlane.f32.xlu0 %v2852_v29 }
0x1418   : > { %v2854_v33 = vpop.xlane.xlu0 %2853 }
0x1419   : > { %v2855_v9 = vmul.f32 0.03125, %v2854_v33 }
0x141b   : > { %v2856_v35 = vadd.f32 1e-05, %v2855_v9 }
0x141d   : > { %3954 = vrsqrt.f32 %v2856_v35 }
0x1427   : > { %v3955_v36 = vpop.eup %3954 }
0x1428   : > { %v2858_v38 = vmul.f32 %v3955_v36, %v2850_v28 }
0x142a   : > { %v2865_v39 = vmul.f32 %v3446_v37, %v2858_v38 }
0x142c   : > { %v2872_v40 = vadd.f32 %v3447_v34, %v2865_v39 }
0x142e   : > { %v2878_v41 = vpack.c.bf16 %v2872_v40, %v2872_v40 }
0x1430   : > { %3683 = vmatmul.mubr.msk.bf16.vlgmr.msra.gmra.mrb[0].mxu0 %vm1335_vm5, %v2878_v41 }
0x1503   : > { %v2934_v43 = vpop.f32.mrb[0].mxu0 }
0x1504   : > { %v2935_v44 = vadd.f32 %v3448_v42, %v2934_v43  ;;  %v3684_v45 = vpop.f32.mrb[1].mxu0 }
0x1505   : > { %v2937_v46 = vpop.f32.mrb[2].mxu0 }
0x1506   : > { %v2940_v47 = vpack.c.bf16 %v2935_v44, %v2935_v44  ;;  %v3685_v48 = vpop.f32.mrb[3].mxu0 }
0x1508   : > { %2941 = vst [vmem:[%s5441_s28] sm:$0xf] %v2940_v47 }
0x1509 PF: > { %s5981_s13 = sld [smem:[#allocation37_spill]]  ;;  %s5982_s1 = sld [smem:[#allocation70_spill]] }
0x150a   : > { %s2956_s16 = sshll.u32 %s5441_s28, 4  ;;  %s2943_s18 = scalar_lea.sflag [#allocation7], %s5346_s12  ;;  %s2957_s16 = int_to_ptr.vmem [resolvable:$true] %s2956_s16 }
0x150b   : > { %s4412_s24 = scalar_lea.vmem %s2957_s16, 64  ;;  %p5983_p1 = scmp.ne.s32.totalorder %s5934_s23, 0 }
0x150c   : > { %p4413_p3 = scmp.ne.s32.totalorder %s2957_s16, %s4412_s24  ;;  %s4593_s15 = smov [#allocation23]  }
0x150d   : > { %s4416_s30 = sshll.u32 %s4593_s15, 4  ;;  %s4417_s30 = int_to_ptr.vmem [resolvable:$false] %s4416_s30 }
0x150e   : > { %p4414_p12 = pnand %p4413_p3, %p5983_p1  ;;  %s4418_s10 = scalar_lea.vmem %s4417_s30, 128 }
0x150f   : > { %s3453_s9 = sshll.u32 %s5981_s13, 6  ;;  %p4419_p11 = scmp.lt.s32.totalorder %s2957_s16, %s4417_s30 }
0x1510   : > { %s5724_s4 = scalar_lea.hbm %s5982_s1, %s3453_s9  ;;  %p4415_p8 = pneg %p4414_p12 }
0x1511   : > { %p4420_p5 = scmp.lt.s32.totalorder %s4418_s10, %s4412_s24 }
0x1513   : > { %p4421_p6 = por %p4420_p5, %p4419_p11 }
0x1515   : > { %p4422_p4 = pnand %p4421_p6, %p4415_p8 }
0x1517   : > { %4425 = shalt.err (!%p4422_p4)
}
0x1518   : > { %s4426_s28 = scalar_lea.hbm %s5724_s4, 64  ;;  %s4430_s25 = scalar_lea.hbm %s5982_s1, 128 }
0x1519   : > { %p4427_p2 = scmp.ne.s32.totalorder %s5724_s4, %s4426_s28  ;;  %p4431_p9 = scmp.lt.u32.totalorder %s5724_s4, %s5982_s1 }
0x151a   : > { %p4432_p10 = scmp.lt.u32.totalorder %s4430_s25, %s4426_s28  ;;  %p4434_p3 = scmp.lt.u32.totalorder %s4426_s28, %s5724_s4 }
0x151b   : > { %p4428_p0 = pnand %p4427_p2, %p5983_p1 }
0x151c   : > { %p4433_p7 = por %p4432_p10, %p4431_p9 }
0x151d   : > { %p4429_p13 = pneg %p4428_p0 }
0x151e   : > { %p4435_p12 = por %p4434_p3, %p4433_p7 }
0x1520   : > { %p4436_p8 = pnand %p4435_p12, %p4429_p13 }
0x1522   : > { %4439 = shalt.err (!%p4436_p8)
}
0x1523   : > { %3725 = dma.vmem_to_hbm [thread:$0]  (%p5983_p1), %s2957_s16, 64, %s5724_s4, %s2943_s18  }
0x1524 PF: > { %s5984_s2 = sld [smem:[#allocation33_spill]]  ;;  %s5985_s19 = sld [smem:[#allocation44_spill]] }
0x1525   : > { %p3783_p11 = scmp.ge.s32.totalorder %s4552_s7, 2 }
0x152a   : > { %s2968_s14 = sand.u32 1, %s5984_s2   ;;  %p5986_p5 = scmp.ne.s32.totalorder %s5985_s19, 0 }
0x152b   : > { %s2969_s27 = scalar_lea.sflag [#allocation7], %s2968_s14 }
0x152c   : > { %p3775_p6 = pnand %p3783_p11, %p5986_p5 }
0x152e   : > { %4507 = dma.done.wait (!%p3775_p6), %s2969_s27, 64  }
0x152f   : > { %4509 = vsyncadd (!%p3775_p6), %s2969_s27, 4294967232  ;;  %s46_s7 = sadd.s32 1, %s4552_s7   ;;  %s5987_s4 = sld [smem:[#allocation31_spill]] }
0x1530   : > { %p43_p4 = scmp.ge.s32.totalorder %s46_s7, 6   ;;  %s5988_s28 = sld [smem:[#allocation32_spill]] }
0x1531   : > { %s5989_s19 = sld [smem:[#allocation42_spill]]  ;;  %s5990_s9 = sld [smem:[#allocation34_spill]] }
0x1532   : > { %s5991_s5 = sld [smem:[#allocation35_spill]]  ;;  %s5992_s0 = sld [smem:[#allocation43_spill]] }
0x1533   : > { %s5993_s29 = sld [smem:[#allocation38_spill]]  ;;  %s5994_s2 = sld [smem:[#allocation39_spill]] }
0x1534   : > { %s5995_s6 = sld [smem:[#allocation40_spill]]  ;;  %s5996_s30 = sld [smem:[#allocation41_spill]] }
0x1535   :  { %45 = sbr.rel (!%p43_p4) target bundleno = 43 (0x2b), region = 331 }
0x153c   :  { %2974 = vsyncpa [#allocation6], 1 }
0x153d   :  { %2976 = vsyncpa [#allocation6 + $0x1], 1 }
0x153e   :  { %2977 = vsyncpa [#allocation9], 1 }
0x153f   :  { %2978 = vsyncpa [#allocation7], 1 }
0x1540   :  { %2980 = vsyncpa [#allocation7 + $0x1], 1 }

</bundles_post_ra>
